<compile_context>
chip_gen: v5e
topology: v5e:2x2
jax: 0.10.0
libtpu: 0.0.40
codegen_flags: <defaults>
</compile_context>

<pallas_src>
import numpy as np
import jax
import jax.numpy as jnp
from jax.experimental import pallas as pl
from jax.experimental.pallas import tpu as pltpu


_LEAKY_SLOPE = 0.01   # matches nn.LeakyReLU(0.01) in the reference module
_ROW_SLACK = 2        # extra zero rows so virtual-width tap reads stay in bounds
# MXU input dtype.  float32 keeps exact parity with the f32 reference at these
# sizes; at production sizes on v6e/v7x set this to jnp.bfloat16 (accumulation
# stays f32 via preferred_element_type) and loosen the test tolerance to ~1e-2.
_MXU_DTYPE = jnp.float32


# ----------------------------------------------------------------------------
# Fused forward kernel: all conv layers + LeakyReLU + conv1 head in one call
# ----------------------------------------------------------------------------
def _build_kernel(layer_dims, head):
    n_layers = len(layer_dims)

    def kernel(*refs):
        x_ref = refs[0]
        wb_refs = refs[1:1 + 2 * n_layers]
        wh_ref = refs[1 + 2 * n_layers]
        out_ref = refs[2 + 2 * n_layers]
        scratch = refs[3 + 2 * n_layers:]
        pad_refs = scratch[:n_layers]                # flat zero-padded activations
        gemm_refs = scratch[n_layers:2 * n_layers]   # virtual-width GEMM results
        head_ref = scratch[2 * n_layers]             # head accumulator

        src = x_ref                                  # flat padded layer input (rows, Cin)
        for l, d in enumerate(layer_dims):
            ho, wo = d["h_out"], d["w_out"]
            cout = d["c_out"]
            wp_in = d["w_in"] + 2                    # padded input row length
            m = ho * wp_in                           # GEMM rows (incl. junk columns)
            w_ref, b_ref = wb_refs[2 * l], wb_refs[2 * l + 1]

            # --- 4x4 / stride-2 conv as 16 strided-tap GEMMs (in-VMEM im2col) ---
            # Bias initialises the accumulator (saves one (m, cout) VPU add).
            acc = jnp.broadcast_to(b_ref[...].astype(jnp.float32), (m, cout))
            for ki in range(4):
                for kj in range(4):
                    tap = src[pl.ds(ki * wp_in + kj, m, 2), :]          # (m, cin)
                    acc = acc + jnp.dot(
                        tap.astype(_MXU_DTYPE),
                        w_ref[ki * 4 + kj].astype(_MXU_DTYPE),          # (cin, cout)
                        preferred_element_type=jnp.float32)
            # LeakyReLU(0.01) == max(x, 0.01*x): 2 VPU ops (mul + max).
            acc = jnp.maximum(acc, _LEAKY_SLOPE * acc)
            gemm_refs[l][...] = acc

            # --- scatter valid rows into the next layer's padded flat scratch ---
            wp_out = wo + 2
            p_ref = pad_refs[l]
            p_ref[...] = jnp.zeros_like(p_ref)       # zero pad border + slack rows
            for oh in range(ho):
                p_ref[pl.ds((oh + 1) * wp_out + 1, wo), :] = (
                    gemm_refs[l][pl.ds(oh * wp_in, wo), :])
            src = p_ref

        # --- conv1 head: 3x3 / stride 1 / pad 1, no bias, Cout = 1 --------------
        hf, wf, c = head["h"], head["w"], head["c"]
        wp = wf + 2
        m = hf * wp
        # Accumulate tap products channel-wise (VPU), reduce across lanes ONCE.
        prod = jnp.zeros((m, c), jnp.float32)
        for ki in range(3):
            for kj in range(3):
                tap = src[pl.ds(ki * wp + kj, m), :]                    # (m, c) contiguous
                prod = prod + tap * wh_ref[ki * 3 + kj]                 # (1, c) bcast
        head_ref[...] = jnp.sum(prod, axis=-1, keepdims=True)           # 1 XLU reduce
        for oh in range(hf):
            out_ref[pl.ds(oh * wf, wf), :] = head_ref[pl.ds(oh * wp, wf), :]

    return kernel


# ----------------------------------------------------------------------------
# Parameter init (matches the PyTorch module's __init__) and one-time packing
# ----------------------------------------------------------------------------
def init_discriminator_params(key, image_size=16, conv_dim=8, c_dim=5, repeat_num=2):
    params = {"main": []}
    cin, curr = 3, conv_dim
    k_w, k_b, key = jax.random.split(key, 3)
    params["main"].append((
        0.05 * jax.random.normal(k_w, (curr, cin, 4, 4), jnp.float32),
        0.01 * jax.random.normal(k_b, (curr,), jnp.float32)))
    for _ in range(1, repeat_num):
        k_w, k_b, key = jax.random.split(key, 3)
        params["main"].append((
            0.05 * jax.random.normal(k_w, (curr * 2, curr, 4, 4), jnp.float32),
            0.01 * jax.random.normal(k_b, (curr * 2,), jnp.float32)))
        curr *= 2
    k1, k2 = jax.random.split(key)
    params["conv1_w"] = 0.05 * jax.random.normal(k1, (1, curr, 3, 3), jnp.float32)
    # conv2 exists in __init__ but is unused by forward(); kept for fidelity.
    ks = int(image_size / np.power(2, repeat_num))
    params["conv2_w"] = 0.05 * jax.random.normal(k2, (c_dim, curr, ks, ks), jnp.float32)
    return params


def pack_discriminator_params(params):
    """One-time repack of PyTorch OIHW weights into (taps, Cin, Cout) GEMM form."""
    packed = {"main": []}
    for w, b in params["main"]:
        cout, cin, kh, kw = w.shape
        packed["main"].append((
            jnp.transpose(w, (2, 3, 1, 0)).reshape(kh * kw, cin, cout),
            b.reshape(1, cout)))
    wh = params["conv1_w"]                                   # (1, C, 3, 3)
    packed["head"] = jnp.transpose(wh, (2, 3, 0, 1)).reshape(9, 1, wh.shape[1])
    return packed


# ----------------------------------------------------------------------------
# Forward wrapper: one fused pallas_call, grid over batch
# ----------------------------------------------------------------------------
def _layer_geometry(x_shape, packed):
    n, c0, h, w = x_shape
    dims = []
    hh, ww, cin = h, w, c0
    for w_mat, _ in packed["main"]:
        taps, wcin, cout = w_mat.shape
        assert taps == 16 and wcin == cin
        assert hh % 2 == 0 and ww % 2 == 0
        dims.append(dict(h_in=hh, w_in=ww, c_in=cin,
                         h_out=hh // 2, w_out=ww // 2, c_out=cout))
        hh, ww, cin = hh // 2, ww // 2, cout
    head = dict(h=hh, w=ww, c=cin)
    return dims, head


@jax.jit
def discriminator_forward(x_nchw, packed):
    n, c0, h, w = x_nchw.shape
    dims, head = _layer_geometry(x_nchw.shape, packed)
    hf, wf = head["h"], head["w"]

    # NCHW -> NHWC, zero-pad spatially (+1 conv halo, +_ROW_SLACK slack rows so
    # in-kernel virtual-width tap reads stay in bounds), flatten rows per image.
    x_nhwc = jnp.transpose(x_nchw, (0, 2, 3, 1))
    x_pad = jnp.pad(x_nhwc, ((0, 0), (1, 1 + _ROW_SLACK), (1, 1), (0, 0)))
    rows0 = (h + 2 + _ROW_SLACK) * (w + 2)
    x_flat = x_pad.reshape(n, rows0, c0)

    # One image per grid step; weights / biases broadcast across the grid
    # (constant block index -> fetched once, not re-DMA'd each step).
    in_specs = [pl.BlockSpec((None, rows0, c0), lambda i: (i, 0, 0))]
    inputs = [x_flat]
    for w_mat, b_row in packed["main"]:
        in_specs.append(pl.BlockSpec(w_mat.shape, lambda i: (0, 0, 0)))
        in_specs.append(pl.BlockSpec(b_row.shape, lambda i: (0, 0)))
        inputs += [w_mat, b_row]
    in_specs.append(pl.BlockSpec(packed["head"].shape, lambda i: (0, 0, 0)))
    inputs.append(packed["head"])

    out_specs = pl.BlockSpec((None, hf * wf, 1), lambda i: (i, 0, 0))
    out_shape = jax.ShapeDtypeStruct((n, hf * wf, 1), jnp.float32)

    scratch_shapes = []
    for d in dims:   # flat zero-padded activation buffers (feed the next layer)
        rows = (d["h_out"] + 2 + _ROW_SLACK) * (d["w_out"] + 2)
        scratch_shapes.append(pltpu.VMEM((rows, d["c_out"]), jnp.float32))
    for d in dims:   # virtual-width GEMM outputs (valid rows scattered from here)
        scratch_shapes.append(
            pltpu.VMEM((d["h_out"] * (d["w_in"] + 2), d["c_out"]), jnp.float32))
    scratch_shapes.append(pltpu.VMEM((hf * (wf + 2), 1), jnp.float32))

    kernel = _build_kernel(dims, head)
    out_flat = pl.pallas_call(
        kernel,
        out_shape=out_shape,
        grid_spec=pltpu.PrefetchScalarGridSpec(
            num_scalar_prefetch=0,
            grid=(n,),
            in_specs=in_specs,
            out_specs=out_specs,
            scratch_shapes=scratch_shapes),
        compiler_params=pltpu.CompilerParams(
            dimension_semantics=("parallel",),      # batch images are independent
            vmem_limit_bytes=32 * 1024 * 1024),     # well under v7x's 64 MiB VMEM
    )(*inputs)

    return out_flat.reshape(n, 1, hf, wf)           # NCHW, matches the torch module


# ----------------------------------------------------------------------------
# Pure-JAX reference (XLA convs) for correctness checking
# ----------------------------------------------------------------------------
def _ref_conv(x_nhwc, w_oihw, bias, stride, pad, lrelu):
    out = jax.lax.conv_general_dilated(
        x_nhwc,
        jnp.transpose(w_oihw, (2, 3, 1, 0)),        # OIHW -> HWIO
        window_strides=(stride, stride),
        padding=[(pad, pad), (pad, pad)],
        dimension_numbers=("NHWC", "HWIO", "NHWC"))
    if bias is not None:
        out = out + bias
    if lrelu:
        out = jnp.where(out >= 0.0, out, _LEAKY_SLOPE * out)
    return out


def _ref_forward(x_nchw, params):
    x = jnp.transpose(x_nchw, (0, 2, 3, 1))
    for w, b in params["main"]:
        x = _ref_conv(x, w, b, stride=2, pad=1, lrelu=True)
    out_src = _ref_conv(x, params["conv1_w"], None, stride=1, pad=1, lrelu=False)
    return jnp.transpose(out_src, (0, 3, 1, 2))


# ----------------------------------------------------------------------------
if __name__ == "__main__":
    key = jax.random.PRNGKey(0)
    k_param, k_x = jax.random.split(key)

    # Small config consistent with the module: image_size=16, conv_dim=8,
    # c_dim=5, repeat_num=2  ->  input [2, 3, 16, 16], out_src [2, 1, 4, 4].
    params = init_discriminator_params(
        k_param, image_size=16, conv_dim=8, c_dim=5, repeat_num=2)
    packed = pack_discriminator_params(params)      # one-time weight repack
    x = jax.random.normal(k_x, (2, 3, 16, 16), jnp.float32)

    out_src = jax.block_until_ready(discriminator_forward(x, packed))
    ref = jax.block_until_ready(_ref_forward(x, params))

    assert out_src.shape == (2, 1, 4, 4), out_src.shape
    assert out_src.dtype == jnp.float32
    np.testing.assert_allclose(np.asarray(out_src), np.asarray(ref),
                               atol=1e-4, rtol=1e-4)

    print("KERNEL_OK")
</pallas_src>

<mosaic_0001>
module attributes {stable_mosaic.version = 11 : i64} {
  func.func @kernel(%arg0: i32, %arg1: memref<1x360x3xf32, #tpu.memory_space<vmem>>, %arg2: memref<16x3x8xf32, #tpu.memory_space<vmem>>, %arg3: memref<1x8xf32, #tpu.memory_space<vmem>>, %arg4: memref<16x8x16xf32, #tpu.memory_space<vmem>>, %arg5: memref<1x16xf32, #tpu.memory_space<vmem>>, %arg6: memref<9x1x16xf32, #tpu.memory_space<vmem>>, %arg7: memref<1x16x1xf32, #tpu.memory_space<vmem>>, %arg8: memref<120x8xf32, #tpu.memory_space<vmem>>, %arg9: memref<48x16xf32, #tpu.memory_space<vmem>>, %arg10: memref<144x8xf32, #tpu.memory_space<vmem>>, %arg11: memref<40x16xf32, #tpu.memory_space<vmem>>, %arg12: memref<24x1xf32, #tpu.memory_space<vmem>>) attributes {dimension_semantics = [#tpu.dimension_semantics<parallel>], iteration_bounds = array<i64: 2>, scalar_prefetch = 0 : i64, scratch_operands = 5 : i64, tpu.core_type = #tpu.core_type<tc>, window_params = [{transform_indices = @transform_0, window_bounds = array<i64: 1, 360, 3>}, {pipeline_mode = #tpu.pipeline_mode<synchronous>, transform_indices = @transform_1, window_bounds = array<i64: 16, 3, 8>}, {pipeline_mode = #tpu.pipeline_mode<synchronous>, transform_indices = @transform_2, window_bounds = array<i64: 1, 8>}, {pipeline_mode = #tpu.pipeline_mode<synchronous>, transform_indices = @transform_3, window_bounds = array<i64: 16, 8, 16>}, {pipeline_mode = #tpu.pipeline_mode<synchronous>, transform_indices = @transform_4, window_bounds = array<i64: 1, 16>}, {pipeline_mode = #tpu.pipeline_mode<synchronous>, transform_indices = @transform_5, window_bounds = array<i64: 9, 1, 16>}, {transform_indices = @transform_6, window_bounds = array<i64: 1, 16, 1>}]} {
    %c0 = arith.constant 0 : index
    %c0_0 = arith.constant 0 : index
    %0 = vector.load %arg3[%c0, %c0_0] : memref<1x8xf32, #tpu.memory_space<vmem>>, vector<1x8xf32>
    %1 = vector.shape_cast %0 : vector<1x8xf32> to vector<1x8xf32>
    %2 = vector.broadcast %1 : vector<1x8xf32> to vector<144x8xf32>
    %c0_1 = arith.constant 0 : index
    %c0_2 = arith.constant 0 : index
    %c0_3 = arith.constant 0 : index
    %3 = tpu.strided_load %arg1[%c0_1, %c0_2, %c0_3] {strides = array<i32: 1, 2, 1>} : memref<1x360x3xf32, #tpu.memory_space<vmem>>, vector<1x144x3xf32>
    %4 = vector.shape_cast %3 : vector<1x144x3xf32> to vector<144x3xf32>
    %c0_4 = arith.constant 0 : index
    %c0_5 = arith.constant 0 : index
    %c0_6 = arith.constant 0 : index
    %5 = vector.load %arg2[%c0_4, %c0_5, %c0_6] : memref<16x3x8xf32, #tpu.memory_space<vmem>>, vector<1x3x8xf32>
    %6 = vector.shape_cast %5 : vector<1x3x8xf32> to vector<3x8xf32>
    %cst = arith.constant dense<0.000000e+00> : vector<144x8xf32>
    %7 = tpu.matmul %4, %6, %cst {dimension_numbers = #tpu.dot_dimension_numbers<[1], [0], [0], [1], [0, 0, 1, 1], [], []>} : vector<144x3xf32>, vector<3x8xf32>, vector<144x8xf32> -> vector<144x8xf32>
    %8 = arith.addf %2, %7 : vector<144x8xf32>
    %c0_7 = arith.constant 0 : index
    %c1 = arith.constant 1 : index
    %c0_8 = arith.constant 0 : index
    %9 = tpu.strided_load %arg1[%c0_7, %c1, %c0_8] {strides = array<i32: 1, 2, 1>} : memref<1x360x3xf32, #tpu.memory_space<vmem>>, vector<1x144x3xf32>
    %10 = vector.shape_cast %9 : vector<1x144x3xf32> to vector<144x3xf32>
    %c1_9 = arith.constant 1 : index
    %c0_10 = arith.constant 0 : index
    %c0_11 = arith.constant 0 : index
    %11 = vector.load %arg2[%c1_9, %c0_10, %c0_11] : memref<16x3x8xf32, #tpu.memory_space<vmem>>, vector<1x3x8xf32>
    %12 = vector.shape_cast %11 : vector<1x3x8xf32> to vector<3x8xf32>
    %cst_12 = arith.constant dense<0.000000e+00> : vector<144x8xf32>
    %13 = tpu.matmul %10, %12, %cst_12 {dimension_numbers = #tpu.dot_dimension_numbers<[1], [0], [0], [1], [0, 0, 1, 1], [], []>} : vector<144x3xf32>, vector<3x8xf32>, vector<144x8xf32> -> vector<144x8xf32>
    %14 = arith.addf %8, %13 : vector<144x8xf32>
    %c0_13 = arith.constant 0 : index
    %c2 = arith.constant 2 : index
    %c0_14 = arith.constant 0 : index
    %15 = tpu.strided_load %arg1[%c0_13, %c2, %c0_14] {strides = array<i32: 1, 2, 1>} : memref<1x360x3xf32, #tpu.memory_space<vmem>>, vector<1x144x3xf32>
    %16 = vector.shape_cast %15 : vector<1x144x3xf32> to vector<144x3xf32>
    %c2_15 = arith.constant 2 : index
    %c0_16 = arith.constant 0 : index
    %c0_17 = arith.constant 0 : index
    %17 = vector.load %arg2[%c2_15, %c0_16, %c0_17] : memref<16x3x8xf32, #tpu.memory_space<vmem>>, vector<1x3x8xf32>
    %18 = vector.shape_cast %17 : vector<1x3x8xf32> to vector<3x8xf32>
    %cst_18 = arith.constant dense<0.000000e+00> : vector<144x8xf32>
    %19 = tpu.matmul %16, %18, %cst_18 {dimension_numbers = #tpu.dot_dimension_numbers<[1], [0], [0], [1], [0, 0, 1, 1], [], []>} : vector<144x3xf32>, vector<3x8xf32>, vector<144x8xf32> -> vector<144x8xf32>
    %20 = arith.addf %14, %19 : vector<144x8xf32>
    %c0_19 = arith.constant 0 : index
    %c3 = arith.constant 3 : index
    %c0_20 = arith.constant 0 : index
    %21 = tpu.strided_load %arg1[%c0_19, %c3, %c0_20] {strides = array<i32: 1, 2, 1>} : memref<1x360x3xf32, #tpu.memory_space<vmem>>, vector<1x144x3xf32>
    %22 = vector.shape_cast %21 : vector<1x144x3xf32> to vector<144x3xf32>
    %c3_21 = arith.constant 3 : index
    %c0_22 = arith.constant 0 : index
    %c0_23 = arith.constant 0 : index
    %23 = vector.load %arg2[%c3_21, %c0_22, %c0_23] : memref<16x3x8xf32, #tpu.memory_space<vmem>>, vector<1x3x8xf32>
    %24 = vector.shape_cast %23 : vector<1x3x8xf32> to vector<3x8xf32>
    %cst_24 = arith.constant dense<0.000000e+00> : vector<144x8xf32>
    %25 = tpu.matmul %22, %24, %cst_24 {dimension_numbers = #tpu.dot_dimension_numbers<[1], [0], [0], [1], [0, 0, 1, 1], [], []>} : vector<144x3xf32>, vector<3x8xf32>, vector<144x8xf32> -> vector<144x8xf32>
    %26 = arith.addf %20, %25 : vector<144x8xf32>
    %c0_25 = arith.constant 0 : index
    %c18 = arith.constant 18 : index
    %c0_26 = arith.constant 0 : index
    %27 = tpu.strided_load %arg1[%c0_25, %c18, %c0_26] {strides = array<i32: 1, 2, 1>} : memref<1x360x3xf32, #tpu.memory_space<vmem>>, vector<1x144x3xf32>
    %28 = vector.shape_cast %27 : vector<1x144x3xf32> to vector<144x3xf32>
    %c4 = arith.constant 4 : index
    %c0_27 = arith.constant 0 : index
    %c0_28 = arith.constant 0 : index
    %29 = vector.load %arg2[%c4, %c0_27, %c0_28] : memref<16x3x8xf32, #tpu.memory_space<vmem>>, vector<1x3x8xf32>
    %30 = vector.shape_cast %29 : vector<1x3x8xf32> to vector<3x8xf32>
    %cst_29 = arith.constant dense<0.000000e+00> : vector<144x8xf32>
    %31 = tpu.matmul %28, %30, %cst_29 {dimension_numbers = #tpu.dot_dimension_numbers<[1], [0], [0], [1], [0, 0, 1, 1], [], []>} : vector<144x3xf32>, vector<3x8xf32>, vector<144x8xf32> -> vector<144x8xf32>
    %32 = arith.addf %26, %31 : vector<144x8xf32>
    %c0_30 = arith.constant 0 : index
    %c19 = arith.constant 19 : index
    %c0_31 = arith.constant 0 : index
    %33 = tpu.strided_load %arg1[%c0_30, %c19, %c0_31] {strides = array<i32: 1, 2, 1>} : memref<1x360x3xf32, #tpu.memory_space<vmem>>, vector<1x144x3xf32>
    %34 = vector.shape_cast %33 : vector<1x144x3xf32> to vector<144x3xf32>
    %c5 = arith.constant 5 : index
    %c0_32 = arith.constant 0 : index
    %c0_33 = arith.constant 0 : index
    %35 = vector.load %arg2[%c5, %c0_32, %c0_33] : memref<16x3x8xf32, #tpu.memory_space<vmem>>, vector<1x3x8xf32>
    %36 = vector.shape_cast %35 : vector<1x3x8xf32> to vector<3x8xf32>
    %cst_34 = arith.constant dense<0.000000e+00> : vector<144x8xf32>
    %37 = tpu.matmul %34, %36, %cst_34 {dimension_numbers = #tpu.dot_dimension_numbers<[1], [0], [0], [1], [0, 0, 1, 1], [], []>} : vector<144x3xf32>, vector<3x8xf32>, vector<144x8xf32> -> vector<144x8xf32>
    %38 = arith.addf %32, %37 : vector<144x8xf32>
    %c0_35 = arith.constant 0 : index
    %c20 = arith.constant 20 : index
    %c0_36 = arith.constant 0 : index
    %39 = tpu.strided_load %arg1[%c0_35, %c20, %c0_36] {strides = array<i32: 1, 2, 1>} : memref<1x360x3xf32, #tpu.memory_space<vmem>>, vector<1x144x3xf32>
    %40 = vector.shape_cast %39 : vector<1x144x3xf32> to vector<144x3xf32>
    %c6 = arith.constant 6 : index
    %c0_37 = arith.constant 0 : index
    %c0_38 = arith.constant 0 : index
    %41 = vector.load %arg2[%c6, %c0_37, %c0_38] : memref<16x3x8xf32, #tpu.memory_space<vmem>>, vector<1x3x8xf32>
    %42 = vector.shape_cast %41 : vector<1x3x8xf32> to vector<3x8xf32>
    %cst_39 = arith.constant dense<0.000000e+00> : vector<144x8xf32>
    %43 = tpu.matmul %40, %42, %cst_39 {dimension_numbers = #tpu.dot_dimension_numbers<[1], [0], [0], [1], [0, 0, 1, 1], [], []>} : vector<144x3xf32>, vector<3x8xf32>, vector<144x8xf32> -> vector<144x8xf32>
    %44 = arith.addf %38, %43 : vector<144x8xf32>
    %c0_40 = arith.constant 0 : index
    %c21 = arith.constant 21 : index
    %c0_41 = arith.constant 0 : index
    %45 = tpu.strided_load %arg1[%c0_40, %c21, %c0_41] {strides = array<i32: 1, 2, 1>} : memref<1x360x3xf32, #tpu.memory_space<vmem>>, vector<1x144x3xf32>
    %46 = vector.shape_cast %45 : vector<1x144x3xf32> to vector<144x3xf32>
    %c7 = arith.constant 7 : index
    %c0_42 = arith.constant 0 : index
    %c0_43 = arith.constant 0 : index
    %47 = vector.load %arg2[%c7, %c0_42, %c0_43] : memref<16x3x8xf32, #tpu.memory_space<vmem>>, vector<1x3x8xf32>
    %48 = vector.shape_cast %47 : vector<1x3x8xf32> to vector<3x8xf32>
    %cst_44 = arith.constant dense<0.000000e+00> : vector<144x8xf32>
    %49 = tpu.matmul %46, %48, %cst_44 {dimension_numbers = #tpu.dot_dimension_numbers<[1], [0], [0], [1], [0, 0, 1, 1], [], []>} : vector<144x3xf32>, vector<3x8xf32>, vector<144x8xf32> -> vector<144x8xf32>
    %50 = arith.addf %44, %49 : vector<144x8xf32>
    %c0_45 = arith.constant 0 : index
    %c36 = arith.constant 36 : index
    %c0_46 = arith.constant 0 : index
    %51 = tpu.strided_load %arg1[%c0_45, %c36, %c0_46] {strides = array<i32: 1, 2, 1>} : memref<1x360x3xf32, #tpu.memory_space<vmem>>, vector<1x144x3xf32>
    %52 = vector.shape_cast %51 : vector<1x144x3xf32> to vector<144x3xf32>
    %c8 = arith.constant 8 : index
    %c0_47 = arith.constant 0 : index
    %c0_48 = arith.constant 0 : index
    %53 = vector.load %arg2[%c8, %c0_47, %c0_48] : memref<16x3x8xf32, #tpu.memory_space<vmem>>, vector<1x3x8xf32>
    %54 = vector.shape_cast %53 : vector<1x3x8xf32> to vector<3x8xf32>
    %cst_49 = arith.constant dense<0.000000e+00> : vector<144x8xf32>
    %55 = tpu.matmul %52, %54, %cst_49 {dimension_numbers = #tpu.dot_dimension_numbers<[1], [0], [0], [1], [0, 0, 1, 1], [], []>} : vector<144x3xf32>, vector<3x8xf32>, vector<144x8xf32> -> vector<144x8xf32>
    %56 = arith.addf %50, %55 : vector<144x8xf32>
    %c0_50 = arith.constant 0 : index
    %c37 = arith.constant 37 : index
    %c0_51 = arith.constant 0 : index
    %57 = tpu.strided_load %arg1[%c0_50, %c37, %c0_51] {strides = array<i32: 1, 2, 1>} : memref<1x360x3xf32, #tpu.memory_space<vmem>>, vector<1x144x3xf32>
    %58 = vector.shape_cast %57 : vector<1x144x3xf32> to vector<144x3xf32>
    %c9 = arith.constant 9 : index
    %c0_52 = arith.constant 0 : index
    %c0_53 = arith.constant 0 : index
    %59 = vector.load %arg2[%c9, %c0_52, %c0_53] : memref<16x3x8xf32, #tpu.memory_space<vmem>>, vector<1x3x8xf32>
    %60 = vector.shape_cast %59 : vector<1x3x8xf32> to vector<3x8xf32>
    %cst_54 = arith.constant dense<0.000000e+00> : vector<144x8xf32>
    %61 = tpu.matmul %58, %60, %cst_54 {dimension_numbers = #tpu.dot_dimension_numbers<[1], [0], [0], [1], [0, 0, 1, 1], [], []>} : vector<144x3xf32>, vector<3x8xf32>, vector<144x8xf32> -> vector<144x8xf32>
    %62 = arith.addf %56, %61 : vector<144x8xf32>
    %c0_55 = arith.constant 0 : index
    %c38 = arith.constant 38 : index
    %c0_56 = arith.constant 0 : index
    %63 = tpu.strided_load %arg1[%c0_55, %c38, %c0_56] {strides = array<i32: 1, 2, 1>} : memref<1x360x3xf32, #tpu.memory_space<vmem>>, vector<1x144x3xf32>
    %64 = vector.shape_cast %63 : vector<1x144x3xf32> to vector<144x3xf32>
    %c10 = arith.constant 10 : index
    %c0_57 = arith.constant 0 : index
    %c0_58 = arith.constant 0 : index
    %65 = vector.load %arg2[%c10, %c0_57, %c0_58] : memref<16x3x8xf32, #tpu.memory_space<vmem>>, vector<1x3x8xf32>
    %66 = vector.shape_cast %65 : vector<1x3x8xf32> to vector<3x8xf32>
    %cst_59 = arith.constant dense<0.000000e+00> : vector<144x8xf32>
    %67 = tpu.matmul %64, %66, %cst_59 {dimension_numbers = #tpu.dot_dimension_numbers<[1], [0], [0], [1], [0, 0, 1, 1], [], []>} : vector<144x3xf32>, vector<3x8xf32>, vector<144x8xf32> -> vector<144x8xf32>
    %68 = arith.addf %62, %67 : vector<144x8xf32>
    %c0_60 = arith.constant 0 : index
    %c39 = arith.constant 39 : index
    %c0_61 = arith.constant 0 : index
    %69 = tpu.strided_load %arg1[%c0_60, %c39, %c0_61] {strides = array<i32: 1, 2, 1>} : memref<1x360x3xf32, #tpu.memory_space<vmem>>, vector<1x144x3xf32>
    %70 = vector.shape_cast %69 : vector<1x144x3xf32> to vector<144x3xf32>
    %c11 = arith.constant 11 : index
    %c0_62 = arith.constant 0 : index
    %c0_63 = arith.constant 0 : index
    %71 = vector.load %arg2[%c11, %c0_62, %c0_63] : memref<16x3x8xf32, #tpu.memory_space<vmem>>, vector<1x3x8xf32>
    %72 = vector.shape_cast %71 : vector<1x3x8xf32> to vector<3x8xf32>
    %cst_64 = arith.constant dense<0.000000e+00> : vector<144x8xf32>
    %73 = tpu.matmul %70, %72, %cst_64 {dimension_numbers = #tpu.dot_dimension_numbers<[1], [0], [0], [1], [0, 0, 1, 1], [], []>} : vector<144x3xf32>, vector<3x8xf32>, vector<144x8xf32> -> vector<144x8xf32>
    %74 = arith.addf %68, %73 : vector<144x8xf32>
    %c0_65 = arith.constant 0 : index
    %c54 = arith.constant 54 : index
    %c0_66 = arith.constant 0 : index
    %75 = tpu.strided_load %arg1[%c0_65, %c54, %c0_66] {strides = array<i32: 1, 2, 1>} : memref<1x360x3xf32, #tpu.memory_space<vmem>>, vector<1x144x3xf32>
    %76 = vector.shape_cast %75 : vector<1x144x3xf32> to vector<144x3xf32>
    %c12 = arith.constant 12 : index
    %c0_67 = arith.constant 0 : index
    %c0_68 = arith.constant 0 : index
    %77 = vector.load %arg2[%c12, %c0_67, %c0_68] : memref<16x3x8xf32, #tpu.memory_space<vmem>>, vector<1x3x8xf32>
    %78 = vector.shape_cast %77 : vector<1x3x8xf32> to vector<3x8xf32>
    %cst_69 = arith.constant dense<0.000000e+00> : vector<144x8xf32>
    %79 = tpu.matmul %76, %78, %cst_69 {dimension_numbers = #tpu.dot_dimension_numbers<[1], [0], [0], [1], [0, 0, 1, 1], [], []>} : vector<144x3xf32>, vector<3x8xf32>, vector<144x8xf32> -> vector<144x8xf32>
    %80 = arith.addf %74, %79 : vector<144x8xf32>
    %c0_70 = arith.constant 0 : index
    %c55 = arith.constant 55 : index
    %c0_71 = arith.constant 0 : index
    %81 = tpu.strided_load %arg1[%c0_70, %c55, %c0_71] {strides = array<i32: 1, 2, 1>} : memref<1x360x3xf32, #tpu.memory_space<vmem>>, vector<1x144x3xf32>
    %82 = vector.shape_cast %81 : vector<1x144x3xf32> to vector<144x3xf32>
    %c13 = arith.constant 13 : index
    %c0_72 = arith.constant 0 : index
    %c0_73 = arith.constant 0 : index
    %83 = vector.load %arg2[%c13, %c0_72, %c0_73] : memref<16x3x8xf32, #tpu.memory_space<vmem>>, vector<1x3x8xf32>
    %84 = vector.shape_cast %83 : vector<1x3x8xf32> to vector<3x8xf32>
    %cst_74 = arith.constant dense<0.000000e+00> : vector<144x8xf32>
    %85 = tpu.matmul %82, %84, %cst_74 {dimension_numbers = #tpu.dot_dimension_numbers<[1], [0], [0], [1], [0, 0, 1, 1], [], []>} : vector<144x3xf32>, vector<3x8xf32>, vector<144x8xf32> -> vector<144x8xf32>
    %86 = arith.addf %80, %85 : vector<144x8xf32>
    %c0_75 = arith.constant 0 : index
    %c56 = arith.constant 56 : index
    %c0_76 = arith.constant 0 : index
    %87 = tpu.strided_load %arg1[%c0_75, %c56, %c0_76] {strides = array<i32: 1, 2, 1>} : memref<1x360x3xf32, #tpu.memory_space<vmem>>, vector<1x144x3xf32>
    %88 = vector.shape_cast %87 : vector<1x144x3xf32> to vector<144x3xf32>
    %c14 = arith.constant 14 : index
    %c0_77 = arith.constant 0 : index
    %c0_78 = arith.constant 0 : index
    %89 = vector.load %arg2[%c14, %c0_77, %c0_78] : memref<16x3x8xf32, #tpu.memory_space<vmem>>, vector<1x3x8xf32>
    %90 = vector.shape_cast %89 : vector<1x3x8xf32> to vector<3x8xf32>
    %cst_79 = arith.constant dense<0.000000e+00> : vector<144x8xf32>
    %91 = tpu.matmul %88, %90, %cst_79 {dimension_numbers = #tpu.dot_dimension_numbers<[1], [0], [0], [1], [0, 0, 1, 1], [], []>} : vector<144x3xf32>, vector<3x8xf32>, vector<144x8xf32> -> vector<144x8xf32>
    %92 = arith.addf %86, %91 : vector<144x8xf32>
    %c0_80 = arith.constant 0 : index
    %c57 = arith.constant 57 : index
    %c0_81 = arith.constant 0 : index
    %93 = tpu.strided_load %arg1[%c0_80, %c57, %c0_81] {strides = array<i32: 1, 2, 1>} : memref<1x360x3xf32, #tpu.memory_space<vmem>>, vector<1x144x3xf32>
    %94 = vector.shape_cast %93 : vector<1x144x3xf32> to vector<144x3xf32>
    %c15 = arith.constant 15 : index
    %c0_82 = arith.constant 0 : index
    %c0_83 = arith.constant 0 : index
    %95 = vector.load %arg2[%c15, %c0_82, %c0_83] : memref<16x3x8xf32, #tpu.memory_space<vmem>>, vector<1x3x8xf32>
    %96 = vector.shape_cast %95 : vector<1x3x8xf32> to vector<3x8xf32>
    %cst_84 = arith.constant dense<0.000000e+00> : vector<144x8xf32>
    %97 = tpu.matmul %94, %96, %cst_84 {dimension_numbers = #tpu.dot_dimension_numbers<[1], [0], [0], [1], [0, 0, 1, 1], [], []>} : vector<144x3xf32>, vector<3x8xf32>, vector<144x8xf32> -> vector<144x8xf32>
    %98 = arith.addf %92, %97 : vector<144x8xf32>
    %cst_85 = arith.constant 0.00999999977 : f32
    %99 = vector.broadcast %cst_85 : f32 to vector<144x8xf32>
    %100 = arith.mulf %99, %98 : vector<144x8xf32>
    %101 = arith.maximumf %98, %100 : vector<144x8xf32>
    %c0_86 = arith.constant 0 : index
    %c0_87 = arith.constant 0 : index
    %102 = vector.load %arg10[%c0_86, %c0_87] : memref<144x8xf32, #tpu.memory_space<vmem>>, vector<144x8xf32>
    tpu.vector_store %arg10[%c0_86, %c0_87], %101 {strides = array<i32>} : memref<144x8xf32, #tpu.memory_space<vmem>>, vector<144x8xf32>,
    %cst_88 = arith.constant 0.000000e+00 : f32
    %103 = vector.broadcast %cst_88 : f32 to vector<120x8xf32>
    %c0_89 = arith.constant 0 : index
    %c0_90 = arith.constant 0 : index
    %104 = vector.load %arg8[%c0_89, %c0_90] : memref<120x8xf32, #tpu.memory_space<vmem>>, vector<120x8xf32>
    tpu.vector_store %arg8[%c0_89, %c0_90], %103 {strides = array<i32>} : memref<120x8xf32, #tpu.memory_space<vmem>>, vector<120x8xf32>,
    %c0_91 = arith.constant 0 : index
    %c0_92 = arith.constant 0 : index
    %105 = vector.load %arg10[%c0_91, %c0_92] : memref<144x8xf32, #tpu.memory_space<vmem>>, vector<8x8xf32>
    %c11_93 = arith.constant 11 : index
    %c0_94 = arith.constant 0 : index
    %106 = vector.load %arg8[%c11_93, %c0_94] : memref<120x8xf32, #tpu.memory_space<vmem>>, vector<8x8xf32>
    tpu.vector_store %arg8[%c11_93, %c0_94], %105 {strides = array<i32>} : memref<120x8xf32, #tpu.memory_space<vmem>>, vector<8x8xf32>,
    %c18_95 = arith.constant 18 : index
    %c0_96 = arith.constant 0 : index
    %107 = vector.load %arg10[%c18_95, %c0_96] : memref<144x8xf32, #tpu.memory_space<vmem>>, vector<8x8xf32>
    %c21_97 = arith.constant 21 : index
    %c0_98 = arith.constant 0 : index
    %108 = vector.load %arg8[%c21_97, %c0_98] : memref<120x8xf32, #tpu.memory_space<vmem>>, vector<8x8xf32>
    tpu.vector_store %arg8[%c21_97, %c0_98], %107 {strides = array<i32>} : memref<120x8xf32, #tpu.memory_space<vmem>>, vector<8x8xf32>,
    %c36_99 = arith.constant 36 : index
    %c0_100 = arith.constant 0 : index
    %109 = vector.load %arg10[%c36_99, %c0_100] : memref<144x8xf32, #tpu.memory_space<vmem>>, vector<8x8xf32>
    %c31 = arith.constant 31 : index
    %c0_101 = arith.constant 0 : index
    %110 = vector.load %arg8[%c31, %c0_101] : memref<120x8xf32, #tpu.memory_space<vmem>>, vector<8x8xf32>
    tpu.vector_store %arg8[%c31, %c0_101], %109 {strides = array<i32>} : memref<120x8xf32, #tpu.memory_space<vmem>>, vector<8x8xf32>,
    %c54_102 = arith.constant 54 : index
    %c0_103 = arith.constant 0 : index
    %111 = vector.load %arg10[%c54_102, %c0_103] : memref<144x8xf32, #tpu.memory_space<vmem>>, vector<8x8xf32>
    %c41 = arith.constant 41 : index
    %c0_104 = arith.constant 0 : index
    %112 = vector.load %arg8[%c41, %c0_104] : memref<120x8xf32, #tpu.memory_space<vmem>>, vector<8x8xf32>
    tpu.vector_store %arg8[%c41, %c0_104], %111 {strides = array<i32>} : memref<120x8xf32, #tpu.memory_space<vmem>>, vector<8x8xf32>,
    %c72 = arith.constant 72 : index
    %c0_105 = arith.constant 0 : index
    %113 = vector.load %arg10[%c72, %c0_105] : memref<144x8xf32, #tpu.memory_space<vmem>>, vector<8x8xf32>
    %c51 = arith.constant 51 : index
    %c0_106 = arith.constant 0 : index
    %114 = vector.load %arg8[%c51, %c0_106] : memref<120x8xf32, #tpu.memory_space<vmem>>, vector<8x8xf32>
    tpu.vector_store %arg8[%c51, %c0_106], %113 {strides = array<i32>} : memref<120x8xf32, #tpu.memory_space<vmem>>, vector<8x8xf32>,
    %c90 = arith.constant 90 : index
    %c0_107 = arith.constant 0 : index
    %115 = vector.load %arg10[%c90, %c0_107] : memref<144x8xf32, #tpu.memory_space<vmem>>, vector<8x8xf32>
    %c61 = arith.constant 61 : index
    %c0_108 = arith.constant 0 : index
    %116 = vector.load %arg8[%c61, %c0_108] : memref<120x8xf32, #tpu.memory_space<vmem>>, vector<8x8xf32>
    tpu.vector_store %arg8[%c61, %c0_108], %115 {strides = array<i32>} : memref<120x8xf32, #tpu.memory_space<vmem>>, vector<8x8xf32>,
    %c108 = arith.constant 108 : index
    %c0_109 = arith.constant 0 : index
    %117 = vector.load %arg10[%c108, %c0_109] : memref<144x8xf32, #tpu.memory_space<vmem>>, vector<8x8xf32>
    %c71 = arith.constant 71 : index
    %c0_110 = arith.constant 0 : index
    %118 = vector.load %arg8[%c71, %c0_110] : memref<120x8xf32, #tpu.memory_space<vmem>>, vector<8x8xf32>
    tpu.vector_store %arg8[%c71, %c0_110], %117 {strides = array<i32>} : memref<120x8xf32, #tpu.memory_space<vmem>>, vector<8x8xf32>,
    %c126 = arith.constant 126 : index
    %c0_111 = arith.constant 0 : index
    %119 = vector.load %arg10[%c126, %c0_111] : memref<144x8xf32, #tpu.memory_space<vmem>>, vector<8x8xf32>
    %c81 = arith.constant 81 : index
    %c0_112 = arith.constant 0 : index
    %120 = vector.load %arg8[%c81, %c0_112] : memref<120x8xf32, #tpu.memory_space<vmem>>, vector<8x8xf32>
    tpu.vector_store %arg8[%c81, %c0_112], %119 {strides = array<i32>} : memref<120x8xf32, #tpu.memory_space<vmem>>, vector<8x8xf32>,
    %c0_113 = arith.constant 0 : index
    %c0_114 = arith.constant 0 : index
    %121 = vector.load %arg5[%c0_113, %c0_114] : memref<1x16xf32, #tpu.memory_space<vmem>>, vector<1x16xf32>
    %122 = vector.shape_cast %121 : vector<1x16xf32> to vector<1x16xf32>
    %123 = vector.broadcast %122 : vector<1x16xf32> to vector<40x16xf32>
    %c0_115 = arith.constant 0 : index
    %c0_116 = arith.constant 0 : index
    %124 = tpu.strided_load %arg8[%c0_115, %c0_116] {strides = array<i32: 2, 1>} : memref<120x8xf32, #tpu.memory_space<vmem>>, vector<40x8xf32>
    %c0_117 = arith.constant 0 : index
    %c0_118 = arith.constant 0 : index
    %c0_119 = arith.constant 0 : index
    %125 = vector.load %arg4[%c0_117, %c0_118, %c0_119] : memref<16x8x16xf32, #tpu.memory_space<vmem>>, vector<1x8x16xf32>
    %126 = vector.shape_cast %125 : vector<1x8x16xf32> to vector<8x16xf32>
    %cst_120 = arith.constant dense<0.000000e+00> : vector<40x16xf32>
    %127 = tpu.matmul %124, %126, %cst_120 {dimension_numbers = #tpu.dot_dimension_numbers<[1], [0], [0], [1], [0, 0, 1, 1], [], []>} : vector<40x8xf32>, vector<8x16xf32>, vector<40x16xf32> -> vector<40x16xf32>
    %128 = arith.addf %123, %127 : vector<40x16xf32>
    %c1_121 = arith.constant 1 : index
    %c0_122 = arith.constant 0 : index
    %129 = tpu.strided_load %arg8[%c1_121, %c0_122] {strides = array<i32: 2, 1>} : memref<120x8xf32, #tpu.memory_space<vmem>>, vector<40x8xf32>
    %c1_123 = arith.constant 1 : index
    %c0_124 = arith.constant 0 : index
    %c0_125 = arith.constant 0 : index
    %130 = vector.load %arg4[%c1_123, %c0_124, %c0_125] : memref<16x8x16xf32, #tpu.memory_space<vmem>>, vector<1x8x16xf32>
    %131 = vector.shape_cast %130 : vector<1x8x16xf32> to vector<8x16xf32>
    %cst_126 = arith.constant dense<0.000000e+00> : vector<40x16xf32>
    %132 = tpu.matmul %129, %131, %cst_126 {dimension_numbers = #tpu.dot_dimension_numbers<[1], [0], [0], [1], [0, 0, 1, 1], [], []>} : vector<40x8xf32>, vector<8x16xf32>, vector<40x16xf32> -> vector<40x16xf32>
    %133 = arith.addf %128, %132 : vector<40x16xf32>
    %c2_127 = arith.constant 2 : index
    %c0_128 = arith.constant 0 : index
    %134 = tpu.strided_load %arg8[%c2_127, %c0_128] {strides = array<i32: 2, 1>} : memref<120x8xf32, #tpu.memory_space<vmem>>, vector<40x8xf32>
    %c2_129 = arith.constant 2 : index
    %c0_130 = arith.constant 0 : index
    %c0_131 = arith.constant 0 : index
    %135 = vector.load %arg4[%c2_129, %c0_130, %c0_131] : memref<16x8x16xf32, #tpu.memory_space<vmem>>, vector<1x8x16xf32>
    %136 = vector.shape_cast %135 : vector<1x8x16xf32> to vector<8x16xf32>
    %cst_132 = arith.constant dense<0.000000e+00> : vector<40x16xf32>
    %137 = tpu.matmul %134, %136, %cst_132 {dimension_numbers = #tpu.dot_dimension_numbers<[1], [0], [0], [1], [0, 0, 1, 1], [], []>} : vector<40x8xf32>, vector<8x16xf32>, vector<40x16xf32> -> vector<40x16xf32>
    %138 = arith.addf %133, %137 : vector<40x16xf32>
    %c3_133 = arith.constant 3 : index
    %c0_134 = arith.constant 0 : index
    %139 = tpu.strided_load %arg8[%c3_133, %c0_134] {strides = array<i32: 2, 1>} : memref<120x8xf32, #tpu.memory_space<vmem>>, vector<40x8xf32>
    %c3_135 = arith.constant 3 : index
    %c0_136 = arith.constant 0 : index
    %c0_137 = arith.constant 0 : index
    %140 = vector.load %arg4[%c3_135, %c0_136, %c0_137] : memref<16x8x16xf32, #tpu.memory_space<vmem>>, vector<1x8x16xf32>
    %141 = vector.shape_cast %140 : vector<1x8x16xf32> to vector<8x16xf32>
    %cst_138 = arith.constant dense<0.000000e+00> : vector<40x16xf32>
    %142 = tpu.matmul %139, %141, %cst_138 {dimension_numbers = #tpu.dot_dimension_numbers<[1], [0], [0], [1], [0, 0, 1, 1], [], []>} : vector<40x8xf32>, vector<8x16xf32>, vector<40x16xf32> -> vector<40x16xf32>
    %143 = arith.addf %138, %142 : vector<40x16xf32>
    %c10_139 = arith.constant 10 : index
    %c0_140 = arith.constant 0 : index
    %144 = tpu.strided_load %arg8[%c10_139, %c0_140] {strides = array<i32: 2, 1>} : memref<120x8xf32, #tpu.memory_space<vmem>>, vector<40x8xf32>
    %c4_141 = arith.constant 4 : index
    %c0_142 = arith.constant 0 : index
    %c0_143 = arith.constant 0 : index
    %145 = vector.load %arg4[%c4_141, %c0_142, %c0_143] : memref<16x8x16xf32, #tpu.memory_space<vmem>>, vector<1x8x16xf32>
    %146 = vector.shape_cast %145 : vector<1x8x16xf32> to vector<8x16xf32>
    %cst_144 = arith.constant dense<0.000000e+00> : vector<40x16xf32>
    %147 = tpu.matmul %144, %146, %cst_144 {dimension_numbers = #tpu.dot_dimension_numbers<[1], [0], [0], [1], [0, 0, 1, 1], [], []>} : vector<40x8xf32>, vector<8x16xf32>, vector<40x16xf32> -> vector<40x16xf32>
    %148 = arith.addf %143, %147 : vector<40x16xf32>
    %c11_145 = arith.constant 11 : index
    %c0_146 = arith.constant 0 : index
    %149 = tpu.strided_load %arg8[%c11_145, %c0_146] {strides = array<i32: 2, 1>} : memref<120x8xf32, #tpu.memory_space<vmem>>, vector<40x8xf32>
    %c5_147 = arith.constant 5 : index
    %c0_148 = arith.constant 0 : index
    %c0_149 = arith.constant 0 : index
    %150 = vector.load %arg4[%c5_147, %c0_148, %c0_149] : memref<16x8x16xf32, #tpu.memory_space<vmem>>, vector<1x8x16xf32>
    %151 = vector.shape_cast %150 : vector<1x8x16xf32> to vector<8x16xf32>
    %cst_150 = arith.constant dense<0.000000e+00> : vector<40x16xf32>
    %152 = tpu.matmul %149, %151, %cst_150 {dimension_numbers = #tpu.dot_dimension_numbers<[1], [0], [0], [1], [0, 0, 1, 1], [], []>} : vector<40x8xf32>, vector<8x16xf32>, vector<40x16xf32> -> vector<40x16xf32>
    %153 = arith.addf %148, %152 : vector<40x16xf32>
    %c12_151 = arith.constant 12 : index
    %c0_152 = arith.constant 0 : index
    %154 = tpu.strided_load %arg8[%c12_151, %c0_152] {strides = array<i32: 2, 1>} : memref<120x8xf32, #tpu.memory_space<vmem>>, vector<40x8xf32>
    %c6_153 = arith.constant 6 : index
    %c0_154 = arith.constant 0 : index
    %c0_155 = arith.constant 0 : index
    %155 = vector.load %arg4[%c6_153, %c0_154, %c0_155] : memref<16x8x16xf32, #tpu.memory_space<vmem>>, vector<1x8x16xf32>
    %156 = vector.shape_cast %155 : vector<1x8x16xf32> to vector<8x16xf32>
    %cst_156 = arith.constant dense<0.000000e+00> : vector<40x16xf32>
    %157 = tpu.matmul %154, %156, %cst_156 {dimension_numbers = #tpu.dot_dimension_numbers<[1], [0], [0], [1], [0, 0, 1, 1], [], []>} : vector<40x8xf32>, vector<8x16xf32>, vector<40x16xf32> -> vector<40x16xf32>
    %158 = arith.addf %153, %157 : vector<40x16xf32>
    %c13_157 = arith.constant 13 : index
    %c0_158 = arith.constant 0 : index
    %159 = tpu.strided_load %arg8[%c13_157, %c0_158] {strides = array<i32: 2, 1>} : memref<120x8xf32, #tpu.memory_space<vmem>>, vector<40x8xf32>
    %c7_159 = arith.constant 7 : index
    %c0_160 = arith.constant 0 : index
    %c0_161 = arith.constant 0 : index
    %160 = vector.load %arg4[%c7_159, %c0_160, %c0_161] : memref<16x8x16xf32, #tpu.memory_space<vmem>>, vector<1x8x16xf32>
    %161 = vector.shape_cast %160 : vector<1x8x16xf32> to vector<8x16xf32>
    %cst_162 = arith.constant dense<0.000000e+00> : vector<40x16xf32>
    %162 = tpu.matmul %159, %161, %cst_162 {dimension_numbers = #tpu.dot_dimension_numbers<[1], [0], [0], [1], [0, 0, 1, 1], [], []>} : vector<40x8xf32>, vector<8x16xf32>, vector<40x16xf32> -> vector<40x16xf32>
    %163 = arith.addf %158, %162 : vector<40x16xf32>
    %c20_163 = arith.constant 20 : index
    %c0_164 = arith.constant 0 : index
    %164 = tpu.strided_load %arg8[%c20_163, %c0_164] {strides = array<i32: 2, 1>} : memref<120x8xf32, #tpu.memory_space<vmem>>, vector<40x8xf32>
    %c8_165 = arith.constant 8 : index
    %c0_166 = arith.constant 0 : index
    %c0_167 = arith.constant 0 : index
    %165 = vector.load %arg4[%c8_165, %c0_166, %c0_167] : memref<16x8x16xf32, #tpu.memory_space<vmem>>, vector<1x8x16xf32>
    %166 = vector.shape_cast %165 : vector<1x8x16xf32> to vector<8x16xf32>
    %cst_168 = arith.constant dense<0.000000e+00> : vector<40x16xf32>
    %167 = tpu.matmul %164, %166, %cst_168 {dimension_numbers = #tpu.dot_dimension_numbers<[1], [0], [0], [1], [0, 0, 1, 1], [], []>} : vector<40x8xf32>, vector<8x16xf32>, vector<40x16xf32> -> vector<40x16xf32>
    %168 = arith.addf %163, %167 : vector<40x16xf32>
    %c21_169 = arith.constant 21 : index
    %c0_170 = arith.constant 0 : index
    %169 = tpu.strided_load %arg8[%c21_169, %c0_170] {strides = array<i32: 2, 1>} : memref<120x8xf32, #tpu.memory_space<vmem>>, vector<40x8xf32>
    %c9_171 = arith.constant 9 : index
    %c0_172 = arith.constant 0 : index
    %c0_173 = arith.constant 0 : index
    %170 = vector.load %arg4[%c9_171, %c0_172, %c0_173] : memref<16x8x16xf32, #tpu.memory_space<vmem>>, vector<1x8x16xf32>
    %171 = vector.shape_cast %170 : vector<1x8x16xf32> to vector<8x16xf32>
    %cst_174 = arith.constant dense<0.000000e+00> : vector<40x16xf32>
    %172 = tpu.matmul %169, %171, %cst_174 {dimension_numbers = #tpu.dot_dimension_numbers<[1], [0], [0], [1], [0, 0, 1, 1], [], []>} : vector<40x8xf32>, vector<8x16xf32>, vector<40x16xf32> -> vector<40x16xf32>
    %173 = arith.addf %168, %172 : vector<40x16xf32>
    %c22 = arith.constant 22 : index
    %c0_175 = arith.constant 0 : index
    %174 = tpu.strided_load %arg8[%c22, %c0_175] {strides = array<i32: 2, 1>} : memref<120x8xf32, #tpu.memory_space<vmem>>, vector<40x8xf32>
    %c10_176 = arith.constant 10 : index
    %c0_177 = arith.constant 0 : index
    %c0_178 = arith.constant 0 : index
    %175 = vector.load %arg4[%c10_176, %c0_177, %c0_178] : memref<16x8x16xf32, #tpu.memory_space<vmem>>, vector<1x8x16xf32>
    %176 = vector.shape_cast %175 : vector<1x8x16xf32> to vector<8x16xf32>
    %cst_179 = arith.constant dense<0.000000e+00> : vector<40x16xf32>
    %177 = tpu.matmul %174, %176, %cst_179 {dimension_numbers = #tpu.dot_dimension_numbers<[1], [0], [0], [1], [0, 0, 1, 1], [], []>} : vector<40x8xf32>, vector<8x16xf32>, vector<40x16xf32> -> vector<40x16xf32>
    %178 = arith.addf %173, %177 : vector<40x16xf32>
    %c23 = arith.constant 23 : index
    %c0_180 = arith.constant 0 : index
    %179 = tpu.strided_load %arg8[%c23, %c0_180] {strides = array<i32: 2, 1>} : memref<120x8xf32, #tpu.memory_space<vmem>>, vector<40x8xf32>
    %c11_181 = arith.constant 11 : index
    %c0_182 = arith.constant 0 : index
    %c0_183 = arith.constant 0 : index
    %180 = vector.load %arg4[%c11_181, %c0_182, %c0_183] : memref<16x8x16xf32, #tpu.memory_space<vmem>>, vector<1x8x16xf32>
    %181 = vector.shape_cast %180 : vector<1x8x16xf32> to vector<8x16xf32>
    %cst_184 = arith.constant dense<0.000000e+00> : vector<40x16xf32>
    %182 = tpu.matmul %179, %181, %cst_184 {dimension_numbers = #tpu.dot_dimension_numbers<[1], [0], [0], [1], [0, 0, 1, 1], [], []>} : vector<40x8xf32>, vector<8x16xf32>, vector<40x16xf32> -> vector<40x16xf32>
    %183 = arith.addf %178, %182 : vector<40x16xf32>
    %c30 = arith.constant 30 : index
    %c0_185 = arith.constant 0 : index
    %184 = tpu.strided_load %arg8[%c30, %c0_185] {strides = array<i32: 2, 1>} : memref<120x8xf32, #tpu.memory_space<vmem>>, vector<40x8xf32>
    %c12_186 = arith.constant 12 : index
    %c0_187 = arith.constant 0 : index
    %c0_188 = arith.constant 0 : index
    %185 = vector.load %arg4[%c12_186, %c0_187, %c0_188] : memref<16x8x16xf32, #tpu.memory_space<vmem>>, vector<1x8x16xf32>
    %186 = vector.shape_cast %185 : vector<1x8x16xf32> to vector<8x16xf32>
    %cst_189 = arith.constant dense<0.000000e+00> : vector<40x16xf32>
    %187 = tpu.matmul %184, %186, %cst_189 {dimension_numbers = #tpu.dot_dimension_numbers<[1], [0], [0], [1], [0, 0, 1, 1], [], []>} : vector<40x8xf32>, vector<8x16xf32>, vector<40x16xf32> -> vector<40x16xf32>
    %188 = arith.addf %183, %187 : vector<40x16xf32>
    %c31_190 = arith.constant 31 : index
    %c0_191 = arith.constant 0 : index
    %189 = tpu.strided_load %arg8[%c31_190, %c0_191] {strides = array<i32: 2, 1>} : memref<120x8xf32, #tpu.memory_space<vmem>>, vector<40x8xf32>
    %c13_192 = arith.constant 13 : index
    %c0_193 = arith.constant 0 : index
    %c0_194 = arith.constant 0 : index
    %190 = vector.load %arg4[%c13_192, %c0_193, %c0_194] : memref<16x8x16xf32, #tpu.memory_space<vmem>>, vector<1x8x16xf32>
    %191 = vector.shape_cast %190 : vector<1x8x16xf32> to vector<8x16xf32>
    %cst_195 = arith.constant dense<0.000000e+00> : vector<40x16xf32>
    %192 = tpu.matmul %189, %191, %cst_195 {dimension_numbers = #tpu.dot_dimension_numbers<[1], [0], [0], [1], [0, 0, 1, 1], [], []>} : vector<40x8xf32>, vector<8x16xf32>, vector<40x16xf32> -> vector<40x16xf32>
    %193 = arith.addf %188, %192 : vector<40x16xf32>
    %c32 = arith.constant 32 : index
    %c0_196 = arith.constant 0 : index
    %194 = tpu.strided_load %arg8[%c32, %c0_196] {strides = array<i32: 2, 1>} : memref<120x8xf32, #tpu.memory_space<vmem>>, vector<40x8xf32>
    %c14_197 = arith.constant 14 : index
    %c0_198 = arith.constant 0 : index
    %c0_199 = arith.constant 0 : index
    %195 = vector.load %arg4[%c14_197, %c0_198, %c0_199] : memref<16x8x16xf32, #tpu.memory_space<vmem>>, vector<1x8x16xf32>
    %196 = vector.shape_cast %195 : vector<1x8x16xf32> to vector<8x16xf32>
    %cst_200 = arith.constant dense<0.000000e+00> : vector<40x16xf32>
    %197 = tpu.matmul %194, %196, %cst_200 {dimension_numbers = #tpu.dot_dimension_numbers<[1], [0], [0], [1], [0, 0, 1, 1], [], []>} : vector<40x8xf32>, vector<8x16xf32>, vector<40x16xf32> -> vector<40x16xf32>
    %198 = arith.addf %193, %197 : vector<40x16xf32>
    %c33 = arith.constant 33 : index
    %c0_201 = arith.constant 0 : index
    %199 = tpu.strided_load %arg8[%c33, %c0_201] {strides = array<i32: 2, 1>} : memref<120x8xf32, #tpu.memory_space<vmem>>, vector<40x8xf32>
    %c15_202 = arith.constant 15 : index
    %c0_203 = arith.constant 0 : index
    %c0_204 = arith.constant 0 : index
    %200 = vector.load %arg4[%c15_202, %c0_203, %c0_204] : memref<16x8x16xf32, #tpu.memory_space<vmem>>, vector<1x8x16xf32>
    %201 = vector.shape_cast %200 : vector<1x8x16xf32> to vector<8x16xf32>
    %cst_205 = arith.constant dense<0.000000e+00> : vector<40x16xf32>
    %202 = tpu.matmul %199, %201, %cst_205 {dimension_numbers = #tpu.dot_dimension_numbers<[1], [0], [0], [1], [0, 0, 1, 1], [], []>} : vector<40x8xf32>, vector<8x16xf32>, vector<40x16xf32> -> vector<40x16xf32>
    %203 = arith.addf %198, %202 : vector<40x16xf32>
    %cst_206 = arith.constant 0.00999999977 : f32
    %204 = vector.broadcast %cst_206 : f32 to vector<40x16xf32>
    %205 = arith.mulf %204, %203 : vector<40x16xf32>
    %206 = arith.maximumf %203, %205 : vector<40x16xf32>
    %c0_207 = arith.constant 0 : index
    %c0_208 = arith.constant 0 : index
    %207 = vector.load %arg11[%c0_207, %c0_208] : memref<40x16xf32, #tpu.memory_space<vmem>>, vector<40x16xf32>
    tpu.vector_store %arg11[%c0_207, %c0_208], %206 {strides = array<i32>} : memref<40x16xf32, #tpu.memory_space<vmem>>, vector<40x16xf32>,
    %cst_209 = arith.constant 0.000000e+00 : f32
    %208 = vector.broadcast %cst_209 : f32 to vector<48x16xf32>
    %c0_210 = arith.constant 0 : index
    %c0_211 = arith.constant 0 : index
    %209 = vector.load %arg9[%c0_210, %c0_211] : memref<48x16xf32, #tpu.memory_space<vmem>>, vector<48x16xf32>
    tpu.vector_store %arg9[%c0_210, %c0_211], %208 {strides = array<i32>} : memref<48x16xf32, #tpu.memory_space<vmem>>, vector<48x16xf32>,
    %c0_212 = arith.constant 0 : index
    %c0_213 = arith.constant 0 : index
    %210 = vector.load %arg11[%c0_212, %c0_213] : memref<40x16xf32, #tpu.memory_space<vmem>>, vector<4x16xf32>
    %c7_214 = arith.constant 7 : index
    %c0_215 = arith.constant 0 : index
    %211 = vector.load %arg9[%c7_214, %c0_215] : memref<48x16xf32, #tpu.memory_space<vmem>>, vector<4x16xf32>
    tpu.vector_store %arg9[%c7_214, %c0_215], %210 {strides = array<i32>} : memref<48x16xf32, #tpu.memory_space<vmem>>, vector<4x16xf32>,
    %c10_216 = arith.constant 10 : index
    %c0_217 = arith.constant 0 : index
    %212 = vector.load %arg11[%c10_216, %c0_217] : memref<40x16xf32, #tpu.memory_space<vmem>>, vector<4x16xf32>
    %c13_218 = arith.constant 13 : index
    %c0_219 = arith.constant 0 : index
    %213 = vector.load %arg9[%c13_218, %c0_219] : memref<48x16xf32, #tpu.memory_space<vmem>>, vector<4x16xf32>
    tpu.vector_store %arg9[%c13_218, %c0_219], %212 {strides = array<i32>} : memref<48x16xf32, #tpu.memory_space<vmem>>, vector<4x16xf32>,
    %c20_220 = arith.constant 20 : index
    %c0_221 = arith.constant 0 : index
    %214 = vector.load %arg11[%c20_220, %c0_221] : memref<40x16xf32, #tpu.memory_space<vmem>>, vector<4x16xf32>
    %c19_222 = arith.constant 19 : index
    %c0_223 = arith.constant 0 : index
    %215 = vector.load %arg9[%c19_222, %c0_223] : memref<48x16xf32, #tpu.memory_space<vmem>>, vector<4x16xf32>
    tpu.vector_store %arg9[%c19_222, %c0_223], %214 {strides = array<i32>} : memref<48x16xf32, #tpu.memory_space<vmem>>, vector<4x16xf32>,
    %c30_224 = arith.constant 30 : index
    %c0_225 = arith.constant 0 : index
    %216 = vector.load %arg11[%c30_224, %c0_225] : memref<40x16xf32, #tpu.memory_space<vmem>>, vector<4x16xf32>
    %c25 = arith.constant 25 : index
    %c0_226 = arith.constant 0 : index
    %217 = vector.load %arg9[%c25, %c0_226] : memref<48x16xf32, #tpu.memory_space<vmem>>, vector<4x16xf32>
    tpu.vector_store %arg9[%c25, %c0_226], %216 {strides = array<i32>} : memref<48x16xf32, #tpu.memory_space<vmem>>, vector<4x16xf32>,
    %cst_227 = arith.constant 0.000000e+00 : f32
    %218 = vector.broadcast %cst_227 : f32 to vector<24x16xf32>
    %c0_228 = arith.constant 0 : index
    %c0_229 = arith.constant 0 : index
    %219 = vector.load %arg9[%c0_228, %c0_229] : memref<48x16xf32, #tpu.memory_space<vmem>>, vector<24x16xf32>
    %c0_230 = arith.constant 0 : index
    %c0_231 = arith.constant 0 : index
    %c0_232 = arith.constant 0 : index
    %220 = vector.load %arg6[%c0_230, %c0_231, %c0_232] : memref<9x1x16xf32, #tpu.memory_space<vmem>>, vector<1x1x16xf32>
    %221 = vector.shape_cast %220 : vector<1x1x16xf32> to vector<1x16xf32>
    %222 = vector.broadcast %221 : vector<1x16xf32> to vector<24x16xf32>
    %223 = arith.mulf %219, %222 : vector<24x16xf32>
    %224 = arith.addf %218, %223 : vector<24x16xf32>
    %c1_233 = arith.constant 1 : index
    %c0_234 = arith.constant 0 : index
    %225 = vector.load %arg9[%c1_233, %c0_234] : memref<48x16xf32, #tpu.memory_space<vmem>>, vector<24x16xf32>
    %c1_235 = arith.constant 1 : index
    %c0_236 = arith.constant 0 : index
    %c0_237 = arith.constant 0 : index
    %226 = vector.load %arg6[%c1_235, %c0_236, %c0_237] : memref<9x1x16xf32, #tpu.memory_space<vmem>>, vector<1x1x16xf32>
    %227 = vector.shape_cast %226 : vector<1x1x16xf32> to vector<1x16xf32>
    %228 = vector.broadcast %227 : vector<1x16xf32> to vector<24x16xf32>
    %229 = arith.mulf %225, %228 : vector<24x16xf32>
    %230 = arith.addf %224, %229 : vector<24x16xf32>
    %c2_238 = arith.constant 2 : index
    %c0_239 = arith.constant 0 : index
    %231 = vector.load %arg9[%c2_238, %c0_239] : memref<48x16xf32, #tpu.memory_space<vmem>>, vector<24x16xf32>
    %c2_240 = arith.constant 2 : index
    %c0_241 = arith.constant 0 : index
    %c0_242 = arith.constant 0 : index
    %232 = vector.load %arg6[%c2_240, %c0_241, %c0_242] : memref<9x1x16xf32, #tpu.memory_space<vmem>>, vector<1x1x16xf32>
    %233 = vector.shape_cast %232 : vector<1x1x16xf32> to vector<1x16xf32>
    %234 = vector.broadcast %233 : vector<1x16xf32> to vector<24x16xf32>
    %235 = arith.mulf %231, %234 : vector<24x16xf32>
    %236 = arith.addf %230, %235 : vector<24x16xf32>
    %c6_243 = arith.constant 6 : index
    %c0_244 = arith.constant 0 : index
    %237 = vector.load %arg9[%c6_243, %c0_244] : memref<48x16xf32, #tpu.memory_space<vmem>>, vector<24x16xf32>
    %c3_245 = arith.constant 3 : index
    %c0_246 = arith.constant 0 : index
    %c0_247 = arith.constant 0 : index
    %238 = vector.load %arg6[%c3_245, %c0_246, %c0_247] : memref<9x1x16xf32, #tpu.memory_space<vmem>>, vector<1x1x16xf32>
    %239 = vector.shape_cast %238 : vector<1x1x16xf32> to vector<1x16xf32>
    %240 = vector.broadcast %239 : vector<1x16xf32> to vector<24x16xf32>
    %241 = arith.mulf %237, %240 : vector<24x16xf32>
    %242 = arith.addf %236, %241 : vector<24x16xf32>
    %c7_248 = arith.constant 7 : index
    %c0_249 = arith.constant 0 : index
    %243 = vector.load %arg9[%c7_248, %c0_249] : memref<48x16xf32, #tpu.memory_space<vmem>>, vector<24x16xf32>
    %c4_250 = arith.constant 4 : index
    %c0_251 = arith.constant 0 : index
    %c0_252 = arith.constant 0 : index
    %244 = vector.load %arg6[%c4_250, %c0_251, %c0_252] : memref<9x1x16xf32, #tpu.memory_space<vmem>>, vector<1x1x16xf32>
    %245 = vector.shape_cast %244 : vector<1x1x16xf32> to vector<1x16xf32>
    %246 = vector.broadcast %245 : vector<1x16xf32> to vector<24x16xf32>
    %247 = arith.mulf %243, %246 : vector<24x16xf32>
    %248 = arith.addf %242, %247 : vector<24x16xf32>
    %c8_253 = arith.constant 8 : index
    %c0_254 = arith.constant 0 : index
    %249 = vector.load %arg9[%c8_253, %c0_254] : memref<48x16xf32, #tpu.memory_space<vmem>>, vector<24x16xf32>
    %c5_255 = arith.constant 5 : index
    %c0_256 = arith.constant 0 : index
    %c0_257 = arith.constant 0 : index
    %250 = vector.load %arg6[%c5_255, %c0_256, %c0_257] : memref<9x1x16xf32, #tpu.memory_space<vmem>>, vector<1x1x16xf32>
    %251 = vector.shape_cast %250 : vector<1x1x16xf32> to vector<1x16xf32>
    %252 = vector.broadcast %251 : vector<1x16xf32> to vector<24x16xf32>
    %253 = arith.mulf %249, %252 : vector<24x16xf32>
    %254 = arith.addf %248, %253 : vector<24x16xf32>
    %c12_258 = arith.constant 12 : index
    %c0_259 = arith.constant 0 : index
    %255 = vector.load %arg9[%c12_258, %c0_259] : memref<48x16xf32, #tpu.memory_space<vmem>>, vector<24x16xf32>
    %c6_260 = arith.constant 6 : index
    %c0_261 = arith.constant 0 : index
    %c0_262 = arith.constant 0 : index
    %256 = vector.load %arg6[%c6_260, %c0_261, %c0_262] : memref<9x1x16xf32, #tpu.memory_space<vmem>>, vector<1x1x16xf32>
    %257 = vector.shape_cast %256 : vector<1x1x16xf32> to vector<1x16xf32>
    %258 = vector.broadcast %257 : vector<1x16xf32> to vector<24x16xf32>
    %259 = arith.mulf %255, %258 : vector<24x16xf32>
    %260 = arith.addf %254, %259 : vector<24x16xf32>
    %c13_263 = arith.constant 13 : index
    %c0_264 = arith.constant 0 : index
    %261 = vector.load %arg9[%c13_263, %c0_264] : memref<48x16xf32, #tpu.memory_space<vmem>>, vector<24x16xf32>
    %c7_265 = arith.constant 7 : index
    %c0_266 = arith.constant 0 : index
    %c0_267 = arith.constant 0 : index
    %262 = vector.load %arg6[%c7_265, %c0_266, %c0_267] : memref<9x1x16xf32, #tpu.memory_space<vmem>>, vector<1x1x16xf32>
    %263 = vector.shape_cast %262 : vector<1x1x16xf32> to vector<1x16xf32>
    %264 = vector.broadcast %263 : vector<1x16xf32> to vector<24x16xf32>
    %265 = arith.mulf %261, %264 : vector<24x16xf32>
    %266 = arith.addf %260, %265 : vector<24x16xf32>
    %c14_268 = arith.constant 14 : index
    %c0_269 = arith.constant 0 : index
    %267 = vector.load %arg9[%c14_268, %c0_269] : memref<48x16xf32, #tpu.memory_space<vmem>>, vector<24x16xf32>
    %c8_270 = arith.constant 8 : index
    %c0_271 = arith.constant 0 : index
    %c0_272 = arith.constant 0 : index
    %268 = vector.load %arg6[%c8_270, %c0_271, %c0_272] : memref<9x1x16xf32, #tpu.memory_space<vmem>>, vector<1x1x16xf32>
    %269 = vector.shape_cast %268 : vector<1x1x16xf32> to vector<1x16xf32>
    %270 = vector.broadcast %269 : vector<1x16xf32> to vector<24x16xf32>
    %271 = arith.mulf %267, %270 : vector<24x16xf32>
    %272 = arith.addf %266, %271 : vector<24x16xf32>
    %cst_273 = arith.constant dense<0.000000e+00> : vector<24xf32>
    %273 = vector.multi_reduction <add>, %272, %cst_273 [1] : vector<24x16xf32> to vector<24xf32>
    %274 = vector.shape_cast %273 : vector<24xf32> to vector<24x1xf32>
    %c0_274 = arith.constant 0 : index
    %c0_275 = arith.constant 0 : index
    %275 = vector.load %arg12[%c0_274, %c0_275] : memref<24x1xf32, #tpu.memory_space<vmem>>, vector<24x1xf32>
    tpu.vector_store %arg12[%c0_274, %c0_275], %274 {strides = array<i32>} : memref<24x1xf32, #tpu.memory_space<vmem>>, vector<24x1xf32>,
    %c0_276 = arith.constant 0 : index
    %c0_277 = arith.constant 0 : index
    %276 = vector.load %arg12[%c0_276, %c0_277] : memref<24x1xf32, #tpu.memory_space<vmem>>, vector<4x1xf32>
    %c0_278 = arith.constant 0 : index
    %c0_279 = arith.constant 0 : index
    %c0_280 = arith.constant 0 : index
    %277 = vector.load %arg7[%c0_278, %c0_279, %c0_280] : memref<1x16x1xf32, #tpu.memory_space<vmem>>, vector<1x4x1xf32>
    %278 = vector.shape_cast %277 : vector<1x4x1xf32> to vector<4x1xf32>
    %279 = vector.shape_cast %276 : vector<4x1xf32> to vector<1x4x1xf32>
    tpu.vector_store %arg7[%c0_278, %c0_279, %c0_280], %279 {strides = array<i32>} : memref<1x16x1xf32, #tpu.memory_space<vmem>>, vector<1x4x1xf32>,
    %c6_281 = arith.constant 6 : index
    %c0_282 = arith.constant 0 : index
    %280 = vector.load %arg12[%c6_281, %c0_282] : memref<24x1xf32, #tpu.memory_space<vmem>>, vector<4x1xf32>
    %c0_283 = arith.constant 0 : index
    %c4_284 = arith.constant 4 : index
    %c0_285 = arith.constant 0 : index
    %281 = vector.load %arg7[%c0_283, %c4_284, %c0_285] : memref<1x16x1xf32, #tpu.memory_space<vmem>>, vector<1x4x1xf32>
    %282 = vector.shape_cast %281 : vector<1x4x1xf32> to vector<4x1xf32>
    %283 = vector.shape_cast %280 : vector<4x1xf32> to vector<1x4x1xf32>
    tpu.vector_store %arg7[%c0_283, %c4_284, %c0_285], %283 {strides = array<i32>} : memref<1x16x1xf32, #tpu.memory_space<vmem>>, vector<1x4x1xf32>,
    %c12_286 = arith.constant 12 : index
    %c0_287 = arith.constant 0 : index
    %284 = vector.load %arg12[%c12_286, %c0_287] : memref<24x1xf32, #tpu.memory_space<vmem>>, vector<4x1xf32>
    %c0_288 = arith.constant 0 : index
    %c8_289 = arith.constant 8 : index
    %c0_290 = arith.constant 0 : index
    %285 = vector.load %arg7[%c0_288, %c8_289, %c0_290] : memref<1x16x1xf32, #tpu.memory_space<vmem>>, vector<1x4x1xf32>
    %286 = vector.shape_cast %285 : vector<1x4x1xf32> to vector<4x1xf32>
    %287 = vector.shape_cast %284 : vector<4x1xf32> to vector<1x4x1xf32>
    tpu.vector_store %arg7[%c0_288, %c8_289, %c0_290], %287 {strides = array<i32>} : memref<1x16x1xf32, #tpu.memory_space<vmem>>, vector<1x4x1xf32>,
    %c18_291 = arith.constant 18 : index
    %c0_292 = arith.constant 0 : index
    %288 = vector.load %arg12[%c18_291, %c0_292] : memref<24x1xf32, #tpu.memory_space<vmem>>, vector<4x1xf32>
    %c0_293 = arith.constant 0 : index
    %c12_294 = arith.constant 12 : index
    %c0_295 = arith.constant 0 : index
    %289 = vector.load %arg7[%c0_293, %c12_294, %c0_295] : memref<1x16x1xf32, #tpu.memory_space<vmem>>, vector<1x4x1xf32>
    %290 = vector.shape_cast %289 : vector<1x4x1xf32> to vector<4x1xf32>
    %291 = vector.shape_cast %288 : vector<4x1xf32> to vector<1x4x1xf32>
    tpu.vector_store %arg7[%c0_293, %c12_294, %c0_295], %291 {strides = array<i32>} : memref<1x16x1xf32, #tpu.memory_space<vmem>>, vector<1x4x1xf32>,
    return
  }
  func.func @transform_0(%arg0: i32) -> (i32, i32, i32) {
    %c0_i32 = arith.constant 0 : i32
    %c0_i32_0 = arith.constant 0 : i32
    %c0_i32_1 = arith.constant 0 : i32
    return %arg0, %c0_i32, %c0_i32_0 : i32, i32, i32
  }
  func.func @transform_1(%arg0: i32) -> (i32, i32, i32) {
    %c0_i32 = arith.constant 0 : i32
    %c0_i32_0 = arith.constant 0 : i32
    %c0_i32_1 = arith.constant 0 : i32
    %c0_i32_2 = arith.constant 0 : i32
    return %c0_i32, %c0_i32_0, %c0_i32_1 : i32, i32, i32
  }
  func.func @transform_2(%arg0: i32) -> (i32, i32) {
    %c0_i32 = arith.constant 0 : i32
    %c0_i32_0 = arith.constant 0 : i32
    %c0_i32_1 = arith.constant 0 : i32
    return %c0_i32, %c0_i32_0 : i32, i32
  }
  func.func @transform_3(%arg0: i32) -> (i32, i32, i32) {
    %c0_i32 = arith.constant 0 : i32
    %c0_i32_0 = arith.constant 0 : i32
    %c0_i32_1 = arith.constant 0 : i32
    %c0_i32_2 = arith.constant 0 : i32
    return %c0_i32, %c0_i32_0, %c0_i32_1 : i32, i32, i32
  }
  func.func @transform_4(%arg0: i32) -> (i32, i32) {
    %c0_i32 = arith.constant 0 : i32
    %c0_i32_0 = arith.constant 0 : i32
    %c0_i32_1 = arith.constant 0 : i32
    return %c0_i32, %c0_i32_0 : i32, i32
  }
  func.func @transform_5(%arg0: i32) -> (i32, i32, i32) {
    %c0_i32 = arith.constant 0 : i32
    %c0_i32_0 = arith.constant 0 : i32
    %c0_i32_1 = arith.constant 0 : i32
    %c0_i32_2 = arith.constant 0 : i32
    return %c0_i32, %c0_i32_0, %c0_i32_1 : i32, i32, i32
  }
  func.func @transform_6(%arg0: i32) -> (i32, i32, i32) {
    %c0_i32 = arith.constant 0 : i32
    %c0_i32_0 = arith.constant 0 : i32
    %c0_i32_1 = arith.constant 0 : i32
    return %arg0, %c0_i32, %c0_i32_0 : i32, i32, i32
  }
}

</mosaic_0001>

<bundles_post_ra>
// kernel: discriminator_forward.1
= control target key start
LH: loop header
LB: loop body
LE: loop exit
PB: predicated region body
PF: predicated region fallthrough
CT: control target
= control target key end

     0   :  { %s5218_s21 = smov 0   ;;  %s6355_s0 = inlined_call_operand.vmem [shape: f32[2,360,3], index: 0, kind: input, shape index: {}]   ;;  %s6356_s1 = inlined_call_operand.vmem [shape: f32[16,3,8], index: 1, kind: input, shape index: {}]   ;;  %s6357_s2 = inlined_call_operand.vmem [shape: f32[1,8], index: 2, kind: input, shape index: {}]   ;;  %s6358_s3 = inlined_call_operand.vmem [shape: f32[16,8,16], index: 3, kind: input, shape index: {}]   ;;  %s6359_s4 = inlined_call_operand.vmem [shape: f32[1,16], index: 4, kind: input, shape index: {}]   ;;  %s6360_s5 = inlined_call_operand.vmem [shape: f32[9,1,16], index: 5, kind: input, shape index: {}]   ;;  %s6361_s6 = inlined_call_operand.vmem [shape: f32[2,16,1], index: 6, kind: output, shape index: {}]  }
   0x1 LB: > { %s4433_s22 = sadd.s32 4294967295, %s5180_s21   ;;  %p4437_p0 = scmp.ge.s32.totalorder %s5180_s21, 1  ;;  %s5180_s21 = sphi %s5218_s21, %s16_s21  }
   0x2   : > { %p212_p1 = scmp.lt.s32.totalorder %s5180_s21, 3 }
   0x4   : > { %p213_p2 = pnand %p4437_p0, %p212_p1 }
   0x5   : > { %p242_p3 = scmp.lt.s32.totalorder (!%p213_p2), %s4433_s22, 1 }
   0x6   : > { %216 = sbr.rel (%p213_p2) target bundleno = 1154 (0x482), region = 44 }
   0xb   : > { %v291_v0 = vld [vmem:[%s6356_s1] sm:$0x7]  ;;  %vm347_vm0 = vcmask 1042432   ;;  %v4533_v1 = vld [vmem:[%s6356_s1 + $0x8] sm:$0x7]  ;;  %s6363_s22 = smov (!%p242_p3, %s4433_s22), 1 }
   0xc   : > { %4458 = vmatpush.msk.msra.mxu0 %vm347_vm0, %v291_v0  ;;  %4534 = vmatpush.msk.msra.mxu2 %vm347_vm0, %v4533_v1  ;;  %v4685_v2 = vld [vmem:[%s6356_s1 + $0x18] sm:$0x7]  ;;  %v4495_v3 = vld [vmem:[%s6356_s1 + $0x4] sm:$0x7]  ;;  %v4571_v4 = vld [vmem:[%s6356_s1 + $0xc] sm:$0x7] }
   0xd   : > { %4496 = vmatpush.msk.msra.mxu1 %vm347_vm0, %v4495_v3  ;;  %v4609_v5 = vld [vmem:[%s6356_s1 + $0x10] sm:$0x7]  ;;  %4572 = vmatpush.msk.msra.mxu3 %vm347_vm0, %v4571_v4  ;;  %v4723_v6 = vld [vmem:[%s6356_s1 + $0x1c] sm:$0x7]  ;;  %v4647_v7 = vld [vmem:[%s6356_s1 + $0x14] sm:$0x7] }
   0xe   : > { %4686 = vmatpush.msk.msrb.mxu2 %vm347_vm0, %v4685_v2  ;;  %4610 = vmatpush.msk.msrb.mxu0 %vm347_vm0, %v4609_v5  ;;  %s5153_s15 = smul.u32 360, %s6363_s22  ;;  %vm292_vm1 = vcmask 23552   ;;  %v4837_v4 = vld [vmem:[%s6356_s1 + $0x28] sm:$0x7]  ;;  %v4761_v5 = vld [vmem:[%s6356_s1 + $0x20] sm:$0x7] }
   0xf   : > { %4724 = vmatpush.msk.msrb.mxu3 %vm347_vm0, %v4723_v6  ;;  %4648 = vmatpush.msk.msrb.mxu1 %vm347_vm0, %v4647_v7  ;;  %v4875_v6 = vld [vmem:[%s6356_s1 + $0x2c] sm:$0x7]  ;;  %v4799_v7 = vld [vmem:[%s6356_s1 + $0x24] sm:$0x7]  ;;  %vm3134_vm2 = vcmask 64512   ;;  %vm4214_vm3 = vcmask 130048  }
  0x10   : > { %s5264_s18 = scalar_lea.vmem %s6355_s0, %s5153_s15  ;;  %vm4227_vm4 = vcmask 125952   ;;  %vm4365_vm5 = vcmask 7168   ;;  %vm4370_vm6 = vcmask 3072  }
  0x11   : > { %v256_v8 = vld [vmem:[%s5264_s18] ss:$2 sm:$0xff]  ;;  %v4477_v10 = vld [vmem:[%s5264_s18 + $0x1] ss:$2 sm:$0xff]  ;;  %v4441_v12 = vld [vmem:[%s5264_s18 + $0x10] ss:$2 sm:$0xff] }
  0x12   : > { %v4515_v9 = vld [vmem:[%s5264_s18 + $0x2] ss:$2 sm:$0xff]  ;;  %4459 = vmatmul.msk.f32.vlgmr.msra.gmra.mxu0 %vm292_vm1, %v256_v8  ;;  %v4553_v11 = vld [vmem:[%s5264_s18 + $0x3] ss:$2 sm:$0xff]  ;;  %4497 = vmatmul.msk.f32.vlgmr.msra.gmra.mxu1 %vm292_vm1, %v4477_v10  ;;  %v4516_v13 = vld [vmem:[%s5264_s18 + $0x12] ss:$2 sm:$0xff] }
  0x13   : > { %4535 = vmatmul.msk.f32.vlgmr.msra.gmra.mxu2 %vm292_vm1, %v4515_v9  ;;  %4573 = vmatmul.msk.f32.vlgmr.msra.gmra.mxu3 %vm292_vm1, %v4553_v11  ;;  %v4478_v14 = vld [vmem:[%s5264_s18 + $0x11] ss:$2 sm:$0xff]  ;;  %v4442_v16 = vld [vmem:[%s5264_s18 + $0x20] ss:$2 sm:$0xff]  ;;  %v4479_v18 = vld [vmem:[%s5264_s18 + $0x21] ss:$2 sm:$0xff] }
  0x14   : > { %v4554_v15 = vld [vmem:[%s5264_s18 + $0x13] ss:$2 sm:$0xff]  ;;  %v4517_v17 = vld [vmem:[%s5264_s18 + $0x22] ss:$2 sm:$0xff]  ;;  %v4555_v19 = vld [vmem:[%s5264_s18 + $0x23] ss:$2 sm:$0xff]  ;;  %4838 = vmatpush.msk.msra.mxu2 %vm347_vm0, %v4837_v4  ;;  %4762 = vmatpush.msk.msra.mxu0 %vm347_vm0, %v4761_v5 }
  0x15   : > { %v4443_v20 = vld [vmem:[%s5264_s18 + $0x30] ss:$2 sm:$0xff]  ;;  %v4480_v22 = vld [vmem:[%s5264_s18 + $0x31] ss:$2 sm:$0xff]  ;;  %v4444_v24 = vld [vmem:[%s5264_s18 + $0x40] ss:$2 sm:$0xff]  ;;  %4876 = vmatpush.msk.msra.mxu3 %vm347_vm0, %v4875_v6  ;;  %4800 = vmatpush.msk.msra.mxu1 %vm347_vm0, %v4799_v7 }
  0x16   : > { %v4518_v21 = vld [vmem:[%s5264_s18 + $0x32] ss:$2 sm:$0xff]  ;;  %v4556_v23 = vld [vmem:[%s5264_s18 + $0x33] ss:$2 sm:$0xff]  ;;  %v4519_v25 = vld [vmem:[%s5264_s18 + $0x42] ss:$2 sm:$0xff] }
  0x17   : > { %v4481_v26 = vld [vmem:[%s5264_s18 + $0x41] ss:$2 sm:$0xff]  ;;  %v4445_v28 = vld [vmem:[%s5264_s18 + $0x50] ss:$2 sm:$0xff]  ;;  %v4482_v30 = vld [vmem:[%s5264_s18 + $0x51] ss:$2 sm:$0xff] }
  0x18   : > { %v4557_v27 = vld [vmem:[%s5264_s18 + $0x43] ss:$2 sm:$0xff]  ;;  %v4520_v29 = vld [vmem:[%s5264_s18 + $0x52] ss:$2 sm:$0xff]  ;;  %v4558_v31 = vld [vmem:[%s5264_s18 + $0x53] ss:$2 sm:$0xff] }
  0x19   : > { %v4446_v32 = vld [vmem:[%s5264_s18 + $0x60] ss:$2 sm:$0xff]  ;;  %v4483_v34 = vld [vmem:[%s5264_s18 + $0x61] ss:$2 sm:$0xff]  ;;  %v4447_v36 = vld [vmem:[%s5264_s18 + $0x70] ss:$2 sm:$0xff] }
  0x1a   : > { %4460 = vmatmul.msk.f32.gmra.mxu0 %vm292_vm1, %v4441_v12  ;;  %4498 = vmatmul.msk.f32.gmra.mxu1 %vm292_vm1, %v4478_v14  ;;  %v4521_v33 = vld [vmem:[%s5264_s18 + $0x62] ss:$2 sm:$0xff]  ;;  %v4559_v35 = vld [vmem:[%s5264_s18 + $0x63] ss:$2 sm:$0xff]  ;;  %v4522_v37 = vld [vmem:[%s5264_s18 + $0x72] ss:$2 sm:$0xff] }
  0x1b   : > { %4536 = vmatmul.msk.f32.gmra.mxu2 %vm292_vm1, %v4516_v13  ;;  %4574 = vmatmul.msk.f32.gmra.mxu3 %vm292_vm1, %v4554_v15  ;;  %v4484_v38 = vld [vmem:[%s5264_s18 + $0x71] ss:$2 sm:$0xff]  ;;  %v4448_v40 = vld [vmem:[%s5264_s18 + $0x80] ss:$2 sm:$0xff]  ;;  %v4485_v42 = vld [vmem:[%s5264_s18 + $0x81] ss:$2 sm:$0xff] }
  0x1c   : > { %v4560_v39 = vld [vmem:[%s5264_s18 + $0x73] ss:$2 sm:$0xff]  ;;  %v4523_v41 = vld [vmem:[%s5264_s18 + $0x82] ss:$2 sm:$0xff]  ;;  %v4561_v43 = vld [vmem:[%s5264_s18 + $0x83] ss:$2 sm:$0xff] }
  0x1d   : > { %v4449_v44 = vld [vmem:[%s5264_s18 + $0x90] ss:$2 sm:$0xff]  ;;  %v4486_v46 = vld [vmem:[%s5264_s18 + $0x91] ss:$2 sm:$0xff]  ;;  %v4450_v48 = vld [vmem:[%s5264_s18 + $0xa0] ss:$2 sm:$0xff] }
  0x1e   : > { %v4524_v45 = vld [vmem:[%s5264_s18 + $0x92] ss:$2 sm:$0xff]  ;;  %v4562_v47 = vld [vmem:[%s5264_s18 + $0x93] ss:$2 sm:$0xff]  ;;  %v4525_v49 = vld [vmem:[%s5264_s18 + $0xa2] ss:$2 sm:$0xff] }
  0x1f   : > { %v4487_v50 = vld [vmem:[%s5264_s18 + $0xa1] ss:$2 sm:$0xff]  ;;  %v4451_v52 = vld [vmem:[%s5264_s18 + $0xb0] ss:$2 sm:$0xff]  ;;  %v4488_v54 = vld [vmem:[%s5264_s18 + $0xb1] ss:$2 sm:$0xff] }
  0x20   : > { %v4563_v51 = vld [vmem:[%s5264_s18 + $0xa3] ss:$2 sm:$0xff]  ;;  %v4526_v53 = vld [vmem:[%s5264_s18 + $0xb2] ss:$2 sm:$0xff]  ;;  %v4564_v55 = vld [vmem:[%s5264_s18 + $0xb3] ss:$2 sm:$0xff] }
  0x21   : > { %v4452_v56 = vld [vmem:[%s5264_s18 + $0xc0] ss:$2 sm:$0xff]  ;;  %v4489_v58 = vld [vmem:[%s5264_s18 + $0xc1] ss:$2 sm:$0xff]  ;;  %v4453_v60 = vld [vmem:[%s5264_s18 + $0xd0] ss:$2 sm:$0xff] }
  0x22   : > { %4461 = vmatmul.msk.f32.gmra.mxu0 %vm292_vm1, %v4442_v16  ;;  %4499 = vmatmul.msk.f32.gmra.mxu1 %vm292_vm1, %v4479_v18  ;;  %v4527_v57 = vld [vmem:[%s5264_s18 + $0xc2] ss:$2 sm:$0xff]  ;;  %v4565_v59 = vld [vmem:[%s5264_s18 + $0xc3] ss:$2 sm:$0xff]  ;;  %v4528_v61 = vld [vmem:[%s5264_s18 + $0xd2] ss:$2 sm:$0xff] }
  0x23   : > { %4537 = vmatmul.msk.f32.gmra.mxu2 %vm292_vm1, %v4517_v17  ;;  %4575 = vmatmul.msk.f32.gmra.mxu3 %vm292_vm1, %v4555_v19  ;;  %v4490_v62 = vld [vmem:[%s5264_s18 + $0xd1] ss:$2 sm:$0xff]  ;;  %v4454_v0 = vld [vmem:[%s5264_s18 + $0xe0] ss:$2 sm:$0xff]  ;;  %v4491_v2 = vld [vmem:[%s5264_s18 + $0xe1] ss:$2 sm:$0xff] }
  0x24   : > { %v4566_v63 = vld [vmem:[%s5264_s18 + $0xd3] ss:$2 sm:$0xff]  ;;  %v4529_v1 = vld [vmem:[%s5264_s18 + $0xe2] ss:$2 sm:$0xff]  ;;  %v4567_v3 = vld [vmem:[%s5264_s18 + $0xe3] ss:$2 sm:$0xff] }
  0x25   : > { %v4455_v8 = vld [vmem:[%s5264_s18 + $0xf0] ss:$2 sm:$0xff]  ;;  %v4492_v10 = vld [vmem:[%s5264_s18 + $0xf1] ss:$2 sm:$0xff]  ;;  %v5413_v12 = vld [vmem:[%s6357_s2] ss:$0 sm:$0xff] }
  0x26   : > { %v4530_v9 = vld [vmem:[%s5264_s18 + $0xf2] ss:$2 sm:$0xff]  ;;  %v4568_v11 = vld [vmem:[%s5264_s18 + $0xf3] ss:$2 sm:$0xff]  ;;  %v4531_v15 = vld [vmem:[%s5264_s18 + $0x102] ss:$2 sm:$0xff] }
  0x27   : > { %v4456_v14 = vld [vmem:[%s5264_s18 + $0x100] ss:$2 sm:$0xff]  ;;  %v4493_v18 = vld [vmem:[%s5264_s18 + $0x101] ss:$2 sm:$0xff] }
  0x28   : > { %v4569_v19 = vld [vmem:[%s5264_s18 + $0x103] ss:$2 sm:$0xff]  ;;  %v4594_v5 = vld [vmem:[%s5264_s18 + $0x42] ss:$2 sm:$0xff] }
  0x29   : > { %v4670_v6 = vld [vmem:[%s5264_s18 + $0x44] ss:$2 sm:$0xff] }
  0x2a   : > { %4462 = vmatmul.msk.f32.gmra.mxu0 %vm292_vm1, %v4443_v20  ;;  %4500 = vmatmul.msk.f32.gmra.mxu1 %vm292_vm1, %v4480_v22 }
  0x2b   : > { %4538 = vmatmul.msk.f32.gmra.mxu2 %vm292_vm1, %v4518_v21  ;;  %4576 = vmatmul.msk.f32.gmra.mxu3 %vm292_vm1, %v4556_v23 }
  0x32   : > { %4463 = vmatmul.msk.f32.gmra.mxu0 %vm292_vm1, %v4444_v24  ;;  %4501 = vmatmul.msk.f32.gmra.mxu1 %vm292_vm1, %v4481_v26  ;;  %v4532_v26 = vld [vmem:[%s5264_s18 + $0x112] ss:$2 sm:$0xff] }
  0x33   : > { %4539 = vmatmul.msk.f32.gmra.mxu2 %vm292_vm1, %v4519_v25  ;;  %4577 = vmatmul.msk.f32.gmra.mxu3 %vm292_vm1, %v4557_v27  ;;  %v4457_v25 = vld [vmem:[%s5264_s18 + $0x110] ss:$2 sm:$0xff] }
  0x3a   : > { %4464 = vmatmul.msk.f32.gmra.mxu0 %vm292_vm1, %v4445_v28  ;;  %4502 = vmatmul.msk.f32.gmra.mxu1 %vm292_vm1, %v4482_v30  ;;  %v4570_v30 = vld [vmem:[%s5264_s18 + $0x113] ss:$2 sm:$0xff] }
  0x3b   : > { %4540 = vmatmul.msk.f32.gmra.mxu2 %vm292_vm1, %v4520_v29  ;;  %4578 = vmatmul.msk.f32.gmra.mxu3 %vm292_vm1, %v4558_v31  ;;  %v4494_v29 = vld [vmem:[%s5264_s18 + $0x111] ss:$2 sm:$0xff] }
  0x42   : > { %4465 = vmatmul.msk.f32.gmra.mxu0 %vm292_vm1, %v4446_v32  ;;  %4503 = vmatmul.msk.f32.gmra.mxu1 %vm292_vm1, %v4483_v34  ;;  %v4591_v34 = vld [vmem:[%s5264_s18 + $0x12] ss:$2 sm:$0xff] }
  0x43   : > { %4541 = vmatmul.msk.f32.gmra.mxu2 %vm292_vm1, %v4521_v33  ;;  %4579 = vmatmul.msk.f32.gmra.mxu3 %vm292_vm1, %v4559_v35  ;;  %v4667_v35 = vld [vmem:[%s5264_s18 + $0x14] ss:$2 sm:$0xff] }
  0x4a   : > { %4466 = vmatmul.msk.f32.gmra.mxu0 %vm292_vm1, %v4447_v36  ;;  %4504 = vmatmul.msk.f32.gmra.mxu1 %vm292_vm1, %v4484_v38  ;;  %v4629_v38 = vld [vmem:[%s5264_s18 + $0x13] ss:$2 sm:$0xff] }
  0x4b   : > { %4542 = vmatmul.msk.f32.gmra.mxu2 %vm292_vm1, %v4522_v37  ;;  %4580 = vmatmul.msk.f32.gmra.mxu3 %vm292_vm1, %v4560_v39  ;;  %v4705_v39 = vld [vmem:[%s5264_s18 + $0x15] ss:$2 sm:$0xff] }
  0x52   : > { %4467 = vmatmul.msk.f32.gmra.mxu0 %vm292_vm1, %v4448_v40  ;;  %4505 = vmatmul.msk.f32.gmra.mxu1 %vm292_vm1, %v4485_v42 }
  0x53   : > { %4543 = vmatmul.msk.f32.gmra.mxu2 %vm292_vm1, %v4523_v41  ;;  %4581 = vmatmul.msk.f32.gmra.mxu3 %vm292_vm1, %v4561_v43 }
  0x5a   : > { %4468 = vmatmul.msk.f32.gmra.mxu0 %vm292_vm1, %v4449_v44  ;;  %4506 = vmatmul.msk.f32.gmra.mxu1 %vm292_vm1, %v4486_v46  ;;  %v4668_v46 = vld [vmem:[%s5264_s18 + $0x24] ss:$2 sm:$0xff] }
  0x5b   : > { %4544 = vmatmul.msk.f32.gmra.mxu2 %vm292_vm1, %v4524_v45  ;;  %4582 = vmatmul.msk.f32.gmra.mxu3 %vm292_vm1, %v4562_v47  ;;  %v4592_v45 = vld [vmem:[%s5264_s18 + $0x22] ss:$2 sm:$0xff] }
  0x62   : > { %4469 = vmatmul.msk.f32.gmra.mxu0 %vm292_vm1, %v4450_v48  ;;  %4507 = vmatmul.msk.f32.gmra.mxu1 %vm292_vm1, %v4487_v50  ;;  %v4630_v50 = vld [vmem:[%s5264_s18 + $0x23] ss:$2 sm:$0xff] }
  0x63   : > { %4545 = vmatmul.msk.f32.gmra.mxu2 %vm292_vm1, %v4525_v49  ;;  %4583 = vmatmul.msk.f32.gmra.mxu3 %vm292_vm1, %v4563_v51  ;;  %v4706_v51 = vld [vmem:[%s5264_s18 + $0x25] ss:$2 sm:$0xff] }
  0x6a   : > { %4470 = vmatmul.msk.f32.gmra.mxu0 %vm292_vm1, %v4451_v52  ;;  %4508 = vmatmul.msk.f32.gmra.mxu1 %vm292_vm1, %v4488_v54 }
  0x6b   : > { %4546 = vmatmul.msk.f32.gmra.mxu2 %vm292_vm1, %v4526_v53  ;;  %4584 = vmatmul.msk.f32.gmra.mxu3 %vm292_vm1, %v4564_v55 }
  0x72   : > { %4471 = vmatmul.msk.f32.gmra.mxu0 %vm292_vm1, %v4452_v56  ;;  %4509 = vmatmul.msk.f32.gmra.mxu1 %vm292_vm1, %v4489_v58  ;;  %v4669_v58 = vld [vmem:[%s5264_s18 + $0x34] ss:$2 sm:$0xff] }
  0x73   : > { %4547 = vmatmul.msk.f32.gmra.mxu2 %vm292_vm1, %v4527_v57  ;;  %4585 = vmatmul.msk.f32.gmra.mxu3 %vm292_vm1, %v4565_v59  ;;  %v4593_v57 = vld [vmem:[%s5264_s18 + $0x32] ss:$2 sm:$0xff] }
  0x7a   : > { %4472 = vmatmul.msk.f32.gmra.mxu0 %vm292_vm1, %v4453_v60  ;;  %4510 = vmatmul.msk.f32.gmra.mxu1 %vm292_vm1, %v4490_v62  ;;  %v4631_v62 = vld [vmem:[%s5264_s18 + $0x33] ss:$2 sm:$0xff] }
  0x7b   : > { %4548 = vmatmul.msk.f32.gmra.mxu2 %vm292_vm1, %v4528_v61  ;;  %4586 = vmatmul.msk.f32.gmra.mxu3 %vm292_vm1, %v4566_v63  ;;  %v4707_v63 = vld [vmem:[%s5264_s18 + $0x35] ss:$2 sm:$0xff] }
  0x82   : > { %4473 = vmatmul.msk.f32.gmra.mxu0 %vm292_vm1, %v4454_v0  ;;  %4511 = vmatmul.msk.f32.gmra.mxu1 %vm292_vm1, %v4491_v2 }
  0x83   : > { %4549 = vmatmul.msk.f32.gmra.mxu2 %vm292_vm1, %v4529_v1  ;;  %4587 = vmatmul.msk.f32.gmra.mxu3 %vm292_vm1, %v4567_v3 }
  0x8a   : > { %4474 = vmatmul.msk.f32.gmra.mxu0 %vm292_vm1, %v4455_v8  ;;  %4512 = vmatmul.msk.f32.gmra.mxu1 %vm292_vm1, %v4492_v10  ;;  %v4632_v10 = vld [vmem:[%s5264_s18 + $0x43] ss:$2 sm:$0xff] }
  0x8b   : > { %4550 = vmatmul.msk.f32.gmra.mxu2 %vm292_vm1, %v4530_v9  ;;  %4588 = vmatmul.msk.f32.gmra.mxu3 %vm292_vm1, %v4568_v11  ;;  %v4708_v11 = vld [vmem:[%s5264_s18 + $0x45] ss:$2 sm:$0xff] }
  0x8f   : > { %v368_v13 = vpop.f32.mrf.mxu0  ;;  %v552_v17 = vpop.f32.mrf.mxu1 }
  0x90   : > { %v422_v16 = vadd.f32 %v5413_v12, %v368_v13 }
  0x92   : > { %v606_v20 = vadd.f32 %v552_v17, %v422_v16  ;;  %4475 = vmatmul.msk.f32.gmra.mxu0 %vm292_vm1, %v4456_v14  ;;  %4513 = vmatmul.msk.f32.gmra.mxu1 %vm292_vm1, %v4493_v18  ;;  %v4595_v18 = vld [vmem:[%s5264_s18 + $0x52] ss:$2 sm:$0xff] }
  0x93   : > { %4551 = vmatmul.msk.f32.gmra.mxu2 %vm292_vm1, %v4531_v15  ;;  %4589 = vmatmul.msk.f32.gmra.mxu3 %vm292_vm1, %v4569_v19  ;;  %v4671_v19 = vld [vmem:[%s5264_s18 + $0x54] ss:$2 sm:$0xff] }
  0x96   : > { %v736_v21 = vpop.f32.mrf.mxu2  ;;  %v920_v23 = vpop.f32.mrf.mxu3 }
  0x97   : > { %v790_v22 = vadd.f32 %v736_v21, %v606_v20  ;;  %v371_v24 = vpop.f32.mrf.mxu0  ;;  %v555_v28 = vpop.f32.mrf.mxu1 }
  0x98   : > { %v4709_v24 = vld [vmem:[%s5264_s18 + $0x55] ss:$2 sm:$0xff] }
  0x99   : > { %v5426_v27 = vadd.f32 %v920_v23, %v790_v22  ;;  %v4633_v23 = vld [vmem:[%s5264_s18 + $0x53] ss:$2 sm:$0xff] }
  0x9a   : > { %4476 = vmatmul.msk.f32.gmra.mxu0 %vm292_vm1, %v4457_v25  ;;  %4514 = vmatmul.msk.f32.gmra.mxu1 %vm292_vm1, %v4494_v29 }
  0x9b   : > { %4552 = vmatmul.msk.f32.gmra.mxu2 %vm292_vm1, %v4532_v26  ;;  %4590 = vmatmul.msk.f32.gmra.mxu3 %vm292_vm1, %v4570_v30 }
  0x9e   : > { %v739_v31 = vpop.f32.mrf.mxu2  ;;  %v923_v32 = vpop.f32.mrf.mxu3 }
  0x9f   : > { %v374_v33 = vpop.f32.mrf.mxu0  ;;  %v558_v37 = vpop.f32.mrf.mxu1  ;;  %v4596_v31 = vld [vmem:[%s5264_s18 + $0x62] ss:$2 sm:$0xff] }
  0xa0   : > { %v424_v36 = vadd.f32 %v5413_v12, %v374_v33  ;;  %v4672_v32 = vld [vmem:[%s5264_s18 + $0x64] ss:$2 sm:$0xff] }
  0xa2   : > { %v608_v40 = vadd.f32 %v558_v37, %v424_v36  ;;  %4611 = vmatmul.msk.f32.vlgmr.msrb.gmra.mxu0 %vm292_vm1, %v4591_v34  ;;  %4649 = vmatmul.msk.f32.vlgmr.msrb.gmra.mxu1 %vm292_vm1, %v4629_v38  ;;  %v4634_v36 = vld [vmem:[%s5264_s18 + $0x63] ss:$2 sm:$0xff] }
  0xa3   : > { %4687 = vmatmul.msk.f32.vlgmr.msrb.gmra.mxu2 %vm292_vm1, %v4667_v35  ;;  %4725 = vmatmul.msk.f32.vlgmr.msrb.gmra.mxu3 %vm292_vm1, %v4705_v39  ;;  %v4710_v37 = vld [vmem:[%s5264_s18 + $0x65] ss:$2 sm:$0xff] }
  0xa6   : > { %v742_v41 = vpop.f32.mrf.mxu2  ;;  %v926_v43 = vpop.f32.mrf.mxu3 }
  0xa7   : > { %v792_v42 = vadd.f32 %v742_v41, %v608_v40  ;;  %v377_v44 = vpop.f32.mrf.mxu0  ;;  %v561_v49 = vpop.f32.mrf.mxu1 }
  0xa8   : > { %v425_v47 = vadd.f32 %v5413_v12, %v377_v44  ;;  %v4673_v44 = vld [vmem:[%s5264_s18 + $0x74] ss:$2 sm:$0xff] }
  0xa9   : > { %v5446_v48 = vadd.f32 %v926_v43, %v792_v42  ;;  %v4597_v43 = vld [vmem:[%s5264_s18 + $0x72] ss:$2 sm:$0xff] }
  0xaa   : > { %v609_v52 = vadd.f32 %v561_v49, %v425_v47  ;;  %4612 = vmatmul.msk.f32.gmra.mxu0 %vm292_vm1, %v4592_v45  ;;  %4650 = vmatmul.msk.f32.gmra.mxu1 %vm292_vm1, %v4630_v50  ;;  %v4635_v47 = vld [vmem:[%s5264_s18 + $0x73] ss:$2 sm:$0xff] }
  0xab   : > { %4688 = vmatmul.msk.f32.gmra.mxu2 %vm292_vm1, %v4668_v46  ;;  %4726 = vmatmul.msk.f32.gmra.mxu3 %vm292_vm1, %v4706_v51  ;;  %v4711_v49 = vld [vmem:[%s5264_s18 + $0x75] ss:$2 sm:$0xff] }
  0xae   : > { %v745_v53 = vpop.f32.mrf.mxu2  ;;  %v929_v55 = vpop.f32.mrf.mxu3 }
  0xaf   : > { %v793_v54 = vadd.f32 %v745_v53, %v609_v52  ;;  %v380_v56 = vpop.f32.mrf.mxu0  ;;  %v564_v61 = vpop.f32.mrf.mxu1  ;;  %v4598_v53 = vld [vmem:[%s5264_s18 + $0x82] ss:$2 sm:$0xff] }
  0xb0   : > { %v426_v59 = vadd.f32 %v5413_v12, %v380_v56 }
  0xb1   : > { %v5457_v60 = vadd.f32 %v929_v55, %v793_v54  ;;  %v4674_v54 = vld [vmem:[%s5264_s18 + $0x84] ss:$2 sm:$0xff] }
  0xb2   : > { %v610_v0 = vadd.f32 %v564_v61, %v426_v59  ;;  %4613 = vmatmul.msk.f32.gmra.mxu0 %vm292_vm1, %v4593_v57  ;;  %4651 = vmatmul.msk.f32.gmra.mxu1 %vm292_vm1, %v4631_v62  ;;  %v4636_v57 = vld [vmem:[%s5264_s18 + $0x83] ss:$2 sm:$0xff] }
  0xb3   : > { %4689 = vmatmul.msk.f32.gmra.mxu2 %vm292_vm1, %v4669_v58  ;;  %4727 = vmatmul.msk.f32.gmra.mxu3 %vm292_vm1, %v4707_v63  ;;  %v4712_v58 = vld [vmem:[%s5264_s18 + $0x85] ss:$2 sm:$0xff] }
  0xb6   : > { %v748_v1 = vpop.f32.mrf.mxu2  ;;  %v932_v3 = vpop.f32.mrf.mxu3 }
  0xb7   : > { %v794_v2 = vadd.f32 %v748_v1, %v610_v0  ;;  %v383_v4 = vpop.f32.mrf.mxu0  ;;  %v567_v9 = vpop.f32.mrf.mxu1  ;;  %v4599_v1 = vld [vmem:[%s5264_s18 + $0x92] ss:$2 sm:$0xff] }
  0xb8   : > { %v427_v7 = vadd.f32 %v5413_v12, %v383_v4 }
  0xb9   : > { %v5468_v8 = vadd.f32 %v932_v3, %v794_v2  ;;  %v4675_v2 = vld [vmem:[%s5264_s18 + $0x94] ss:$2 sm:$0xff] }
  0xba   : > { %v611_v13 = vadd.f32 %v567_v9, %v427_v7  ;;  %4614 = vmatmul.msk.f32.gmra.mxu0 %vm292_vm1, %v4594_v5  ;;  %4652 = vmatmul.msk.f32.gmra.mxu1 %vm292_vm1, %v4632_v10  ;;  %v4637_v5 = vld [vmem:[%s5264_s18 + $0x93] ss:$2 sm:$0xff] }
  0xbb   : > { %4690 = vmatmul.msk.f32.gmra.mxu2 %vm292_vm1, %v4670_v6  ;;  %4728 = vmatmul.msk.f32.gmra.mxu3 %vm292_vm1, %v4708_v11  ;;  %v4713_v6 = vld [vmem:[%s5264_s18 + $0x95] ss:$2 sm:$0xff]  ;;  %v4600_v11 = vld [vmem:[%s5264_s18 + $0xa2] ss:$2 sm:$0xff] }
  0xbe   : > { %v751_v14 = vpop.f32.mrf.mxu2  ;;  %v935_v16 = vpop.f32.mrf.mxu3 }
  0xbf   : > { %v795_v15 = vadd.f32 %v751_v14, %v611_v13  ;;  %v386_v17 = vpop.f32.mrf.mxu0  ;;  %v570_v22 = vpop.f32.mrf.mxu1  ;;  %v4676_v13 = vld [vmem:[%s5264_s18 + $0xa4] ss:$2 sm:$0xff] }
  0xc0   : > { %v428_v20 = vadd.f32 %v5413_v12, %v386_v17  ;;  %v4714_v17 = vld [vmem:[%s5264_s18 + $0xa5] ss:$2 sm:$0xff] }
  0xc1   : > { %v5479_v21 = vadd.f32 %v935_v16, %v795_v15  ;;  %v4638_v16 = vld [vmem:[%s5264_s18 + $0xa3] ss:$2 sm:$0xff] }
  0xc2   : > { %v612_v25 = vadd.f32 %v570_v22, %v428_v20  ;;  %4615 = vmatmul.msk.f32.gmra.mxu0 %vm292_vm1, %v4595_v18  ;;  %4653 = vmatmul.msk.f32.gmra.mxu1 %vm292_vm1, %v4633_v23 }
  0xc3   : > { %4691 = vmatmul.msk.f32.gmra.mxu2 %vm292_vm1, %v4671_v19  ;;  %4729 = vmatmul.msk.f32.gmra.mxu3 %vm292_vm1, %v4709_v24  ;;  %v4601_v24 = vld [vmem:[%s5264_s18 + $0xb2] ss:$2 sm:$0xff] }
  0xc6   : > { %v754_v26 = vpop.f32.mrf.mxu2  ;;  %v938_v29 = vpop.f32.mrf.mxu3 }
  0xc7   : > { %v796_v28 = vadd.f32 %v754_v26, %v612_v25  ;;  %v389_v30 = vpop.f32.mrf.mxu0  ;;  %v573_v35 = vpop.f32.mrf.mxu1  ;;  %v4677_v25 = vld [vmem:[%s5264_s18 + $0xb4] ss:$2 sm:$0xff] }
  0xc8   : > { %v429_v33 = vadd.f32 %v5413_v12, %v389_v30  ;;  %v4639_v30 = vld [vmem:[%s5264_s18 + $0xb3] ss:$2 sm:$0xff] }
  0xc9   : > { %v5490_v34 = vadd.f32 %v938_v29, %v796_v28 }
  0xca   : > { %v613_v38 = vadd.f32 %v573_v35, %v429_v33  ;;  %4616 = vmatmul.msk.f32.gmra.mxu0 %vm292_vm1, %v4596_v31  ;;  %4654 = vmatmul.msk.f32.gmra.mxu1 %vm292_vm1, %v4634_v36  ;;  %v4715_v31 = vld [vmem:[%s5264_s18 + $0xb5] ss:$2 sm:$0xff] }
  0xcb   : > { %4692 = vmatmul.msk.f32.gmra.mxu2 %vm292_vm1, %v4672_v32  ;;  %4730 = vmatmul.msk.f32.gmra.mxu3 %vm292_vm1, %v4710_v37 }
  0xce   : > { %v757_v39 = vpop.f32.mrf.mxu2  ;;  %v941_v41 = vpop.f32.mrf.mxu3 }
  0xcf   : > { %v797_v40 = vadd.f32 %v757_v39, %v613_v38  ;;  %v392_v42 = vpop.f32.mrf.mxu0  ;;  %v576_v46 = vpop.f32.mrf.mxu1  ;;  %v4602_v38 = vld [vmem:[%s5264_s18 + $0xc2] ss:$2 sm:$0xff] }
  0xd0   : > { %v4678_v39 = vld [vmem:[%s5264_s18 + $0xc4] ss:$2 sm:$0xff] }
  0xd1   : > { %v5500_v45 = vadd.f32 %v941_v41, %v797_v40 }
  0xd2   : > { %4617 = vmatmul.msk.f32.gmra.mxu0 %vm292_vm1, %v4597_v43  ;;  %4655 = vmatmul.msk.f32.gmra.mxu1 %vm292_vm1, %v4635_v47  ;;  %v4640_v43 = vld [vmem:[%s5264_s18 + $0xc3] ss:$2 sm:$0xff] }
  0xd3   : > { %4693 = vmatmul.msk.f32.gmra.mxu2 %vm292_vm1, %v4673_v44  ;;  %4731 = vmatmul.msk.f32.gmra.mxu3 %vm292_vm1, %v4711_v49  ;;  %v4716_v44 = vld [vmem:[%s5264_s18 + $0xc5] ss:$2 sm:$0xff] }
  0xd6   : > { %v760_v50 = vpop.f32.mrf.mxu2  ;;  %v944_v51 = vpop.f32.mrf.mxu3 }
  0xd7   : > { %v395_v52 = vpop.f32.mrf.mxu0  ;;  %v579_v56 = vpop.f32.mrf.mxu1 }
  0xd8   : > { %v431_v55 = vadd.f32 %v5413_v12, %v395_v52  ;;  %v4603_v52 = vld [vmem:[%s5264_s18 + $0xd2] ss:$2 sm:$0xff] }
  0xda   : > { %v615_v59 = vadd.f32 %v579_v56, %v431_v55  ;;  %4618 = vmatmul.msk.f32.gmra.mxu0 %vm292_vm1, %v4598_v53  ;;  %4656 = vmatmul.msk.f32.gmra.mxu1 %vm292_vm1, %v4636_v57  ;;  %v4679_v53 = vld [vmem:[%s5264_s18 + $0xd4] ss:$2 sm:$0xff]  ;;  %v4641_v57 = vld [vmem:[%s5264_s18 + $0xd3] ss:$2 sm:$0xff] }
  0xdb   : > { %4694 = vmatmul.msk.f32.gmra.mxu2 %vm292_vm1, %v4674_v54  ;;  %4732 = vmatmul.msk.f32.gmra.mxu3 %vm292_vm1, %v4712_v58  ;;  %v4717_v58 = vld [vmem:[%s5264_s18 + $0xd5] ss:$2 sm:$0xff] }
  0xde   : > { %v763_v61 = vpop.f32.mrf.mxu2  ;;  %v947_v63 = vpop.f32.mrf.mxu3 }
  0xdf   : > { %v799_v62 = vadd.f32 %v763_v61, %v615_v59  ;;  %v398_v0 = vpop.f32.mrf.mxu0  ;;  %v582_v4 = vpop.f32.mrf.mxu1 }
  0xe1   : > { %v5519_v3 = vadd.f32 %v947_v63, %v799_v62 }
  0xe2   : > { %4619 = vmatmul.msk.f32.gmra.mxu0 %vm292_vm1, %v4599_v1  ;;  %4657 = vmatmul.msk.f32.gmra.mxu1 %vm292_vm1, %v4637_v5  ;;  %v4604_v1 = vld [vmem:[%s5264_s18 + $0xe2] ss:$2 sm:$0xff] }
  0xe3   : > { %4695 = vmatmul.msk.f32.gmra.mxu2 %vm292_vm1, %v4675_v2  ;;  %4733 = vmatmul.msk.f32.gmra.mxu3 %vm292_vm1, %v4713_v6  ;;  %v4680_v2 = vld [vmem:[%s5264_s18 + $0xe4] ss:$2 sm:$0xff] }
  0xe6   : > { %v766_v7 = vpop.f32.mrf.mxu2  ;;  %v950_v9 = vpop.f32.mrf.mxu3 }
  0xe7   : > { %v401_v10 = vpop.f32.mrf.mxu0  ;;  %v585_v15 = vpop.f32.mrf.mxu1  ;;  %v4642_v7 = vld [vmem:[%s5264_s18 + $0xe3] ss:$2 sm:$0xff] }
  0xe8   : > { %v433_v14 = vadd.f32 %v5413_v12, %v401_v10  ;;  %v4718_v9 = vld [vmem:[%s5264_s18 + $0xe5] ss:$2 sm:$0xff] }
  0xea   : > { %v617_v18 = vadd.f32 %v585_v15, %v433_v14  ;;  %4620 = vmatmul.msk.f32.gmra.mxu0 %vm292_vm1, %v4600_v11  ;;  %4658 = vmatmul.msk.f32.gmra.mxu1 %vm292_vm1, %v4638_v16  ;;  %v4605_v16 = vld [vmem:[%s5264_s18 + $0xf2] ss:$2 sm:$0xff] }
  0xeb   : > { %4696 = vmatmul.msk.f32.gmra.mxu2 %vm292_vm1, %v4676_v13  ;;  %4734 = vmatmul.msk.f32.gmra.mxu3 %vm292_vm1, %v4714_v17  ;;  %v4681_v17 = vld [vmem:[%s5264_s18 + $0xf4] ss:$2 sm:$0xff] }
  0xee   : > { %v769_v19 = vpop.f32.mrf.mxu2  ;;  %v953_v22 = vpop.f32.mrf.mxu3 }
  0xef   : > { %v801_v20 = vadd.f32 %v769_v19, %v617_v18  ;;  %v404_v23 = vpop.f32.mrf.mxu0  ;;  %v588_v29 = vpop.f32.mrf.mxu1 }
  0xf0   : > { %v434_v26 = vadd.f32 %v5413_v12, %v404_v23  ;;  %v4719_v23 = vld [vmem:[%s5264_s18 + $0xf5] ss:$2 sm:$0xff] }
  0xf1   : > { %v5539_v28 = vadd.f32 %v953_v22, %v801_v20  ;;  %v4643_v22 = vld [vmem:[%s5264_s18 + $0xf3] ss:$2 sm:$0xff] }
  0xf2   : > { %v618_v32 = vadd.f32 %v588_v29, %v434_v26  ;;  %4621 = vmatmul.msk.f32.gmra.mxu0 %vm292_vm1, %v4601_v24  ;;  %4659 = vmatmul.msk.f32.gmra.mxu1 %vm292_vm1, %v4639_v30  ;;  %v5027_v26 = vld [vmem:[%s6356_s1 + $0x3c] sm:$0x7] }
  0xf3   : > { %4697 = vmatmul.msk.f32.gmra.mxu2 %vm292_vm1, %v4677_v25  ;;  %4735 = vmatmul.msk.f32.gmra.mxu3 %vm292_vm1, %v4715_v31  ;;  %v4989_v25 = vld [vmem:[%s6356_s1 + $0x38] sm:$0x7] }
  0xf4   : > { %4990 = vmatpush.msk.msrb.mxu2 %vm347_vm0, %v4989_v25  ;;  %5028 = vmatpush.msk.msrb.mxu3 %vm347_vm0, %v5027_v26  ;;  %v4782_v25 = vld [vmem:[%s5264_s18 + $0x35] ss:$2 sm:$0xff] }
  0xf6   : > { %v772_v33 = vpop.f32.mrf.mxu2  ;;  %v956_v36 = vpop.f32.mrf.mxu3 }
  0xf7   : > { %v802_v35 = vadd.f32 %v772_v33, %v618_v32  ;;  %v407_v37 = vpop.f32.mrf.mxu0  ;;  %v591_v42 = vpop.f32.mrf.mxu1  ;;  %v4951_v32 = vld [vmem:[%s6356_s1 + $0x34] sm:$0x7] }
  0xf8   : > { %v435_v40 = vadd.f32 %v5413_v12, %v407_v37  ;;  %4952 = vmatpush.msk.msrb.mxu1 %vm347_vm0, %v4951_v32  ;;  %v4745_v32 = vld [vmem:[%s5264_s18 + $0x44] ss:$2 sm:$0xff] }
  0xf9   : > { %v5550_v41 = vadd.f32 %v956_v36, %v802_v35  ;;  %v4606_v35 = vld [vmem:[%s5264_s18 + $0x102] ss:$2 sm:$0xff] }
  0xfa   : > { %v619_v46 = vadd.f32 %v591_v42, %v435_v40  ;;  %4622 = vmatmul.msk.f32.gmra.mxu0 %vm292_vm1, %v4602_v38  ;;  %4660 = vmatmul.msk.f32.gmra.mxu1 %vm292_vm1, %v4640_v43  ;;  %v4682_v36 = vld [vmem:[%s5264_s18 + $0x104] ss:$2 sm:$0xff]  ;;  %v4720_v40 = vld [vmem:[%s5264_s18 + $0x105] ss:$2 sm:$0xff] }
  0xfb   : > { %4698 = vmatmul.msk.f32.gmra.mxu2 %vm292_vm1, %v4678_v39  ;;  %4736 = vmatmul.msk.f32.gmra.mxu3 %vm292_vm1, %v4716_v44  ;;  %v4644_v39 = vld [vmem:[%s5264_s18 + $0x103] ss:$2 sm:$0xff] }
  0xfe   : > { %v775_v47 = vpop.f32.mrf.mxu2  ;;  %v959_v50 = vpop.f32.mrf.mxu3 }
  0xff   : > { %v803_v49 = vadd.f32 %v775_v47, %v619_v46  ;;  %v410_v51 = vpop.f32.mrf.mxu0  ;;  %v594_v56 = vpop.f32.mrf.mxu1  ;;  %v4607_v46 = vld [vmem:[%s5264_s18 + $0x112] ss:$2 sm:$0xff] }
 0x100   : > { %v436_v54 = vadd.f32 %v5413_v12, %v410_v51  ;;  %v4683_v47 = vld [vmem:[%s5264_s18 + $0x114] ss:$2 sm:$0xff]  ;;  %v4645_v51 = vld [vmem:[%s5264_s18 + $0x113] ss:$2 sm:$0xff] }
 0x101   : > { %v5561_v55 = vadd.f32 %v959_v50, %v803_v49 }
 0x102   : > { %v620_v59 = vadd.f32 %v594_v56, %v436_v54  ;;  %4623 = vmatmul.msk.f32.gmra.mxu0 %vm292_vm1, %v4603_v52  ;;  %4661 = vmatmul.msk.f32.gmra.mxu1 %vm292_vm1, %v4641_v57  ;;  %v4721_v52 = vld [vmem:[%s5264_s18 + $0x115] ss:$2 sm:$0xff] }
 0x103   : > { %4699 = vmatmul.msk.f32.gmra.mxu2 %vm292_vm1, %v4679_v53  ;;  %4737 = vmatmul.msk.f32.gmra.mxu3 %vm292_vm1, %v4717_v58  ;;  %v4608_v58 = vld [vmem:[%s5264_s18 + $0x122] ss:$2 sm:$0xff] }
 0x106   : > { %v778_v61 = vpop.f32.mrf.mxu2  ;;  %v962_v63 = vpop.f32.mrf.mxu3 }
 0x107   : > { %v804_v62 = vadd.f32 %v778_v61, %v620_v59  ;;  %v413_v0 = vpop.f32.mrf.mxu0  ;;  %v597_v6 = vpop.f32.mrf.mxu1  ;;  %v4684_v59 = vld [vmem:[%s5264_s18 + $0x124] ss:$2 sm:$0xff] }
 0x108   : > { %v437_v4 = vadd.f32 %v5413_v12, %v413_v0  ;;  %v4722_v0 = vld [vmem:[%s5264_s18 + $0x125] ss:$2 sm:$0xff] }
 0x109   : > { %v5572_v5 = vadd.f32 %v962_v63, %v804_v62  ;;  %v4646_v63 = vld [vmem:[%s5264_s18 + $0x123] ss:$2 sm:$0xff] }
 0x10a   : > { %v621_v10 = vadd.f32 %v597_v6, %v437_v4  ;;  %4624 = vmatmul.msk.f32.gmra.mxu0 %vm292_vm1, %v4604_v1  ;;  %4662 = vmatmul.msk.f32.gmra.mxu1 %vm292_vm1, %v4642_v7  ;;  %v4743_v6 = vld [vmem:[%s5264_s18 + $0x24] ss:$2 sm:$0xff] }
 0x10b   : > { %4700 = vmatmul.msk.f32.gmra.mxu2 %vm292_vm1, %v4680_v2  ;;  %4738 = vmatmul.msk.f32.gmra.mxu3 %vm292_vm1, %v4718_v9  ;;  %v4819_v7 = vld [vmem:[%s5264_s18 + $0x26] ss:$2 sm:$0xff] }
 0x10e   : > { %v781_v11 = vpop.f32.mrf.mxu2  ;;  %v965_v14 = vpop.f32.mrf.mxu3 }
 0x10f   : > { %v805_v13 = vadd.f32 %v781_v11, %v621_v10  ;;  %v416_v15 = vpop.f32.mrf.mxu0  ;;  %v600_v20 = vpop.f32.mrf.mxu1  ;;  %v4781_v11 = vld [vmem:[%s5264_s18 + $0x25] ss:$2 sm:$0xff] }
 0x110   : > { %v438_v18 = vadd.f32 %v5413_v12, %v416_v15  ;;  %v4913_v12 = vld [vmem:[%s6356_s1 + $0x30] sm:$0x7] }
 0x111   : > { %v5583_v19 = vadd.f32 %v965_v14, %v805_v13  ;;  %4914 = vmatpush.msk.msrb.mxu0 %vm347_vm0, %v4913_v12  ;;  %v4857_v13 = vld [vmem:[%s5264_s18 + $0x27] ss:$2 sm:$0xff]  ;;  %v4858_v12 = vld [vmem:[%s5264_s18 + $0x37] ss:$2 sm:$0xff] }
 0x112   : > { %v622_v24 = vadd.f32 %v600_v20, %v438_v18  ;;  %4625 = vmatmul.msk.f32.gmra.mxu0 %vm292_vm1, %v4605_v16  ;;  %4663 = vmatmul.msk.f32.gmra.mxu1 %vm292_vm1, %v4643_v22  ;;  %v4744_v20 = vld [vmem:[%s5264_s18 + $0x34] ss:$2 sm:$0xff] }
 0x113   : > { %4701 = vmatmul.msk.f32.gmra.mxu2 %vm292_vm1, %v4681_v17  ;;  %4739 = vmatmul.msk.f32.gmra.mxu3 %vm292_vm1, %v4719_v23 }
 0x116   : > { %v784_v29 = vpop.f32.mrf.mxu2  ;;  %v968_v31 = vpop.f32.mrf.mxu3 }
 0x117   : > { %v806_v30 = vadd.f32 %v784_v29, %v622_v24  ;;  %v419_v33 = vpop.f32.mrf.mxu0  ;;  %v603_v38 = vpop.f32.mrf.mxu1 }
 0x118   : > { %v4821_v33 = vld [vmem:[%s5264_s18 + $0x46] ss:$2 sm:$0xff] }
 0x119   : > { %v5609_v37 = vadd.f32 %v968_v31, %v806_v30 }
 0x11a   : > { %4626 = vmatmul.msk.f32.gmra.mxu0 %vm292_vm1, %v4606_v35  ;;  %4664 = vmatmul.msk.f32.gmra.mxu1 %vm292_vm1, %v4644_v39  ;;  %v4783_v39 = vld [vmem:[%s5264_s18 + $0x45] ss:$2 sm:$0xff] }
 0x11b   : > { %4702 = vmatmul.msk.f32.gmra.mxu2 %vm292_vm1, %v4682_v36  ;;  %4740 = vmatmul.msk.f32.gmra.mxu3 %vm292_vm1, %v4720_v40  ;;  %v4859_v40 = vld [vmem:[%s5264_s18 + $0x47] ss:$2 sm:$0xff] }
 0x11e   : > { %v787_v42 = vpop.f32.mrf.mxu2  ;;  %v971_v43 = vpop.f32.mrf.mxu3 }
 0x11f   : > { %v1087_v44 = vpop.f32.mrf.mxu0  ;;  %v1254_v50 = vpop.f32.mrf.mxu1 }
 0x120   : > { %v1141_v49 = vadd.f32 %v1087_v44, %v5426_v27 }
 0x122   : > { %4627 = vmatmul.msk.f32.gmra.mxu0 %vm292_vm1, %v4607_v46  ;;  %4665 = vmatmul.msk.f32.gmra.mxu1 %vm292_vm1, %v4645_v51  ;;  %v1308_v53 = vadd.f32 %v1254_v50, %v1141_v49  ;;  %v4822_v49 = vld [vmem:[%s5264_s18 + $0x56] ss:$2 sm:$0xff] }
 0x123   : > { %4703 = vmatmul.msk.f32.gmra.mxu2 %vm292_vm1, %v4683_v47  ;;  %4741 = vmatmul.msk.f32.gmra.mxu3 %vm292_vm1, %v4721_v52  ;;  %v4746_v47 = vld [vmem:[%s5264_s18 + $0x54] ss:$2 sm:$0xff] }
 0x126   : > { %v1438_v54 = vpop.f32.mrf.mxu2  ;;  %v1622_v57 = vpop.f32.mrf.mxu3 }
 0x127   : > { %v1492_v56 = vadd.f32 %v1438_v54, %v1308_v53  ;;  %v1090_v27 = vpop.f32.mrf.mxu0  ;;  %v1257_v62 = vpop.f32.mrf.mxu1  ;;  %v4784_v53 = vld [vmem:[%s5264_s18 + $0x55] ss:$2 sm:$0xff] }
 0x128   : > { %v4860_v54 = vld [vmem:[%s5264_s18 + $0x57] ss:$2 sm:$0xff]  ;;  %v4823_v62 = vld [vmem:[%s5264_s18 + $0x66] ss:$2 sm:$0xff] }
 0x129   : > { %v5628_v61 = vadd.f32 %v1622_v57, %v1492_v56 }
 0x12a   : > { %4628 = vmatmul.msk.f32.gmra.mxu0 %vm292_vm1, %v4608_v58  ;;  %4666 = vmatmul.msk.f32.gmra.mxu1 %vm292_vm1, %v4646_v63 }
 0x12b   : > { %4704 = vmatmul.msk.f32.gmra.mxu2 %vm292_vm1, %v4684_v59  ;;  %4742 = vmatmul.msk.f32.gmra.mxu3 %vm292_vm1, %v4722_v0  ;;  %v4747_v59 = vld [vmem:[%s5264_s18 + $0x64] ss:$2 sm:$0xff] }
 0x12e   : > { %v1441_v1 = vpop.f32.mrf.mxu2  ;;  %v1625_v2 = vpop.f32.mrf.mxu3 }
 0x12f   : > { %v1093_v4 = vpop.f32.mrf.mxu0  ;;  %v1260_v10 = vpop.f32.mrf.mxu1  ;;  %v4785_v2 = vld [vmem:[%s5264_s18 + $0x65] ss:$2 sm:$0xff] }
 0x130   : > { %v1143_v9 = vadd.f32 %v1093_v4, %v5446_v48  ;;  %v4820_v48 = vld [vmem:[%s5264_s18 + $0x36] ss:$2 sm:$0xff]  ;;  %v4861_v4 = vld [vmem:[%s5264_s18 + $0x67] ss:$2 sm:$0xff] }
 0x132   : > { %4763 = vmatmul.msk.f32.vlgmr.msra.gmra.mxu0 %vm292_vm1, %v4743_v6  ;;  %4801 = vmatmul.msk.f32.vlgmr.msra.gmra.mxu1 %vm292_vm1, %v4781_v11  ;;  %v1310_v14 = vadd.f32 %v1260_v10, %v1143_v9  ;;  %v4748_v11 = vld [vmem:[%s5264_s18 + $0x74] ss:$2 sm:$0xff] }
 0x133   : > { %4839 = vmatmul.msk.f32.vlgmr.msra.gmra.mxu2 %vm292_vm1, %v4819_v7  ;;  %4877 = vmatmul.msk.f32.vlgmr.msra.gmra.mxu3 %vm292_vm1, %v4857_v13  ;;  %v4824_v13 = vld [vmem:[%s5264_s18 + $0x76] ss:$2 sm:$0xff] }
 0x136   : > { %v1444_v15 = vpop.f32.mrf.mxu2  ;;  %v1628_v17 = vpop.f32.mrf.mxu3 }
 0x137   : > { %v1494_v16 = vadd.f32 %v1444_v15, %v1310_v14  ;;  %v1096_v18 = vpop.f32.mrf.mxu0  ;;  %v1263_v24 = vpop.f32.mrf.mxu1 }
 0x138   : > { %v1144_v22 = vadd.f32 %v1096_v18, %v5457_v60  ;;  %v4862_v18 = vld [vmem:[%s5264_s18 + $0x77] ss:$2 sm:$0xff] }
 0x139   : > { %v5648_v23 = vadd.f32 %v1628_v17, %v1494_v16  ;;  %v4786_v17 = vld [vmem:[%s5264_s18 + $0x75] ss:$2 sm:$0xff] }
 0x13a   : > { %4764 = vmatmul.msk.f32.gmra.mxu0 %vm292_vm1, %v4744_v20  ;;  %4802 = vmatmul.msk.f32.gmra.mxu1 %vm292_vm1, %v4782_v25  ;;  %v1311_v26 = vadd.f32 %v1263_v24, %v1144_v22  ;;  %v4749_v25 = vld [vmem:[%s5264_s18 + $0x84] ss:$2 sm:$0xff] }
 0x13b   : > { %4840 = vmatmul.msk.f32.gmra.mxu2 %vm292_vm1, %v4820_v48  ;;  %4878 = vmatmul.msk.f32.gmra.mxu3 %vm292_vm1, %v4858_v12  ;;  %v4825_v12 = vld [vmem:[%s5264_s18 + $0x86] ss:$2 sm:$0xff] }
 0x13e   : > { %v1447_v29 = vpop.f32.mrf.mxu2  ;;  %v1631_v31 = vpop.f32.mrf.mxu3 }
 0x13f   : > { %v1495_v30 = vadd.f32 %v1447_v29, %v1311_v26  ;;  %v1099_v60 = vpop.f32.mrf.mxu0  ;;  %v1266_v38 = vpop.f32.mrf.mxu1 }
 0x140   : > { %v1145_v35 = vadd.f32 %v1099_v60, %v5468_v8 }
 0x141   : > { %v5659_v36 = vadd.f32 %v1631_v31, %v1495_v30  ;;  %v4787_v30 = vld [vmem:[%s5264_s18 + $0x85] ss:$2 sm:$0xff] }
 0x142   : > { %4765 = vmatmul.msk.f32.gmra.mxu0 %vm292_vm1, %v4745_v32  ;;  %4803 = vmatmul.msk.f32.gmra.mxu1 %vm292_vm1, %v4783_v39  ;;  %v1312_v42 = vadd.f32 %v1266_v38, %v1145_v35  ;;  %v4863_v31 = vld [vmem:[%s5264_s18 + $0x87] ss:$2 sm:$0xff]  ;;  %v4750_v35 = vld [vmem:[%s5264_s18 + $0x94] ss:$2 sm:$0xff] }
 0x143   : > { %4841 = vmatmul.msk.f32.gmra.mxu2 %vm292_vm1, %v4821_v33  ;;  %4879 = vmatmul.msk.f32.gmra.mxu3 %vm292_vm1, %v4859_v40  ;;  %v4826_v38 = vld [vmem:[%s5264_s18 + $0x96] ss:$2 sm:$0xff] }
 0x146   : > { %v1450_v43 = vpop.f32.mrf.mxu2  ;;  %v1634_v46 = vpop.f32.mrf.mxu3 }
 0x147   : > { %v1496_v44 = vadd.f32 %v1450_v43, %v1312_v42  ;;  %v1102_v8 = vpop.f32.mrf.mxu0  ;;  %v1269_v52 = vpop.f32.mrf.mxu1  ;;  %v4788_v42 = vld [vmem:[%s5264_s18 + $0x95] ss:$2 sm:$0xff] }
 0x148   : > { %v1146_v50 = vadd.f32 %v1102_v8, %v5479_v21  ;;  %v4864_v43 = vld [vmem:[%s5264_s18 + $0x97] ss:$2 sm:$0xff] }
 0x149   : > { %v5670_v51 = vadd.f32 %v1634_v46, %v1496_v44 }
 0x14a   : > { %4766 = vmatmul.msk.f32.gmra.mxu0 %vm292_vm1, %v4746_v47  ;;  %4804 = vmatmul.msk.f32.gmra.mxu1 %vm292_vm1, %v4784_v53  ;;  %v1313_v56 = vadd.f32 %v1269_v52, %v1146_v50  ;;  %v4827_v50 = vld [vmem:[%s5264_s18 + $0xa6] ss:$2 sm:$0xff] }
 0x14b   : > { %4842 = vmatmul.msk.f32.gmra.mxu2 %vm292_vm1, %v4822_v49  ;;  %4880 = vmatmul.msk.f32.gmra.mxu3 %vm292_vm1, %v4860_v54  ;;  %v4751_v49 = vld [vmem:[%s5264_s18 + $0xa4] ss:$2 sm:$0xff]  ;;  %v4789_v54 = vld [vmem:[%s5264_s18 + $0xa5] ss:$2 sm:$0xff] }
 0x14e   : > { %v1453_v57 = vpop.f32.mrf.mxu2  ;;  %v1637_v58 = vpop.f32.mrf.mxu3 }
 0x14f   : > { %v1497_v27 = vadd.f32 %v1453_v57, %v1313_v56  ;;  %v1105_v21 = vpop.f32.mrf.mxu0  ;;  %v1272_v1 = vpop.f32.mrf.mxu1  ;;  %v4865_v56 = vld [vmem:[%s5264_s18 + $0xa7] ss:$2 sm:$0xff] }
 0x150   : > { %v1147_v63 = vadd.f32 %v1105_v21, %v5490_v34  ;;  %v4752_v21 = vld [vmem:[%s5264_s18 + $0xb4] ss:$2 sm:$0xff] }
 0x151   : > { %v5681_v0 = vadd.f32 %v1637_v58, %v1497_v27 }
 0x152   : > { %4767 = vmatmul.msk.f32.gmra.mxu0 %vm292_vm1, %v4747_v59  ;;  %4805 = vmatmul.msk.f32.gmra.mxu1 %vm292_vm1, %v4785_v2  ;;  %v1314_v6 = vadd.f32 %v1272_v1, %v1147_v63  ;;  %v4828_v59 = vld [vmem:[%s5264_s18 + $0xb6] ss:$2 sm:$0xff]  ;;  %v4790_v1 = vld [vmem:[%s5264_s18 + $0xb5] ss:$2 sm:$0xff] }
 0x153   : > { %4843 = vmatmul.msk.f32.gmra.mxu2 %vm292_vm1, %v4823_v62  ;;  %4881 = vmatmul.msk.f32.gmra.mxu3 %vm292_vm1, %v4861_v4  ;;  %v4866_v2 = vld [vmem:[%s5264_s18 + $0xb7] ss:$2 sm:$0xff] }
 0x156   : > { %v1456_v7 = vpop.f32.mrf.mxu2  ;;  %v1640_v10 = vpop.f32.mrf.mxu3 }
 0x157   : > { %v1498_v9 = vadd.f32 %v1456_v7, %v1314_v6  ;;  %v1108_v34 = vpop.f32.mrf.mxu0  ;;  %v1275_v16 = vpop.f32.mrf.mxu1 }
 0x158   : > { %v1148_v14 = vadd.f32 %v1108_v34, %v5500_v45  ;;  %v4753_v34 = vld [vmem:[%s5264_s18 + $0xc4] ss:$2 sm:$0xff] }
 0x159   : > { %v5692_v15 = vadd.f32 %v1640_v10, %v1498_v9 }
 0x15a   : > { %4768 = vmatmul.msk.f32.gmra.mxu0 %vm292_vm1, %v4748_v11  ;;  %4806 = vmatmul.msk.f32.gmra.mxu1 %vm292_vm1, %v4786_v17  ;;  %v1315_v20 = vadd.f32 %v1275_v16, %v1148_v14  ;;  %v4791_v16 = vld [vmem:[%s5264_s18 + $0xc5] ss:$2 sm:$0xff] }
 0x15b   : > { %4844 = vmatmul.msk.f32.gmra.mxu2 %vm292_vm1, %v4824_v13  ;;  %4882 = vmatmul.msk.f32.gmra.mxu3 %vm292_vm1, %v4862_v18  ;;  %v4867_v17 = vld [vmem:[%s5264_s18 + $0xc7] ss:$2 sm:$0xff] }
 0x15e   : > { %v1459_v48 = vpop.f32.mrf.mxu2  ;;  %v1643_v45 = vpop.f32.mrf.mxu3 }
 0x15f   : > { %v1499_v22 = vadd.f32 %v1459_v48, %v1315_v20  ;;  %v1111_v24 = vpop.f32.mrf.mxu0  ;;  %v1278_v29 = vpop.f32.mrf.mxu1 }
 0x160   : > { %v4830_v24 = vld [vmem:[%s5264_s18 + $0xd6] ss:$2 sm:$0xff] }
 0x161   : > { %v5702_v26 = vadd.f32 %v1643_v45, %v1499_v22  ;;  %v4754_v45 = vld [vmem:[%s5264_s18 + $0xd4] ss:$2 sm:$0xff] }
 0x162   : > { %4769 = vmatmul.msk.f32.gmra.mxu0 %vm292_vm1, %v4749_v25  ;;  %4807 = vmatmul.msk.f32.gmra.mxu1 %vm292_vm1, %v4787_v30  ;;  %v4792_v30 = vld [vmem:[%s5264_s18 + $0xd5] ss:$2 sm:$0xff] }
 0x163   : > { %4845 = vmatmul.msk.f32.gmra.mxu2 %vm292_vm1, %v4825_v12  ;;  %4883 = vmatmul.msk.f32.gmra.mxu3 %vm292_vm1, %v4863_v31  ;;  %v4868_v31 = vld [vmem:[%s5264_s18 + $0xd7] ss:$2 sm:$0xff] }
 0x166   : > { %v1462_v60 = vpop.f32.mrf.mxu2  ;;  %v1646_v32 = vpop.f32.mrf.mxu3 }
 0x167   : > { %v1114_v33 = vpop.f32.mrf.mxu0  ;;  %v1281_v40 = vpop.f32.mrf.mxu1 }
 0x168   : > { %v1150_v39 = vadd.f32 %v1114_v33, %v5519_v3 }
 0x16a   : > { %4770 = vmatmul.msk.f32.gmra.mxu0 %vm292_vm1, %v4750_v35  ;;  %4808 = vmatmul.msk.f32.gmra.mxu1 %vm292_vm1, %v4788_v42  ;;  %v1317_v44 = vadd.f32 %v1281_v40, %v1150_v39  ;;  %v4831_v39 = vld [vmem:[%s5264_s18 + $0xe6] ss:$2 sm:$0xff] }
 0x16b   : > { %4846 = vmatmul.msk.f32.gmra.mxu2 %vm292_vm1, %v4826_v38  ;;  %4884 = vmatmul.msk.f32.gmra.mxu3 %vm292_vm1, %v4864_v43  ;;  %v4755_v38 = vld [vmem:[%s5264_s18 + $0xe4] ss:$2 sm:$0xff] }
 0x16e   : > { %v1465_v46 = vpop.f32.mrf.mxu2  ;;  %v1649_v47 = vpop.f32.mrf.mxu3 }
 0x16f   : > { %v1501_v8 = vadd.f32 %v1465_v46, %v1317_v44  ;;  %v1117_v3 = vpop.f32.mrf.mxu0  ;;  %v1284_v53 = vpop.f32.mrf.mxu1  ;;  %v4793_v44 = vld [vmem:[%s5264_s18 + $0xe5] ss:$2 sm:$0xff] }
 0x170   : > { %v4869_v46 = vld [vmem:[%s5264_s18 + $0xe7] ss:$2 sm:$0xff]  ;;  %v4832_v53 = vld [vmem:[%s5264_s18 + $0xf6] ss:$2 sm:$0xff] }
 0x171   : > { %v5721_v52 = vadd.f32 %v1649_v47, %v1501_v8 }
 0x172   : > { %4771 = vmatmul.msk.f32.gmra.mxu0 %vm292_vm1, %v4751_v49  ;;  %4809 = vmatmul.msk.f32.gmra.mxu1 %vm292_vm1, %v4789_v54 }
 0x173   : > { %4847 = vmatmul.msk.f32.gmra.mxu2 %vm292_vm1, %v4827_v50  ;;  %4885 = vmatmul.msk.f32.gmra.mxu3 %vm292_vm1, %v4865_v56  ;;  %v4756_v50 = vld [vmem:[%s5264_s18 + $0xf4] ss:$2 sm:$0xff] }
 0x176   : > { %v1468_v57 = vpop.f32.mrf.mxu2  ;;  %v1652_v27 = vpop.f32.mrf.mxu3 }
 0x177   : > { %v1120_v58 = vpop.f32.mrf.mxu0  ;;  %v1287_v63 = vpop.f32.mrf.mxu1  ;;  %v4794_v27 = vld [vmem:[%s5264_s18 + $0xf5] ss:$2 sm:$0xff] }
 0x178   : > { %v1152_v62 = vadd.f32 %v1120_v58, %v5539_v28  ;;  %v4829_v28 = vld [vmem:[%s5264_s18 + $0xc6] ss:$2 sm:$0xff]  ;;  %v4870_v58 = vld [vmem:[%s5264_s18 + $0xf7] ss:$2 sm:$0xff] }
 0x17a   : > { %4772 = vmatmul.msk.f32.gmra.mxu0 %vm292_vm1, %v4752_v21  ;;  %4810 = vmatmul.msk.f32.gmra.mxu1 %vm292_vm1, %v4790_v1  ;;  %v1319_v4 = vadd.f32 %v1287_v63, %v1152_v62  ;;  %v4757_v1 = vld [vmem:[%s5264_s18 + $0x104] ss:$2 sm:$0xff] }
 0x17b   : > { %4848 = vmatmul.msk.f32.gmra.mxu2 %vm292_vm1, %v4828_v59  ;;  %4886 = vmatmul.msk.f32.gmra.mxu3 %vm292_vm1, %v4866_v2  ;;  %v4833_v2 = vld [vmem:[%s5264_s18 + $0x106] ss:$2 sm:$0xff] }
 0x17e   : > { %v1471_v6 = vpop.f32.mrf.mxu2  ;;  %v1655_v9 = vpop.f32.mrf.mxu3 }
 0x17f   : > { %v1503_v7 = vadd.f32 %v1471_v6, %v1319_v4  ;;  %v1123_v10 = vpop.f32.mrf.mxu0  ;;  %v1290_v14 = vpop.f32.mrf.mxu1 }
 0x180   : > { %v1153_v11 = vadd.f32 %v1123_v10, %v5550_v41  ;;  %v4871_v10 = vld [vmem:[%s5264_s18 + $0x107] ss:$2 sm:$0xff] }
 0x181   : > { %v5741_v13 = vadd.f32 %v1655_v9, %v1503_v7  ;;  %v4795_v9 = vld [vmem:[%s5264_s18 + $0x105] ss:$2 sm:$0xff] }
 0x182   : > { %4773 = vmatmul.msk.f32.gmra.mxu0 %vm292_vm1, %v4753_v34  ;;  %4811 = vmatmul.msk.f32.gmra.mxu1 %vm292_vm1, %v4791_v16  ;;  %v1320_v18 = vadd.f32 %v1290_v14, %v1153_v11  ;;  %v4758_v16 = vld [vmem:[%s5264_s18 + $0x114] ss:$2 sm:$0xff] }
 0x183   : > { %4849 = vmatmul.msk.f32.gmra.mxu2 %vm292_vm1, %v4829_v28  ;;  %4887 = vmatmul.msk.f32.gmra.mxu3 %vm292_vm1, %v4867_v17  ;;  %v4834_v17 = vld [vmem:[%s5264_s18 + $0x116] ss:$2 sm:$0xff] }
 0x186   : > { %v1474_v20 = vpop.f32.mrf.mxu2  ;;  %v1658_v22 = vpop.f32.mrf.mxu3 }
 0x187   : > { %v1504_v48 = vadd.f32 %v1474_v20, %v1320_v18  ;;  %v1126_v41 = vpop.f32.mrf.mxu0  ;;  %v1293_v29 = vpop.f32.mrf.mxu1 }
 0x188   : > { %v1154_v25 = vadd.f32 %v1126_v41, %v5561_v55 }
 0x189   : > { %v5752_v12 = vadd.f32 %v1658_v22, %v1504_v48  ;;  %v4796_v48 = vld [vmem:[%s5264_s18 + $0x115] ss:$2 sm:$0xff] }
 0x18a   : > { %4774 = vmatmul.msk.f32.gmra.mxu0 %vm292_vm1, %v4754_v45  ;;  %4812 = vmatmul.msk.f32.gmra.mxu1 %vm292_vm1, %v4792_v30  ;;  %v1321_v60 = vadd.f32 %v1293_v29, %v1154_v25  ;;  %v4872_v22 = vld [vmem:[%s5264_s18 + $0x117] ss:$2 sm:$0xff]  ;;  %v4759_v25 = vld [vmem:[%s5264_s18 + $0x124] ss:$2 sm:$0xff] }
 0x18b   : > { %4850 = vmatmul.msk.f32.gmra.mxu2 %vm292_vm1, %v4830_v24  ;;  %4888 = vmatmul.msk.f32.gmra.mxu3 %vm292_vm1, %v4868_v31  ;;  %v4835_v29 = vld [vmem:[%s5264_s18 + $0x126] ss:$2 sm:$0xff] }
 0x18e   : > { %v1477_v32 = vpop.f32.mrf.mxu2  ;;  %v1661_v35 = vpop.f32.mrf.mxu3 }
 0x18f   : > { %v1505_v33 = vadd.f32 %v1477_v32, %v1321_v60  ;;  %v1129_v55 = vpop.f32.mrf.mxu0  ;;  %v1296_v43 = vpop.f32.mrf.mxu1  ;;  %v4797_v60 = vld [vmem:[%s5264_s18 + $0x125] ss:$2 sm:$0xff] }
 0x190   : > { %v1155_v40 = vadd.f32 %v1129_v55, %v5572_v5  ;;  %v4873_v32 = vld [vmem:[%s5264_s18 + $0x127] ss:$2 sm:$0xff] }
 0x191   : > { %v5763_v42 = vadd.f32 %v1661_v35, %v1505_v33 }
 0x192   : > { %4775 = vmatmul.msk.f32.gmra.mxu0 %vm292_vm1, %v4755_v38  ;;  %4813 = vmatmul.msk.f32.gmra.mxu1 %vm292_vm1, %v4793_v44  ;;  %v1322_v8 = vadd.f32 %v1296_v43, %v1155_v40  ;;  %v4836_v40 = vld [vmem:[%s5264_s18 + $0x136] ss:$2 sm:$0xff] }
 0x193   : > { %4851 = vmatmul.msk.f32.gmra.mxu2 %vm292_vm1, %v4831_v39  ;;  %4889 = vmatmul.msk.f32.gmra.mxu3 %vm292_vm1, %v4869_v46  ;;  %v4760_v39 = vld [vmem:[%s5264_s18 + $0x134] ss:$2 sm:$0xff]  ;;  %v4798_v46 = vld [vmem:[%s5264_s18 + $0x135] ss:$2 sm:$0xff] }
 0x196   : > { %v1480_v47 = vpop.f32.mrf.mxu2  ;;  %v1664_v49 = vpop.f32.mrf.mxu3 }
 0x197   : > { %v1506_v3 = vadd.f32 %v1480_v47, %v1322_v8  ;;  %v1132_v5 = vpop.f32.mrf.mxu0  ;;  %v1299_v57 = vpop.f32.mrf.mxu1  ;;  %v4874_v8 = vld [vmem:[%s5264_s18 + $0x137] ss:$2 sm:$0xff] }
 0x198   : > { %v1156_v54 = vadd.f32 %v1132_v5, %v5583_v19  ;;  %v4895_v5 = vld [vmem:[%s5264_s18 + $0x36] ss:$2 sm:$0xff] }
 0x199   : > { %v5774_v56 = vadd.f32 %v1664_v49, %v1506_v3 }
 0x19a   : > { %4776 = vmatmul.msk.f32.gmra.mxu0 %vm292_vm1, %v4756_v50  ;;  %4814 = vmatmul.msk.f32.gmra.mxu1 %vm292_vm1, %v4794_v27  ;;  %v1323_v21 = vadd.f32 %v1299_v57, %v1156_v54  ;;  %v4971_v50 = vld [vmem:[%s5264_s18 + $0x38] ss:$2 sm:$0xff]  ;;  %v4933_v57 = vld [vmem:[%s5264_s18 + $0x37] ss:$2 sm:$0xff] }
 0x19b   : > { %4852 = vmatmul.msk.f32.gmra.mxu2 %vm292_vm1, %v4832_v53  ;;  %4890 = vmatmul.msk.f32.gmra.mxu3 %vm292_vm1, %v4870_v58  ;;  %v5009_v27 = vld [vmem:[%s5264_s18 + $0x39] ss:$2 sm:$0xff] }
 0x19e   : > { %v1483_v59 = vpop.f32.mrf.mxu2  ;;  %v1667_v63 = vpop.f32.mrf.mxu3 }
 0x19f   : > { %v1507_v62 = vadd.f32 %v1483_v59, %v1323_v21  ;;  %v1135_v19 = vpop.f32.mrf.mxu0  ;;  %v1302_v7 = vpop.f32.mrf.mxu1 }
 0x1a0   : > { %v1157_v4 = vadd.f32 %v1135_v19, %v5609_v37  ;;  %v4896_v19 = vld [vmem:[%s5264_s18 + $0x46] ss:$2 sm:$0xff] }
 0x1a1   : > { %v5785_v6 = vadd.f32 %v1667_v63, %v1507_v62 }
 0x1a2   : > { %4777 = vmatmul.msk.f32.gmra.mxu0 %vm292_vm1, %v4757_v1  ;;  %4815 = vmatmul.msk.f32.gmra.mxu1 %vm292_vm1, %v4795_v9  ;;  %v1324_v34 = vadd.f32 %v1302_v7, %v1157_v4  ;;  %v4934_v7 = vld [vmem:[%s5264_s18 + $0x47] ss:$2 sm:$0xff] }
 0x1a3   : > { %4853 = vmatmul.msk.f32.gmra.mxu2 %vm292_vm1, %v4833_v2  ;;  %4891 = vmatmul.msk.f32.gmra.mxu3 %vm292_vm1, %v4871_v10  ;;  %v5010_v9 = vld [vmem:[%s5264_s18 + $0x49] ss:$2 sm:$0xff] }
 0x1a6   : > { %v1486_v28 = vpop.f32.mrf.mxu2  ;;  %v1670_v37 = vpop.f32.mrf.mxu3 }
 0x1a7   : > { %v1508_v11 = vadd.f32 %v1486_v28, %v1324_v34  ;;  %v1138_v14 = vpop.f32.mrf.mxu0  ;;  %v1305_v20 = vpop.f32.mrf.mxu1 }
 0x1a8   : > { %v4973_v14 = vld [vmem:[%s5264_s18 + $0x58] ss:$2 sm:$0xff] }
 0x1a9   : > { %v5795_v18 = vadd.f32 %v1670_v37, %v1508_v11  ;;  %v4897_v37 = vld [vmem:[%s5264_s18 + $0x56] ss:$2 sm:$0xff] }
 0x1aa   : > { %4778 = vmatmul.msk.f32.gmra.mxu0 %vm292_vm1, %v4758_v16  ;;  %4816 = vmatmul.msk.f32.gmra.mxu1 %vm292_vm1, %v4796_v48  ;;  %v4935_v48 = vld [vmem:[%s5264_s18 + $0x57] ss:$2 sm:$0xff] }
 0x1ab   : > { %4854 = vmatmul.msk.f32.gmra.mxu2 %vm292_vm1, %v4834_v17  ;;  %4892 = vmatmul.msk.f32.gmra.mxu3 %vm292_vm1, %v4872_v22  ;;  %v5011_v22 = vld [vmem:[%s5264_s18 + $0x59] ss:$2 sm:$0xff] }
 0x1ae   : > { %v1489_v41 = vpop.f32.mrf.mxu2  ;;  %v1673_v45 = vpop.f32.mrf.mxu3 }
 0x1af   : > { %v1789_v24 = vpop.f32.mrf.mxu0  ;;  %v1956_v31 = vpop.f32.mrf.mxu1 }
 0x1b0   : > { %v1843_v30 = vadd.f32 %v1789_v24, %v5628_v61 }
 0x1b2   : > { %4779 = vmatmul.msk.f32.gmra.mxu0 %vm292_vm1, %v4759_v25  ;;  %4817 = vmatmul.msk.f32.gmra.mxu1 %vm292_vm1, %v4797_v60  ;;  %v2010_v33 = vadd.f32 %v1956_v31, %v1843_v30  ;;  %v4974_v30 = vld [vmem:[%s5264_s18 + $0x68] ss:$2 sm:$0xff] }
 0x1b3   : > { %4855 = vmatmul.msk.f32.gmra.mxu2 %vm292_vm1, %v4835_v29  ;;  %4893 = vmatmul.msk.f32.gmra.mxu3 %vm292_vm1, %v4873_v32  ;;  %v4898_v29 = vld [vmem:[%s5264_s18 + $0x66] ss:$2 sm:$0xff] }
 0x1b6   : > { %v2140_v35 = vpop.f32.mrf.mxu2  ;;  %v2324_v38 = vpop.f32.mrf.mxu3 }
 0x1b7   : > { %v2194_v55 = vadd.f32 %v2140_v35, %v2010_v33  ;;  %v1792_v61 = vpop.f32.mrf.mxu0  ;;  %v1959_v44 = vpop.f32.mrf.mxu1  ;;  %v4936_v33 = vld [vmem:[%s5264_s18 + $0x67] ss:$2 sm:$0xff] }
 0x1b8   : > { %v5012_v35 = vld [vmem:[%s5264_s18 + $0x69] ss:$2 sm:$0xff]  ;;  %v4975_v44 = vld [vmem:[%s5264_s18 + $0x78] ss:$2 sm:$0xff] }
 0x1b9   : > { %v5814_v43 = vadd.f32 %v2324_v38, %v2194_v55 }
 0x1ba   : > { %4780 = vmatmul.msk.f32.gmra.mxu0 %vm292_vm1, %v4760_v39  ;;  %4818 = vmatmul.msk.f32.gmra.mxu1 %vm292_vm1, %v4798_v46 }
 0x1bb   : > { %4856 = vmatmul.msk.f32.gmra.mxu2 %vm292_vm1, %v4836_v40  ;;  %4894 = vmatmul.msk.f32.gmra.mxu3 %vm292_vm1, %v4874_v8  ;;  %v4899_v40 = vld [vmem:[%s5264_s18 + $0x76] ss:$2 sm:$0xff] }
 0x1be   : > { %v2143_v47 = vpop.f32.mrf.mxu2  ;;  %v2327_v3 = vpop.f32.mrf.mxu3 }
 0x1bf   : > { %v1795_v49 = vpop.f32.mrf.mxu0  ;;  %v1962_v54 = vpop.f32.mrf.mxu1  ;;  %v4937_v3 = vld [vmem:[%s5264_s18 + $0x77] ss:$2 sm:$0xff] }
 0x1c0   : > { %v1845_v53 = vadd.f32 %v1795_v49, %v5648_v23  ;;  %v4972_v23 = vld [vmem:[%s5264_s18 + $0x48] ss:$2 sm:$0xff]  ;;  %v5013_v49 = vld [vmem:[%s5264_s18 + $0x79] ss:$2 sm:$0xff] }
 0x1c2   : > { %4915 = vmatmul.msk.f32.vlgmr.msrb.gmra.mxu0 %vm292_vm1, %v4895_v5  ;;  %4953 = vmatmul.msk.f32.vlgmr.msrb.gmra.mxu1 %vm292_vm1, %v4933_v57  ;;  %v2012_v58 = vadd.f32 %v1962_v54, %v1845_v53  ;;  %v4900_v57 = vld [vmem:[%s5264_s18 + $0x86] ss:$2 sm:$0xff] }
 0x1c3   : > { %4991 = vmatmul.msk.f32.vlgmr.msrb.gmra.mxu2 %vm292_vm1, %v4971_v50  ;;  %5029 = vmatmul.msk.f32.vlgmr.msrb.gmra.mxu3 %vm292_vm1, %v5009_v27  ;;  %v4976_v27 = vld [vmem:[%s5264_s18 + $0x88] ss:$2 sm:$0xff] }
 0x1c6   : > { %v2146_v21 = vpop.f32.mrf.mxu2  ;;  %v2330_v62 = vpop.f32.mrf.mxu3 }
 0x1c7   : > { %v2196_v59 = vadd.f32 %v2146_v21, %v2012_v58  ;;  %v1798_v63 = vpop.f32.mrf.mxu0  ;;  %v1965_v4 = vpop.f32.mrf.mxu1 }
 0x1c8   : > { %v1846_v1 = vadd.f32 %v1798_v63, %v5659_v36  ;;  %v5014_v63 = vld [vmem:[%s5264_s18 + $0x89] ss:$2 sm:$0xff] }
 0x1c9   : > { %v5834_v2 = vadd.f32 %v2330_v62, %v2196_v59  ;;  %v4938_v62 = vld [vmem:[%s5264_s18 + $0x87] ss:$2 sm:$0xff] }
 0x1ca   : > { %4916 = vmatmul.msk.f32.gmra.mxu0 %vm292_vm1, %v4896_v19  ;;  %4954 = vmatmul.msk.f32.gmra.mxu1 %vm292_vm1, %v4934_v7  ;;  %v2013_v10 = vadd.f32 %v1965_v4, %v1846_v1  ;;  %v4901_v7 = vld [vmem:[%s5264_s18 + $0x96] ss:$2 sm:$0xff] }
 0x1cb   : > { %4992 = vmatmul.msk.f32.gmra.mxu2 %vm292_vm1, %v4972_v23  ;;  %5030 = vmatmul.msk.f32.gmra.mxu3 %vm292_vm1, %v5010_v9  ;;  %v4977_v9 = vld [vmem:[%s5264_s18 + $0x98] ss:$2 sm:$0xff] }
 0x1ce   : > { %v2149_v34 = vpop.f32.mrf.mxu2  ;;  %v2333_v11 = vpop.f32.mrf.mxu3 }
 0x1cf   : > { %v2197_v28 = vadd.f32 %v2149_v34, %v2013_v10  ;;  %v1801_v36 = vpop.f32.mrf.mxu0  ;;  %v1968_v20 = vpop.f32.mrf.mxu1 }
 0x1d0   : > { %v1847_v16 = vadd.f32 %v1801_v36, %v5670_v51 }
 0x1d1   : > { %v5845_v17 = vadd.f32 %v2333_v11, %v2197_v28  ;;  %v4939_v28 = vld [vmem:[%s5264_s18 + $0x97] ss:$2 sm:$0xff] }
 0x1d2   : > { %4917 = vmatmul.msk.f32.gmra.mxu0 %vm292_vm1, %v4897_v37  ;;  %4955 = vmatmul.msk.f32.gmra.mxu1 %vm292_vm1, %v4935_v48  ;;  %v2014_v41 = vadd.f32 %v1968_v20, %v1847_v16  ;;  %v5015_v11 = vld [vmem:[%s5264_s18 + $0x99] ss:$2 sm:$0xff]  ;;  %v4902_v16 = vld [vmem:[%s5264_s18 + $0xa6] ss:$2 sm:$0xff] }
 0x1d3   : > { %4993 = vmatmul.msk.f32.gmra.mxu2 %vm292_vm1, %v4973_v14  ;;  %5031 = vmatmul.msk.f32.gmra.mxu3 %vm292_vm1, %v5011_v22  ;;  %v4978_v20 = vld [vmem:[%s5264_s18 + $0xa8] ss:$2 sm:$0xff] }
 0x1d6   : > { %v2152_v45 = vpop.f32.mrf.mxu2  ;;  %v2336_v25 = vpop.f32.mrf.mxu3 }
 0x1d7   : > { %v2198_v24 = vadd.f32 %v2152_v45, %v2014_v41  ;;  %v1804_v51 = vpop.f32.mrf.mxu0  ;;  %v1971_v32 = vpop.f32.mrf.mxu1  ;;  %v4940_v41 = vld [vmem:[%s5264_s18 + $0xa7] ss:$2 sm:$0xff] }
 0x1d8   : > { %v1848_v31 = vadd.f32 %v1804_v51, %v5681_v0  ;;  %v5016_v45 = vld [vmem:[%s5264_s18 + $0xa9] ss:$2 sm:$0xff] }
 0x1d9   : > { %v5856_v60 = vadd.f32 %v2336_v25, %v2198_v24 }
 0x1da   : > { %4918 = vmatmul.msk.f32.gmra.mxu0 %vm292_vm1, %v4898_v29  ;;  %4956 = vmatmul.msk.f32.gmra.mxu1 %vm292_vm1, %v4936_v33  ;;  %v2015_v55 = vadd.f32 %v1971_v32, %v1848_v31  ;;  %v4979_v31 = vld [vmem:[%s5264_s18 + $0xb8] ss:$2 sm:$0xff] }
 0x1db   : > { %4994 = vmatmul.msk.f32.gmra.mxu2 %vm292_vm1, %v4974_v30  ;;  %5032 = vmatmul.msk.f32.gmra.mxu3 %vm292_vm1, %v5012_v35  ;;  %v4903_v30 = vld [vmem:[%s5264_s18 + $0xb6] ss:$2 sm:$0xff]  ;;  %v4941_v35 = vld [vmem:[%s5264_s18 + $0xb7] ss:$2 sm:$0xff] }
 0x1de   : > { %v2155_v38 = vpop.f32.mrf.mxu2  ;;  %v2339_v39 = vpop.f32.mrf.mxu3 }
 0x1df   : > { %v2199_v61 = vadd.f32 %v2155_v38, %v2015_v55  ;;  %v1807_v0 = vpop.f32.mrf.mxu0  ;;  %v1974_v47 = vpop.f32.mrf.mxu1  ;;  %v5017_v55 = vld [vmem:[%s5264_s18 + $0xb9] ss:$2 sm:$0xff] }
 0x1e0   : > { %v1849_v46 = vadd.f32 %v1807_v0, %v5692_v15  ;;  %v4904_v0 = vld [vmem:[%s5264_s18 + $0xc6] ss:$2 sm:$0xff] }
 0x1e1   : > { %v5867_v8 = vadd.f32 %v2339_v39, %v2199_v61 }
 0x1e2   : > { %4919 = vmatmul.msk.f32.gmra.mxu0 %vm292_vm1, %v4899_v40  ;;  %4957 = vmatmul.msk.f32.gmra.mxu1 %vm292_vm1, %v4937_v3  ;;  %v2016_v5 = vadd.f32 %v1974_v47, %v1849_v46  ;;  %v4980_v40 = vld [vmem:[%s5264_s18 + $0xc8] ss:$2 sm:$0xff]  ;;  %v4942_v47 = vld [vmem:[%s5264_s18 + $0xc7] ss:$2 sm:$0xff] }
 0x1e3   : > { %4995 = vmatmul.msk.f32.gmra.mxu2 %vm292_vm1, %v4975_v44  ;;  %5033 = vmatmul.msk.f32.gmra.mxu3 %vm292_vm1, %v5013_v49  ;;  %v5018_v3 = vld [vmem:[%s5264_s18 + $0xc9] ss:$2 sm:$0xff] }
 0x1e4   : > { %v5058_v49 = vld [vmem:[%s6358_s3 + $0x10] sm:$0xff] }
 0x1e5   : > { %3356 = vmatpush.msra.mxu2 %v5058_v49  ;;  %v4910_v49 = vld [vmem:[%s5264_s18 + $0x126] ss:$2 sm:$0xff] }
 0x1e6   : > { %v2158_v50 = vpop.f32.mrf.mxu2  ;;  %v2342_v54 = vpop.f32.mrf.mxu3 }
 0x1e7   : > { %v2200_v53 = vadd.f32 %v2158_v50, %v2016_v5  ;;  %v1810_v15 = vpop.f32.mrf.mxu0  ;;  %v1977_v59 = vpop.f32.mrf.mxu1 }
 0x1e8   : > { %v1850_v58 = vadd.f32 %v1810_v15, %v5702_v26  ;;  %v5064_v15 = vld [vmem:[%s6358_s3 + $0x18] sm:$0xff] }
 0x1e9   : > { %v5878_v21 = vadd.f32 %v2342_v54, %v2200_v53  ;;  %v3197_v54 = vld [vmem:[%s6358_s3] sm:$0xff]  ;;  %3420 = vmatpush.msra.mxu3 %v5064_v15 }
 0x1ea   : > { %4920 = vmatmul.msk.f32.gmra.mxu0 %vm292_vm1, %v4900_v57  ;;  %4958 = vmatmul.msk.f32.gmra.mxu1 %vm292_vm1, %v4938_v62  ;;  %v2017_v19 = vadd.f32 %v1977_v59, %v1850_v58  ;;  %v4981_v58 = vld [vmem:[%s5264_s18 + $0xd8] ss:$2 sm:$0xff] }
 0x1eb   : > { %4996 = vmatmul.msk.f32.gmra.mxu2 %vm292_vm1, %v4976_v27  ;;  %5034 = vmatmul.msk.f32.gmra.mxu3 %vm292_vm1, %v5014_v63  ;;  %v4905_v27 = vld [vmem:[%s5264_s18 + $0xd6] ss:$2 sm:$0xff]  ;;  %v4943_v63 = vld [vmem:[%s5264_s18 + $0xd7] ss:$2 sm:$0xff] }
 0x1ec   : > { %3228 = vmatpush.msra.mxu0 %v3197_v54 }
 0x1ee   : > { %v2161_v23 = vpop.f32.mrf.mxu2  ;;  %v2345_v26 = vpop.f32.mrf.mxu3 }
 0x1ef   : > { %v2201_v1 = vadd.f32 %v2161_v23, %v2017_v19  ;;  %v1813_v4 = vpop.f32.mrf.mxu0  ;;  %v1980_v34 = vpop.f32.mrf.mxu1  ;;  %v5019_v19 = vld [vmem:[%s5264_s18 + $0xd9] ss:$2 sm:$0xff]  ;;  %v5052_v23 = vld [vmem:[%s6358_s3 + $0x8] sm:$0xff] }
 0x1f0   : > { %3292 = vmatpush.msra.mxu1 %v5052_v23 }
 0x1f1   : > { %v5888_v10 = vadd.f32 %v2345_v26, %v2201_v1 }
 0x1f2   : > { %4921 = vmatmul.msk.f32.gmra.mxu0 %vm292_vm1, %v4901_v7  ;;  %4959 = vmatmul.msk.f32.gmra.mxu1 %vm292_vm1, %v4939_v28  ;;  %v4906_v7 = vld [vmem:[%s5264_s18 + $0xe6] ss:$2 sm:$0xff]  ;;  %v4944_v28 = vld [vmem:[%s5264_s18 + $0xe7] ss:$2 sm:$0xff] }
 0x1f3   : > { %4997 = vmatmul.msk.f32.gmra.mxu2 %vm292_vm1, %v4977_v9  ;;  %5035 = vmatmul.msk.f32.gmra.mxu3 %vm292_vm1, %v5015_v11  ;;  %v4982_v9 = vld [vmem:[%s5264_s18 + $0xe8] ss:$2 sm:$0xff]  ;;  %v5020_v11 = vld [vmem:[%s5264_s18 + $0xe9] ss:$2 sm:$0xff] }
 0x1f6   : > { %v2164_v36 = vpop.f32.mrf.mxu2  ;;  %v2348_v37 = vpop.f32.mrf.mxu3 }
 0x1f7   : > { %v1816_v14 = vpop.f32.mrf.mxu0  ;;  %v1983_v22 = vpop.f32.mrf.mxu1 }
 0x1f8   : > { %v1852_v48 = vadd.f32 %v1816_v14, %v5721_v52 }
 0x1fa   : > { %4922 = vmatmul.msk.f32.gmra.mxu0 %vm292_vm1, %v4902_v16  ;;  %4960 = vmatmul.msk.f32.gmra.mxu1 %vm292_vm1, %v4940_v41  ;;  %v2019_v24 = vadd.f32 %v1983_v22, %v1852_v48  ;;  %v4907_v16 = vld [vmem:[%s5264_s18 + $0xf6] ss:$2 sm:$0xff]  ;;  %v4945_v22 = vld [vmem:[%s5264_s18 + $0xf7] ss:$2 sm:$0xff] }
 0x1fb   : > { %4998 = vmatmul.msk.f32.gmra.mxu2 %vm292_vm1, %v4978_v20  ;;  %5036 = vmatmul.msk.f32.gmra.mxu3 %vm292_vm1, %v5016_v45  ;;  %v4983_v20 = vld [vmem:[%s5264_s18 + $0xf8] ss:$2 sm:$0xff]  ;;  %v5021_v41 = vld [vmem:[%s5264_s18 + $0xf9] ss:$2 sm:$0xff] }
 0x1fe   : > { %v2167_v25 = vpop.f32.mrf.mxu2  ;;  %v2351_v29 = vpop.f32.mrf.mxu3 }
 0x1ff   : > { %v2203_v51 = vadd.f32 %v2167_v25, %v2019_v24  ;;  %v1819_v52 = vpop.f32.mrf.mxu0  ;;  %v1986_v33 = vpop.f32.mrf.mxu1 }
 0x201   : > { %v5907_v32 = vadd.f32 %v2351_v29, %v2203_v51  ;;  %v4908_v51 = vld [vmem:[%s5264_s18 + $0x106] ss:$2 sm:$0xff] }
 0x202   : > { %4923 = vmatmul.msk.f32.gmra.mxu0 %vm292_vm1, %v4903_v30  ;;  %4961 = vmatmul.msk.f32.gmra.mxu1 %vm292_vm1, %v4941_v35  ;;  %v4984_v29 = vld [vmem:[%s5264_s18 + $0x108] ss:$2 sm:$0xff]  ;;  %v4946_v30 = vld [vmem:[%s5264_s18 + $0x107] ss:$2 sm:$0xff] }
 0x203   : > { %4999 = vmatmul.msk.f32.gmra.mxu2 %vm292_vm1, %v4979_v31  ;;  %5037 = vmatmul.msk.f32.gmra.mxu3 %vm292_vm1, %v5017_v55  ;;  %v5022_v31 = vld [vmem:[%s5264_s18 + $0x109] ss:$2 sm:$0xff] }
 0x206   : > { %v2170_v38 = vpop.f32.mrf.mxu2  ;;  %v2354_v61 = vpop.f32.mrf.mxu3 }
 0x207   : > { %v1822_v39 = vpop.f32.mrf.mxu0  ;;  %v1989_v46 = vpop.f32.mrf.mxu1  ;;  %v4909_v38 = vld [vmem:[%s5264_s18 + $0x116] ss:$2 sm:$0xff] }
 0x208   : > { %v1854_v44 = vadd.f32 %v1822_v39, %v5741_v13  ;;  %v4985_v61 = vld [vmem:[%s5264_s18 + $0x118] ss:$2 sm:$0xff] }
 0x20a   : > { %4924 = vmatmul.msk.f32.gmra.mxu0 %vm292_vm1, %v4904_v0  ;;  %4962 = vmatmul.msk.f32.gmra.mxu1 %vm292_vm1, %v4942_v47  ;;  %v2021_v13 = vadd.f32 %v1989_v46, %v1854_v44  ;;  %v4947_v0 = vld [vmem:[%s5264_s18 + $0x117] ss:$2 sm:$0xff]  ;;  %v5182_v46 = vmov 0.0  }
 0x20b   : > { %5000 = vmatmul.msk.f32.gmra.mxu2 %vm292_vm1, %v4980_v40  ;;  %5038 = vmatmul.msk.f32.gmra.mxu3 %vm292_vm1, %v5018_v3  ;;  %v5023_v40 = vld [vmem:[%s5264_s18 + $0x119] ss:$2 sm:$0xff]  ;;  %3153 = vst.msk [vmem:[#allocation2] sm:$0xff] %vm3134_vm2, %v5182_v46 }
 0x20c   : > { %3154 = vst.msk [vmem:[#allocation2 + $0x8] sm:$0xff] %vm3134_vm2, %v5182_v46 }
 0x20d   : > { %3155 = vst.msk [vmem:[#allocation2 + $0x10] sm:$0xff] %vm3134_vm2, %v5182_v46 }
 0x20e   : > { %v2173_v5 = vpop.f32.mrf.mxu2  ;;  %v2357_v53 = vpop.f32.mrf.mxu3  ;;  %3156 = vst.msk [vmem:[#allocation2 + $0x18] sm:$0xff] %vm3134_vm2, %v5182_v46 }
 0x20f   : > { %v2205_v50 = vadd.f32 %v2173_v5, %v2021_v13  ;;  %v5933_v57 = vpop.f32.mrf.mxu0  ;;  %v5939_v62 = vpop.f32.mrf.mxu1  ;;  %v4986_v13 = vld [vmem:[%s5264_s18 + $0x128] ss:$2 sm:$0xff]  ;;  %3157 = vst.msk [vmem:[#allocation2 + $0x20] sm:$0xff] %vm3134_vm2, %v5182_v46 }
 0x210   : > { %3158 = vst.msk [vmem:[#allocation2 + $0x28] sm:$0xff] %vm3134_vm2, %v5182_v46 }
 0x211   : > { %v5937_v59 = vadd.f32 %v2357_v53, %v2205_v50  ;;  %v4948_v50 = vld [vmem:[%s5264_s18 + $0x127] ss:$2 sm:$0xff]  ;;  %3159 = vst.msk [vmem:[#allocation2 + $0x30] sm:$0xff] %vm3134_vm2, %v5182_v46 }
 0x212   : > { %4925 = vmatmul.msk.f32.gmra.mxu0 %vm292_vm1, %v4905_v27  ;;  %4963 = vmatmul.msk.f32.gmra.mxu1 %vm292_vm1, %v4943_v63  ;;  %v5024_v53 = vld [vmem:[%s5264_s18 + $0x129] ss:$2 sm:$0xff]  ;;  %3160 = vst.msk [vmem:[#allocation2 + $0x38] sm:$0xff] %vm3134_vm2, %v5182_v46  ;;  %v4987_v63 = vld [vmem:[%s5264_s18 + $0x138] ss:$2 sm:$0xff] }
 0x213   : > { %5001 = vmatmul.msk.f32.gmra.mxu2 %vm292_vm1, %v4981_v58  ;;  %5039 = vmatmul.msk.f32.gmra.mxu3 %vm292_vm1, %v5019_v19  ;;  %3161 = vst.msk [vmem:[#allocation2 + $0x40] sm:$0xff] %vm3134_vm2, %v5182_v46  ;;  %v4911_v58 = vld [vmem:[%s5264_s18 + $0x136] ss:$2 sm:$0xff] }
 0x214   : > { %3162 = vst.msk [vmem:[#allocation2 + $0x48] sm:$0xff] %vm3134_vm2, %v5182_v46 }
 0x215   : > { %3163 = vst.msk [vmem:[#allocation2 + $0x50] sm:$0xff] %vm3134_vm2, %v5182_v46 }
 0x216   : > { %v5950_v1 = vpop.f32.mrf.mxu2  ;;  %v5952_v26 = vpop.f32.mrf.mxu3  ;;  %3164 = vst.msk [vmem:[#allocation2 + $0x58] sm:$0xff] %vm3134_vm2, %v5182_v46 }
 0x217   : > { %v5954_v4 = vpop.f32.mrf.mxu0  ;;  %v5958_v34 = vpop.f32.mrf.mxu1  ;;  %3165 = vst.msk [vmem:[#allocation2 + $0x60] sm:$0xff] %vm3134_vm2, %v5182_v46 }
 0x218   : > { %3166 = vst.msk [vmem:[#allocation2 + $0x68] sm:$0xff] %vm3134_vm2, %v5182_v46 }
 0x219   : > { %4220 = vst.msk [vmem:[#allocation3] sm:$0xff] %vm4214_vm3, %v5182_v46 }
 0x21a   : > { %4926 = vmatmul.msk.f32.gmra.mxu0 %vm292_vm1, %v4906_v7  ;;  %4964 = vmatmul.msk.f32.gmra.mxu1 %vm292_vm1, %v4944_v28  ;;  %v4949_v7 = vld [vmem:[%s5264_s18 + $0x137] ss:$2 sm:$0xff]  ;;  %4221 = vst.msk [vmem:[#allocation3 + $0x8] sm:$0xff] %vm4214_vm3, %v5182_v46 }
 0x21b   : > { %5002 = vmatmul.msk.f32.gmra.mxu2 %vm292_vm1, %v4982_v9  ;;  %5040 = vmatmul.msk.f32.gmra.mxu3 %vm292_vm1, %v5020_v11  ;;  %v5025_v9 = vld [vmem:[%s5264_s18 + $0x139] ss:$2 sm:$0xff]  ;;  %4222 = vst.msk [vmem:[#allocation3 + $0x10] sm:$0xff] %vm4214_vm3, %v5182_v46 }
 0x21c   : > { %4223 = vst.msk [vmem:[#allocation3 + $0x18] sm:$0xff] %vm4214_vm3, %v5182_v46 }
 0x21d   : > { %4224 = vst.msk [vmem:[#allocation3 + $0x20] sm:$0xff] %vm4214_vm3, %v5182_v46 }
 0x21e   : > { %v5966_v36 = vpop.f32.mrf.mxu2  ;;  %v5968_v37 = vpop.f32.mrf.mxu3 }
 0x21f   : > { %v5970_v14 = vpop.f32.mrf.mxu0  ;;  %v5974_v48 = vpop.f32.mrf.mxu1 }
 0x222   : > { %4927 = vmatmul.msk.f32.gmra.mxu0 %vm292_vm1, %v4907_v16  ;;  %4965 = vmatmul.msk.f32.gmra.mxu1 %vm292_vm1, %v4945_v22  ;;  %v4912_v22 = vld [vmem:[%s5264_s18 + $0x146] ss:$2 sm:$0xff] }
 0x223   : > { %5003 = vmatmul.msk.f32.gmra.mxu2 %vm292_vm1, %v4983_v20  ;;  %5041 = vmatmul.msk.f32.gmra.mxu3 %vm292_vm1, %v5021_v41  ;;  %v4988_v41 = vld [vmem:[%s5264_s18 + $0x148] ss:$2 sm:$0xff] }
 0x226   : > { %v5982_v45 = vpop.f32.mrf.mxu2  ;;  %v5984_v24 = vpop.f32.mrf.mxu3 }
 0x227   : > { %v5986_v25 = vpop.f32.mrf.mxu0  ;;  %v5990_v52 = vpop.f32.mrf.mxu1 }
 0x22a   : > { %4928 = vmatmul.msk.f32.gmra.mxu0 %vm292_vm1, %v4908_v51  ;;  %4966 = vmatmul.msk.f32.gmra.mxu1 %vm292_vm1, %v4946_v30  ;;  %v4950_v30 = vld [vmem:[%s5264_s18 + $0x147] ss:$2 sm:$0xff] }
 0x22b   : > { %5004 = vmatmul.msk.f32.gmra.mxu2 %vm292_vm1, %v4984_v29  ;;  %5042 = vmatmul.msk.f32.gmra.mxu3 %vm292_vm1, %v5022_v31  ;;  %v5026_v31 = vld [vmem:[%s5264_s18 + $0x149] ss:$2 sm:$0xff]  ;;  %s5152_s18 = sshll.u32 %s6363_s22, 4 }
 0x22c   : > { %s251_s28 = scalar_lea.vmem %s6361_s6, %s5152_s18 }
 0x22e   : > { %v5998_v33 = vpop.f32.mrf.mxu2  ;;  %v6000_v35 = vpop.f32.mrf.mxu3 }
 0x22f   : > { %v6002_v55 = vpop.f32.mrf.mxu0  ;;  %v6006_v39 = vpop.f32.mrf.mxu1 }
 0x232   : > { %4929 = vmatmul.msk.f32.gmra.mxu0 %vm292_vm1, %v4909_v38  ;;  %4967 = vmatmul.msk.f32.gmra.mxu1 %vm292_vm1, %v4947_v0 }
 0x233   : > { %5005 = vmatmul.msk.f32.gmra.mxu2 %vm292_vm1, %v4985_v61  ;;  %5043 = vmatmul.msk.f32.gmra.mxu3 %vm292_vm1, %v5023_v40 }
 0x236   : > { %v6014_v44 = vpop.f32.mrf.mxu2  ;;  %v6018_v47 = vpop.f32.mrf.mxu3 }
 0x237   : > { %v1840_v3 = vpop.f32.mrf.mxu0  ;;  %v2007_v5 = vpop.f32.mrf.mxu1 }
 0x23a   : > { %4930 = vmatmul.msk.f32.gmra.mxu0 %vm292_vm1, %v4910_v49  ;;  %4968 = vmatmul.msk.f32.gmra.mxu1 %vm292_vm1, %v4948_v50 }
 0x23b   : > { %5006 = vmatmul.msk.f32.gmra.mxu2 %vm292_vm1, %v4986_v13  ;;  %5044 = vmatmul.msk.f32.gmra.mxu3 %vm292_vm1, %v5024_v53 }
 0x23e   : > { %v2191_v54 = vpop.f32.mrf.mxu2  ;;  %v2375_v15 = vpop.f32.mrf.mxu3 }
 0x23f   : > { %v2491_v27 = vpop.f32.mrf.mxu0  ;;  %v2658_v23 = vpop.f32.mrf.mxu1 }
 0x240   : > { %v2545_v19 = vadd.f32 %v2491_v27, %v5814_v43 }
 0x242   : > { %4931 = vmatmul.msk.f32.gmra.mxu0 %vm292_vm1, %v4911_v58  ;;  %4969 = vmatmul.msk.f32.gmra.mxu1 %vm292_vm1, %v4949_v7  ;;  %v2712_v43 = vadd.f32 %v2658_v23, %v2545_v19 }
 0x243   : > { %5007 = vmatmul.msk.f32.gmra.mxu2 %vm292_vm1, %v4987_v63  ;;  %5045 = vmatmul.msk.f32.gmra.mxu3 %vm292_vm1, %v5025_v9 }
 0x246   : > { %v2842_v28 = vpop.f32.mrf.mxu2  ;;  %v3026_v16 = vpop.f32.mrf.mxu3 }
 0x247   : > { %v2896_v11 = vadd.f32 %v2842_v28, %v2712_v43  ;;  %v2494_v20 = vpop.f32.mrf.mxu0  ;;  %v2661_v29 = vpop.f32.mrf.mxu1 }
 0x249   : > { %v3080_v51 = vadd.f32 %v3026_v16, %v2896_v11 }
 0x24a   : > { %4932 = vmatmul.msk.f32.gmra.mxu0 %vm292_vm1, %v4912_v22  ;;  %4970 = vmatmul.msk.f32.gmra.mxu1 %vm292_vm1, %v4950_v30 }
 0x24b   : > { %v3098_v38 = vmul.f32 0.01, %v3080_v51  ;;  %5008 = vmatmul.msk.f32.gmra.mxu2 %vm292_vm1, %v4988_v41  ;;  %5046 = vmatmul.msk.f32.gmra.mxu3 %vm292_vm1, %v5026_v31 }
 0x24d   : > { %v3116_v61 = vmax.f32 %v3080_v51, %v3098_v38 }
 0x24e   : > { %v2845_v0 = vpop.f32.mrf.mxu2  ;;  %v3029_v40 = vpop.f32.mrf.mxu3 }
 0x24f   : > { %3135 = vst.msk [vmem:[#allocation4] sm:$0xff] %vm3134_vm2, %v3116_v61  ;;  %v2497_v3 = vpop.f32.mrf.mxu0  ;;  %v2664_v13 = vpop.f32.mrf.mxu1 }
 0x250   : > { %v2547_v49 = vadd.f32 %v2497_v3, %v5834_v2 }
 0x252   : > { %v2714_v5 = vadd.f32 %v2664_v13, %v2547_v49 }
 0x256   : > { %v3168_v50 = vld [vmem:[#allocation4] sm:$0xff]  ;;  %v2848_v53 = vpop.f32.mrf.mxu2  ;;  %v3032_v15 = vpop.f32.mrf.mxu3 }
 0x257   : > { %v2898_v54 = vadd.f32 %v2848_v53, %v2714_v5  ;;  %v2500_v27 = vpop.f32.mrf.mxu0  ;;  %3169 = vst.msk [vmem:[#allocation2 + $0xb] sm:$0xff] %vm3134_vm2, %v3168_v50  ;;  %v2667_v19 = vpop.f32.mrf.mxu1 }
 0x258   : > { %v2548_v58 = vadd.f32 %v2500_v27, %v5845_v17 }
 0x259   : > { %v3082_v63 = vadd.f32 %v3032_v15, %v2898_v54 }
 0x25a   : > { %v2715_v9 = vadd.f32 %v2667_v19, %v2548_v58 }
 0x25b   : > { %v3100_v23 = vmul.f32 0.01, %v3082_v63 }
 0x25d   : > { %v3118_v7 = vmax.f32 %v3082_v63, %v3100_v23 }
 0x25e   : > { %v2851_v43 = vpop.f32.mrf.mxu2  ;;  %v3188_v28 = vld [vmem:[#allocation2] ss:$2 sm:$0xff]  ;;  %v3251_v11 = vld [vmem:[#allocation2 + $0x1] ss:$2 sm:$0xff]  ;;  %v3035_v16 = vpop.f32.mrf.mxu3 }
 0x25f   : > { %3137 = vst.msk [vmem:[#allocation4 + $0x10] sm:$0xff] %vm3134_vm2, %v3118_v7  ;;  %v2899_v2 = vadd.f32 %v2851_v43, %v2715_v9  ;;  %5047 = vmatmul.msk.f32.vlgmr.msra.gmra.mxu0 %vm3134_vm2, %v3188_v28  ;;  %5053 = vmatmul.msk.f32.vlgmr.msra.gmra.mxu1 %vm3134_vm2, %v3251_v11  ;;  %v3315_v20 = vld [vmem:[#allocation2 + $0x2] ss:$2 sm:$0xff]  ;;  %v3379_v22 = vld [vmem:[#allocation2 + $0x3] ss:$2 sm:$0xff]  ;;  %v2503_v41 = vpop.f32.mrf.mxu0  ;;  %v2670_v29 = vpop.f32.mrf.mxu1 }
 0x260   : > { %5059 = vmatmul.msk.f32.vlgmr.msra.gmra.mxu2 %vm3134_vm2, %v3315_v20  ;;  %5065 = vmatmul.msk.f32.vlgmr.msra.gmra.mxu3 %vm3134_vm2, %v3379_v22  ;;  %v2549_v17 = vadd.f32 %v2503_v41, %v5856_v60 }
 0x261   : > { %v3083_v51 = vadd.f32 %v3035_v16, %v2899_v2 }
 0x262   : > { %v2716_v38 = vadd.f32 %v2670_v29, %v2549_v17 }
 0x263   : > { %v3101_v30 = vmul.f32 0.01, %v3083_v51 }
 0x265   : > { %v3119_v31 = vmax.f32 %v3083_v51, %v3101_v30 }
 0x266   : > { %v2854_v61 = vpop.f32.mrf.mxu2  ;;  %v3038_v40 = vpop.f32.mrf.mxu3 }
 0x267   : > { %3138 = vst.msk [vmem:[#allocation4 + $0x18] sm:$0xff] %vm3134_vm2, %v3119_v31  ;;  %v2900_v0 = vadd.f32 %v2854_v61, %v2716_v38  ;;  %v2506_v3 = vpop.f32.mrf.mxu0  ;;  %v2673_v5 = vpop.f32.mrf.mxu1 }
 0x268   : > { %v2550_v49 = vadd.f32 %v2506_v3, %v5867_v8 }
 0x269   : > { %v3084_v13 = vadd.f32 %v3038_v40, %v2900_v0 }
 0x26a   : > { %v2717_v54 = vadd.f32 %v2673_v5, %v2550_v49 }
 0x26b   : > { %v3102_v50 = vmul.f32 0.01, %v3084_v13 }
 0x26d   : > { %v3120_v53 = vmax.f32 %v3084_v13, %v3102_v50 }
 0x26e   : > { %v3170_v15 = vld [vmem:[#allocation4 + $0x12] sm:$0xff]  ;;  %v2857_v60 = vpop.f32.mrf.mxu2  ;;  %v3041_v58 = vpop.f32.mrf.mxu3 }
 0x26f   : > { %3171 = vst.msk [vmem:[#allocation2 + $0x15] sm:$0xff] %vm3134_vm2, %v3170_v15  ;;  %v2901_v27 = vadd.f32 %v2857_v60, %v2717_v54  ;;  %v2509_v63 = vpop.f32.mrf.mxu0  ;;  %v2676_v7 = vpop.f32.mrf.mxu1 }
 0x270   : > { %3139 = vst.msk [vmem:[#allocation4 + $0x20] sm:$0xff] %vm3134_vm2, %v3120_v53  ;;  %v2551_v19 = vadd.f32 %v2509_v63, %v5878_v21 }
 0x271   : > { %v3085_v23 = vadd.f32 %v3041_v58, %v2901_v27 }
 0x272   : > { %v2718_v43 = vadd.f32 %v2676_v7, %v2551_v19 }
 0x273   : > { %v3103_v9 = vmul.f32 0.01, %v3085_v23 }
 0x275   : > { %v3121_v8 = vmax.f32 %v3085_v23, %v3103_v9 }
 0x276   : > { %v2860_v2 = vpop.f32.mrf.mxu2  ;;  %v3190_v28 = vld [vmem:[#allocation2 + $0x10] ss:$2 sm:$0xff]  ;;  %v3044_v16 = vpop.f32.mrf.mxu3 }
 0x277   : > { %3140 = vst.msk [vmem:[#allocation4 + $0x28] sm:$0xff] %vm3134_vm2, %v3121_v8  ;;  %v2902_v11 = vadd.f32 %v2860_v2, %v2718_v43  ;;  %5048 = vmatmul.msk.f32.gmra.mxu0 %vm3134_vm2, %v3190_v28  ;;  %v2512_v20 = vpop.f32.mrf.mxu0  ;;  %v2679_v17 = vpop.f32.mrf.mxu1  ;;  %v1855_v28 = vadd.f32 %v5933_v57, %v5752_v12 }
 0x278   : > { %v2552_v22 = vadd.f32 %v2512_v20, %v5888_v10 }
 0x279   : > { %v3086_v41 = vadd.f32 %v3044_v16, %v2902_v11  ;;  %v2022_v12 = vadd.f32 %v5939_v62, %v1855_v28 }
 0x27a   : > { %v2719_v29 = vadd.f32 %v2679_v17, %v2552_v22 }
 0x27b   : > { %v3104_v51 = vmul.f32 0.01, %v3086_v41 }
 0x27d   : > { %v3122_v21 = vmax.f32 %v3086_v41, %v3104_v51 }
 0x27e   : > { %v3172_v30 = vld [vmem:[#allocation4 + $0x24] sm:$0xff]  ;;  %v2863_v31 = vpop.f32.mrf.mxu2  ;;  %v3047_v61 = vpop.f32.mrf.mxu3 }
 0x27f   : > { %3173 = vst.msk [vmem:[#allocation2 + $0x1f] sm:$0xff] %vm3134_vm2, %v3172_v30  ;;  %v2903_v38 = vadd.f32 %v2863_v31, %v2719_v29  ;;  %v2515_v0 = vpop.f32.mrf.mxu0  ;;  %v2682_v3 = vpop.f32.mrf.mxu1  ;;  %v2206_v29 = vadd.f32 %v5950_v1, %v2022_v12  ;;  %v1856_v30 = vadd.f32 %v5954_v4, %v5763_v42  ;;  %v1857_v42 = vadd.f32 %v5970_v14, %v5774_v56  ;;  %v5088_v56 = vld [vmem:[%s6358_s3 + $0x38] sm:$0xff] }
 0x280   : > { %3141 = vst.msk [vmem:[#allocation4 + $0x30] sm:$0xff] %vm3134_vm2, %v3122_v21  ;;  %3676 = vmatpush.msrb.mxu3 %v5088_v56  ;;  %v5100_v56 = vld [vmem:[%s6358_s3 + $0x48] sm:$0xff] }
 0x281   : > { %v3087_v40 = vadd.f32 %v3047_v61, %v2903_v38  ;;  %v2390_v0 = vadd.f32 %v5952_v26, %v2206_v29  ;;  %v2023_v62 = vadd.f32 %v5958_v34, %v1856_v30  ;;  %v5082_v34 = vld [vmem:[%s6358_s3 + $0x30] sm:$0xff] }
 0x282   : > { %3612 = vmatpush.msrb.mxu2 %v5082_v34  ;;  %v5094_v34 = vld [vmem:[%s6358_s3 + $0x40] sm:$0xff] }
 0x283   : > { %v3105_v49 = vmul.f32 0.01, %v3087_v40  ;;  %v2207_v1 = vadd.f32 %v5966_v36, %v2023_v62  ;;  %v5070_v36 = vld [vmem:[%s6358_s3 + $0x20] sm:$0xff] }
 0x284   : > { %3484 = vmatpush.msrb.mxu0 %v5070_v36  ;;  %v5112_v36 = vld [vmem:[%s6358_s3 + $0x58] sm:$0xff] }
 0x285   : > { %v3123_v13 = vmax.f32 %v3087_v40, %v3105_v49  ;;  %v2391_v26 = vadd.f32 %v5968_v37, %v2207_v1  ;;  %v5076_v37 = vld [vmem:[%s6358_s3 + $0x28] sm:$0xff]  ;;  %3932 = vmatpush.msra.mxu3 %v5112_v36 }
 0x286   : > { %v2866_v5 = vpop.f32.mrf.mxu2  ;;  %v3253_v10 = vld [vmem:[#allocation2 + $0x11] ss:$2 sm:$0xff]  ;;  %v3317_v50 = vld [vmem:[#allocation2 + $0x12] ss:$2 sm:$0xff]  ;;  %v3050_v54 = vpop.f32.mrf.mxu3  ;;  %3548 = vmatpush.msrb.mxu1 %v5076_v37  ;;  %3740 = vmatpush.msra.mxu0 %v5094_v34 }
 0x287   : > { %v3381_v53 = vld [vmem:[#allocation2 + $0x13] ss:$2 sm:$0xff]  ;;  %3142 = vst.msk [vmem:[#allocation4 + $0x38] sm:$0xff] %vm3134_vm2, %v3123_v13  ;;  %5054 = vmatmul.msk.f32.gmra.mxu1 %vm3134_vm2, %v3253_v10  ;;  %5060 = vmatmul.msk.f32.gmra.mxu2 %vm3134_vm2, %v3317_v50  ;;  %v2518_v15 = vpop.f32.mrf.mxu0  ;;  %v2685_v27 = vpop.f32.mrf.mxu1 }
 0x288   : > { %5066 = vmatmul.msk.f32.gmra.mxu3 %vm3134_vm2, %v3381_v53  ;;  %v2554_v60 = vadd.f32 %v2518_v15, %v5907_v32  ;;  %3804 = vmatpush.msra.mxu1 %v5100_v56 }
 0x28a   : > { %v2721_v58 = vadd.f32 %v2685_v27, %v2554_v60  ;;  %v2024_v60 = vadd.f32 %v5974_v48, %v1857_v42 }
 0x28e   : > { %v3174_v63 = vld [vmem:[#allocation4 + $0x36] sm:$0xff]  ;;  %v2869_v19 = vpop.f32.mrf.mxu2  ;;  %v3053_v7 = vpop.f32.mrf.mxu3 }
 0x28f   : > { %3175 = vst.msk [vmem:[#allocation2 + $0x29] sm:$0xff] %vm3134_vm2, %v3174_v63  ;;  %v2905_v23 = vadd.f32 %v2869_v19, %v2721_v58  ;;  %v2521_v9 = vpop.f32.mrf.mxu0  ;;  %v2688_v43 = vpop.f32.mrf.mxu1  ;;  %v2208_v19 = vadd.f32 %v5982_v45, %v2024_v60 }
 0x291   : > { %v3089_v8 = vadd.f32 %v3053_v7, %v2905_v23  ;;  %v1858_v7 = vadd.f32 %v5986_v25, %v5785_v6  ;;  %v1859_v6 = vadd.f32 %v6002_v55, %v5795_v18 }
 0x293   : > { %v3107_v2 = vmul.f32 0.01, %v3089_v8  ;;  %v2026_v29 = vadd.f32 %v6006_v39, %v1859_v6 }
 0x295   : > { %v3125_v11 = vmax.f32 %v3089_v8, %v3107_v2  ;;  %v2392_v2 = vadd.f32 %v5984_v24, %v2208_v19  ;;  %v2210_v18 = vadd.f32 %v6014_v44, %v2026_v29 }
 0x296   : > { %v2872_v16 = vpop.f32.mrf.mxu2  ;;  %v3192_v20 = vld [vmem:[#allocation2 + $0x20] ss:$2 sm:$0xff]  ;;  %v3255_v22 = vld [vmem:[#allocation2 + $0x21] ss:$2 sm:$0xff]  ;;  %v3056_v17 = vpop.f32.mrf.mxu3 }
 0x297   : > { %v3319_v32 = vld [vmem:[#allocation2 + $0x22] ss:$2 sm:$0xff]  ;;  %3144 = vst.msk [vmem:[#allocation4 + $0x48] sm:$0xff] %vm3134_vm2, %v3125_v11  ;;  %5049 = vmatmul.msk.f32.gmra.mxu0 %vm3134_vm2, %v3192_v20  ;;  %5055 = vmatmul.msk.f32.gmra.mxu1 %vm3134_vm2, %v3255_v22  ;;  %v3383_v41 = vld [vmem:[#allocation2 + $0x23] ss:$2 sm:$0xff]  ;;  %v2524_v51 = vpop.f32.mrf.mxu0  ;;  %v2691_v21 = vpop.f32.mrf.mxu1  ;;  %v2025_v16 = vadd.f32 %v5990_v52, %v1858_v7 }
 0x298   : > { %5061 = vmatmul.msk.f32.gmra.mxu2 %vm3134_vm2, %v3319_v32  ;;  %5067 = vmatmul.msk.f32.gmra.mxu3 %vm3134_vm2, %v3383_v41  ;;  %v2556_v57 = vadd.f32 %v2524_v51, %v5937_v59 }
 0x299   : > { %v2209_v45 = vadd.f32 %v5998_v33, %v2025_v16 }
 0x29a   : > { %v2723_v31 = vadd.f32 %v2691_v21, %v2556_v57 }
 0x29b   : > { %v2393_v12 = vadd.f32 %v6000_v35, %v2209_v45  ;;  %v3573_v45 = vld [vmem:[#allocation2 + $0x1c] ss:$2 sm:$0xff] }
 0x29e   : > { %v3176_v38 = vld [vmem:[#allocation4 + $0x48] sm:$0xff]  ;;  %v2875_v61 = vpop.f32.mrf.mxu2  ;;  %v3059_v3 = vpop.f32.mrf.mxu3 }
 0x29f   : > { %3177 = vst.msk [vmem:[#allocation2 + $0x33] sm:$0xff] %vm3134_vm2, %v3176_v38  ;;  %v2907_v40 = vadd.f32 %v2875_v61, %v2723_v31  ;;  %v2527_v49 = vpop.f32.mrf.mxu0  ;;  %v2694_v5 = vpop.f32.mrf.mxu1 }
 0x2a0   : > { %v2557_v13 = vadd.f32 %v2527_v49, %v2390_v0  ;;  %v2394_v49 = vadd.f32 %v6018_v47, %v2210_v18  ;;  %v5118_v18 = vld [vmem:[%s6358_s3 + $0x60] sm:$0xff] }
 0x2a1   : > { %v3091_v59 = vadd.f32 %v3059_v3, %v2907_v40 }
 0x2a2   : > { %v2724_v50 = vadd.f32 %v2694_v5, %v2557_v13 }
 0x2a3   : > { %v3109_v10 = vmul.f32 0.01, %v3091_v59 }
 0x2a5   : > { %v3127_v4 = vmax.f32 %v3091_v59, %v3109_v10 }
 0x2a6   : > { %v2878_v53 = vpop.f32.mrf.mxu2  ;;  %v3062_v15 = vpop.f32.mrf.mxu3 }
 0x2a7   : > { %3146 = vst.msk [vmem:[#allocation4 + $0x58] sm:$0xff] %vm3134_vm2, %v3127_v4  ;;  %v2908_v54 = vadd.f32 %v2878_v53, %v2724_v50  ;;  %v2530_v14 = vpop.f32.mrf.mxu0  ;;  %v2697_v63 = vpop.f32.mrf.mxu1 }
 0x2a8   : > { %v2558_v27 = vadd.f32 %v2530_v14, %v2391_v26 }
 0x2a9   : > { %v3092_v58 = vadd.f32 %v3062_v15, %v2908_v54  ;;  %v5106_v54 = vld [vmem:[%s6358_s3 + $0x50] sm:$0xff] }
 0x2aa   : > { %v2725_v8 = vadd.f32 %v2697_v63, %v2558_v27  ;;  %3868 = vmatpush.msra.mxu2 %v5106_v54 }
 0x2ab   : > { %v3110_v23 = vmul.f32 0.01, %v3092_v58 }
 0x2ad   : > { %v3128_v9 = vmax.f32 %v3092_v58, %v3110_v23 }
 0x2ae   : > { %v2881_v43 = vpop.f32.mrf.mxu2  ;;  %v3065_v48 = vpop.f32.mrf.mxu3 }
 0x2af   : > { %3147 = vst.msk [vmem:[#allocation4 + $0x60] sm:$0xff] %vm3134_vm2, %v3128_v9  ;;  %v2909_v28 = vadd.f32 %v2881_v43, %v2725_v8  ;;  %v2533_v11 = vpop.f32.mrf.mxu0  ;;  %v2700_v32 = vpop.f32.mrf.mxu1  ;;  %v3443_v8 = vld [vmem:[#allocation2 + $0xa] ss:$2 sm:$0xff]  ;;  %v3507_v43 = vld [vmem:[#allocation2 + $0xb] ss:$2 sm:$0xff] }
 0x2b0   : > { %v2559_v20 = vadd.f32 %v2533_v11, %v2392_v2  ;;  %v3571_v2 = vld [vmem:[#allocation2 + $0xc] ss:$2 sm:$0xff] }
 0x2b1   : > { %v3093_v22 = vadd.f32 %v3065_v48, %v2909_v28  ;;  %v6175_v28 = vld [vmem:[%s6359_s4] ss:$0 sm:$0xff] }
 0x2b2   : > { %v2726_v17 = vadd.f32 %v2700_v32, %v2559_v20  ;;  %v3445_v20 = vld [vmem:[#allocation2 + $0x1a] ss:$2 sm:$0xff]  ;;  %v3509_v32 = vld [vmem:[#allocation2 + $0x1b] ss:$2 sm:$0xff] }
 0x2b3   : > { %v3111_v41 = vmul.f32 0.01, %v3093_v22 }
 0x2b5   : > { %v3129_v25 = vmax.f32 %v3093_v22, %v3111_v41 }
 0x2b6   : > { %v3178_v51 = vld [vmem:[#allocation4 + $0x5a] sm:$0xff]  ;;  %v2884_v24 = vpop.f32.mrf.mxu2  ;;  %v3068_v21 = vpop.f32.mrf.mxu3 }
 0x2b7   : > { %3179 = vst.msk [vmem:[#allocation2 + $0x3d] sm:$0xff] %vm3134_vm2, %v3178_v51  ;;  %v2910_v57 = vadd.f32 %v2884_v24, %v2726_v17  ;;  %v2536_v52 = vpop.f32.mrf.mxu0  ;;  %v2703_v31 = vpop.f32.mrf.mxu1  ;;  %v3447_v51 = vld [vmem:[#allocation2 + $0x2a] ss:$2 sm:$0xff]  ;;  %v3635_v24 = vld [vmem:[#allocation2 + $0xd] ss:$2 sm:$0xff] }
 0x2b8   : > { %3148 = vst.msk [vmem:[#allocation4 + $0x68] sm:$0xff] %vm3134_vm2, %v3129_v25  ;;  %v2560_v33 = vadd.f32 %v2536_v52, %v2393_v12  ;;  %v5130_v52 = vld [vmem:[%s6358_s3 + $0x70] sm:$0xff] }
 0x2b9   : > { %v3094_v30 = vadd.f32 %v3068_v21, %v2910_v57  ;;  %v3511_v57 = vld [vmem:[#allocation2 + $0x2b] ss:$2 sm:$0xff]  ;;  %v3575_v21 = vld [vmem:[#allocation2 + $0x2c] ss:$2 sm:$0xff] }
 0x2ba   : > { %v2727_v61 = vadd.f32 %v2703_v31, %v2560_v33  ;;  %v3637_v33 = vld [vmem:[#allocation2 + $0x1d] ss:$2 sm:$0xff] }
 0x2bb   : > { %v3112_v55 = vmul.f32 0.01, %v3094_v30 }
 0x2bd   : > { %v3130_v38 = vmax.f32 %v3094_v30, %v3112_v55  ;;  %v5136_v55 = vld [vmem:[%s6358_s3 + $0x78] sm:$0xff] }
 0x2be   : > { %v2887_v0 = vpop.f32.mrf.mxu2  ;;  %v3194_v40 = vld [vmem:[#allocation2 + $0x30] ss:$2 sm:$0xff]  ;;  %v3257_v35 = vld [vmem:[#allocation2 + $0x31] ss:$2 sm:$0xff]  ;;  %v3071_v13 = vpop.f32.mrf.mxu3 }
 0x2bf   : > { %v3321_v3 = vld [vmem:[#allocation2 + $0x32] ss:$2 sm:$0xff]  ;;  %3149 = vst.msk [vmem:[#allocation4 + $0x70] sm:$0xff] %vm3134_vm2, %v3130_v38  ;;  %v2911_v62 = vadd.f32 %v2887_v0, %v2727_v61  ;;  %5050 = vmatmul.msk.f32.gmra.mxu0 %vm3134_vm2, %v3194_v40  ;;  %5056 = vmatmul.msk.f32.gmra.mxu1 %vm3134_vm2, %v3257_v35  ;;  %v3385_v39 = vld [vmem:[#allocation2 + $0x33] ss:$2 sm:$0xff]  ;;  %v2539_v44 = vpop.f32.mrf.mxu0  ;;  %v2706_v1 = vpop.f32.mrf.mxu1  ;;  %v5124_v38 = vld [vmem:[%s6358_s3 + $0x68] sm:$0xff] }
 0x2c0   : > { %5062 = vmatmul.msk.f32.gmra.mxu2 %vm3134_vm2, %v3321_v3  ;;  %5068 = vmatmul.msk.f32.gmra.mxu3 %vm3134_vm2, %v3385_v39  ;;  %v2561_v59 = vadd.f32 %v2539_v44, %v2394_v49  ;;  %v3639_v0 = vld [vmem:[#allocation2 + $0x2d] ss:$2 sm:$0xff]  ;;  %v3699_v49 = vld [vmem:[#allocation2 + $0x14] ss:$2 sm:$0xff] }
 0x2c1   : > { %v3095_v5 = vadd.f32 %v3071_v13, %v2911_v62  ;;  %v3763_v62 = vld [vmem:[#allocation2 + $0x15] ss:$2 sm:$0xff]  ;;  %v3827_v39 = vld [vmem:[#allocation2 + $0x16] ss:$2 sm:$0xff] }
 0x2c2   : > { %v2728_v47 = vadd.f32 %v2706_v1, %v2561_v59  ;;  %v3703_v54 = vld [vmem:[#allocation2 + $0x34] ss:$2 sm:$0xff]  ;;  %v3767_v34 = vld [vmem:[#allocation2 + $0x35] ss:$2 sm:$0xff] }
 0x2c3   : > { %v3113_v10 = vmul.f32 0.01, %v3095_v5  ;;  %v3831_v36 = vld [vmem:[#allocation2 + $0x36] ss:$2 sm:$0xff] }
 0x2c5   : > { %v3131_v42 = vmax.f32 %v3095_v5, %v3113_v10  ;;  %v3701_v10 = vld [vmem:[#allocation2 + $0x24] ss:$2 sm:$0xff] }
 0x2c6   : > { %v3180_v4 = vld [vmem:[#allocation4 + $0x6c] sm:$0xff]  ;;  %v2890_v50 = vpop.f32.mrf.mxu2  ;;  %v3074_v26 = vpop.f32.mrf.mxu3 }
 0x2c7   : > { %3181 = vst.msk [vmem:[#allocation2 + $0x47] sm:$0xff] %vm3134_vm2, %v3180_v4  ;;  %v2912_v53 = vadd.f32 %v2890_v50, %v2728_v47  ;;  %v2542_v15 = vpop.f32.mrf.mxu0  ;;  %v2709_v37 = vpop.f32.mrf.mxu1  ;;  %v3829_v47 = vld [vmem:[#allocation2 + $0x26] ss:$2 sm:$0xff] }
 0x2c8   : > { %3150 = vst.msk [vmem:[#allocation4 + $0x78] sm:$0xff] %vm3134_vm2, %v3131_v42  ;;  %v3765_v42 = vld [vmem:[#allocation2 + $0x25] ss:$2 sm:$0xff] }
 0x2c9   : > { %v3096_v14 = vadd.f32 %v3074_v26, %v2912_v53  ;;  %v3891_v15 = vld [vmem:[#allocation2 + $0x17] ss:$2 sm:$0xff] }
 0x2cb   : > { %v3114_v60 = vmul.f32 0.01, %v3096_v14 }
 0x2cd   : > { %v3132_v27 = vmax.f32 %v3096_v14, %v3114_v60 }
 0x2ce   : > { %v2893_v58 = vpop.f32.mrf.mxu2  ;;  %v3196_v63 = vld [vmem:[#allocation2 + $0x40] ss:$2 sm:$0xff]  ;;  %v3259_v19 = vld [vmem:[#allocation2 + $0x41] ss:$2 sm:$0xff]  ;;  %v3077_v7 = vpop.f32.mrf.mxu3 }
 0x2cf   : > { %v3323_v23 = vld [vmem:[#allocation2 + $0x42] ss:$2 sm:$0xff]  ;;  %3151 = vst.msk [vmem:[#allocation4 + $0x80] sm:$0xff] %vm3134_vm2, %v3132_v27  ;;  %5051 = vmatmul.msk.f32.gmra.mxu0 %vm3134_vm2, %v3196_v63  ;;  %5057 = vmatmul.msk.f32.gmra.mxu1 %vm3134_vm2, %v3259_v19  ;;  %v3513_v30 = vld [vmem:[#allocation2 + $0x3b] ss:$2 sm:$0xff] }
 0x2d0   : > { %5063 = vmatmul.msk.f32.gmra.mxu2 %vm3134_vm2, %v3323_v23  ;;  %v3449_v29 = vld [vmem:[#allocation2 + $0x3a] ss:$2 sm:$0xff]  ;;  %v3641_v3 = vld [vmem:[#allocation2 + $0x3d] ss:$2 sm:$0xff] }
 0x2d1   : > { %v3577_v31 = vld [vmem:[#allocation2 + $0x3c] ss:$2 sm:$0xff]  ;;  %v3893_v27 = vld [vmem:[#allocation2 + $0x27] ss:$2 sm:$0xff] }
 0x2d6   : > { %v3182_v9 = vld [vmem:[#allocation4 + $0x7e] sm:$0xff] }
 0x2d7   : > { %3183 = vst.msk [vmem:[#allocation2 + $0x51] sm:$0xff] %vm3134_vm2, %v3182_v9  ;;  %5071 = vmatmul.msk.f32.vlgmr.msrb.gmra.mxu0 %vm3134_vm2, %v3443_v8  ;;  %5077 = vmatmul.msk.f32.vlgmr.msrb.gmra.mxu1 %vm3134_vm2, %v3507_v43 }
 0x2d8   : > { %5083 = vmatmul.msk.f32.vlgmr.msrb.gmra.mxu2 %vm3134_vm2, %v3571_v2  ;;  %3996 = vmatpush.msrb.mxu0 %v5118_v18  ;;  %v3895_v2 = vld [vmem:[#allocation2 + $0x37] ss:$2 sm:$0xff] }
 0x2d9   : > { %4121 = vmatpush.msrb.mxu2 %v5130_v52  ;;  %4060 = vmatpush.msrb.mxu1 %v5124_v38 }
 0x2dc   : > { %v3230_v48 = vpop.f32.mrf.mxu0  ;;  %v3294_v22 = vpop.f32.mrf.mxu1 }
 0x2dd   : > { %v3245_v11 = vadd.f32 %v6175_v28, %v3230_v48 }
 0x2de   : > { %v3387_v16 = vld [vmem:[#allocation2 + $0x43] ss:$2 sm:$0xff]  ;;  %v3451_v61 = vld [vmem:[#allocation2 + $0x4a] ss:$2 sm:$0xff] }
 0x2df   : > { %5069 = vmatmul.msk.f32.gmra.mxu3 %vm3134_vm2, %v3387_v16  ;;  %5072 = vmatmul.msk.f32.gmra.mxu0 %vm3134_vm2, %v3445_v20  ;;  %v3309_v41 = vadd.f32 %v3294_v22, %v3245_v11  ;;  %v3515_v40 = vld [vmem:[#allocation2 + $0x4b] ss:$2 sm:$0xff]  ;;  %v3579_v35 = vld [vmem:[#allocation2 + $0x4c] ss:$2 sm:$0xff] }
 0x2e0   : > { %5078 = vmatmul.msk.f32.gmra.mxu1 %vm3134_vm2, %v3509_v32  ;;  %5084 = vmatmul.msk.f32.gmra.mxu2 %vm3134_vm2, %v3573_v45  ;;  %v3643_v1 = vld [vmem:[#allocation2 + $0x4d] ss:$2 sm:$0xff]  ;;  %v3705_v60 = vld [vmem:[#allocation2 + $0x44] ss:$2 sm:$0xff]  ;;  %v3707_v43 = vld [vmem:[#allocation2 + $0x54] ss:$2 sm:$0xff] }
 0x2e1   : > { %v3769_v63 = vld [vmem:[#allocation2 + $0x45] ss:$2 sm:$0xff]  ;;  %v3833_v19 = vld [vmem:[#allocation2 + $0x46] ss:$2 sm:$0xff]  ;;  %v3771_v48 = vld [vmem:[#allocation2 + $0x55] ss:$2 sm:$0xff] }
 0x2e2   : > { %v3835_v11 = vld [vmem:[#allocation2 + $0x56] ss:$2 sm:$0xff]  ;;  %v3897_v16 = vld [vmem:[#allocation2 + $0x47] ss:$2 sm:$0xff]  ;;  %v3899_v45 = vld [vmem:[#allocation2 + $0x57] ss:$2 sm:$0xff] }
 0x2e3   : > { %v3358_v6 = vpop.f32.mrf.mxu2  ;;  %v3422_v17 = vpop.f32.mrf.mxu3  ;;  %v3955_v20 = vld [vmem:[#allocation2 + $0x1e] ss:$2 sm:$0xff]  ;;  %v4019_v22 = vld [vmem:[#allocation2 + $0x1f] ss:$2 sm:$0xff]  ;;  %v4025_v18 = vld [vmem:[#allocation2 + $0x4f] ss:$2 sm:$0xff] }
 0x2e4   : > { %v3373_v25 = vadd.f32 %v3358_v6, %v3309_v41  ;;  %v4082_v32 = vld [vmem:[#allocation2 + $0x20] ss:$2 sm:$0xff]  ;;  %v4021_v6 = vld [vmem:[#allocation2 + $0x2f] ss:$2 sm:$0xff] }
 0x2e5   : > { %v3957_v41 = vld [vmem:[#allocation2 + $0x2e] ss:$2 sm:$0xff] }
 0x2e6   : > { %v6182_v12 = vadd.f32 %v3422_v17, %v3373_v25  ;;  %v4083_v25 = vld [vmem:[#allocation2 + $0x30] ss:$2 sm:$0xff] }
 0x2e7   : > { %5073 = vmatmul.msk.f32.gmra.mxu0 %vm3134_vm2, %v3447_v51  ;;  %5089 = vmatmul.msk.f32.vlgmr.msrb.gmra.mxu3 %vm3134_vm2, %v3635_v24  ;;  %v3959_v17 = vld [vmem:[#allocation2 + $0x3e] ss:$2 sm:$0xff]  ;;  %v4143_v51 = vld [vmem:[#allocation2 + $0x21] ss:$2 sm:$0xff] }
 0x2e8   : > { %5079 = vmatmul.msk.f32.gmra.mxu1 %vm3134_vm2, %v3511_v57  ;;  %5085 = vmatmul.msk.f32.gmra.mxu2 %vm3134_vm2, %v3575_v21  ;;  %v4023_v24 = vld [vmem:[#allocation2 + $0x3f] ss:$2 sm:$0xff]  ;;  %v4084_v57 = vld [vmem:[#allocation2 + $0x40] ss:$2 sm:$0xff] }
 0x2e9   : > { %4182 = vmatpush.msrb.mxu3 %v5136_v55  ;;  %v4086_v55 = vld [vmem:[#allocation2 + $0x50] ss:$2 sm:$0xff] }
 0x2ef   : > { %5074 = vmatmul.msk.f32.gmra.mxu0 %vm3134_vm2, %v3449_v29  ;;  %5090 = vmatmul.msk.f32.gmra.mxu3 %vm3134_vm2, %v3637_v33  ;;  %v3961_v33 = vld [vmem:[#allocation2 + $0x4e] ss:$2 sm:$0xff] }
 0x2f0   : > { %5080 = vmatmul.msk.f32.gmra.mxu1 %vm3134_vm2, %v3513_v30  ;;  %5086 = vmatmul.msk.f32.gmra.mxu2 %vm3134_vm2, %v3577_v31  ;;  %v4144_v30 = vld [vmem:[#allocation2 + $0x31] ss:$2 sm:$0xff] }
 0x2f4   : > { %v3233_v13 = vpop.f32.mrf.mxu0 }
 0x2f5   : > { %v3246_v44 = vadd.f32 %v6175_v28, %v3233_v13 }
 0x2f7   : > { %5075 = vmatmul.msk.f32.gmra.mxu0 %vm3134_vm2, %v3451_v61  ;;  %5091 = vmatmul.msk.f32.gmra.mxu3 %vm3134_vm2, %v3639_v0  ;;  %v3963_v0 = vld [vmem:[#allocation2 + $0x5e] ss:$2 sm:$0xff] }
 0x2f8   : > { %5081 = vmatmul.msk.f32.gmra.mxu1 %vm3134_vm2, %v3515_v40  ;;  %5087 = vmatmul.msk.f32.gmra.mxu2 %vm3134_vm2, %v3579_v35  ;;  %v4088_v35 = vld [vmem:[#allocation2 + $0x60] ss:$2 sm:$0xff] }
 0x2ff   : > { %5092 = vmatmul.msk.f32.gmra.mxu3 %vm3134_vm2, %v3641_v3  ;;  %5095 = vmatmul.msk.f32.vlgmr.msra.gmra.mxu0 %vm3134_vm2, %v3699_v49  ;;  %v4027_v3 = vld [vmem:[#allocation2 + $0x5f] ss:$2 sm:$0xff] }
 0x300   : > { %5101 = vmatmul.msk.f32.vlgmr.msra.gmra.mxu1 %vm3134_vm2, %v3763_v62  ;;  %5107 = vmatmul.msk.f32.vlgmr.msra.gmra.mxu2 %vm3134_vm2, %v3827_v39  ;;  %v4145_v62 = vld [vmem:[#allocation2 + $0x41] ss:$2 sm:$0xff] }
 0x304   : > { %v3297_v59 = vpop.f32.mrf.mxu1 }
 0x305   : > { %v3310_v5 = vadd.f32 %v3297_v59, %v3246_v44  ;;  %v4147_v59 = vld [vmem:[#allocation2 + $0x51] ss:$2 sm:$0xff] }
 0x307   : > { %5093 = vmatmul.msk.f32.gmra.mxu3 %vm3134_vm2, %v3643_v1  ;;  %5096 = vmatmul.msk.f32.gmra.mxu0 %vm3134_vm2, %v3701_v10 }
 0x308   : > { %5102 = vmatmul.msk.f32.gmra.mxu1 %vm3134_vm2, %v3765_v42  ;;  %5108 = vmatmul.msk.f32.gmra.mxu2 %vm3134_vm2, %v3829_v47 }
 0x30a   : > { %v3361_v4 = vpop.f32.mrf.mxu2 }
 0x30b   : > { %v3374_v50 = vadd.f32 %v3361_v4, %v3310_v5  ;;  %v3425_v53 = vpop.f32.mrf.mxu3  ;;  %v4149_v4 = vld [vmem:[#allocation2 + $0x61] ss:$2 sm:$0xff] }
 0x30d   : > { %v6217_v26 = vadd.f32 %v3425_v53, %v3374_v50 }
 0x30f   : > { %5097 = vmatmul.msk.f32.gmra.mxu0 %vm3134_vm2, %v3703_v54  ;;  %5113 = vmatmul.msk.f32.vlgmr.msra.gmra.mxu3 %vm3134_vm2, %v3891_v15 }
 0x310   : > { %5103 = vmatmul.msk.f32.gmra.mxu1 %vm3134_vm2, %v3767_v34  ;;  %5109 = vmatmul.msk.f32.gmra.mxu2 %vm3134_vm2, %v3831_v36 }
 0x314   : > { %v3236_v56 = vpop.f32.mrf.mxu0  ;;  %v3300_v37 = vpop.f32.mrf.mxu1 }
 0x315   : > { %v3247_v14 = vadd.f32 %v6175_v28, %v3236_v56 }
 0x317   : > { %v3311_v58 = vadd.f32 %v3300_v37, %v3247_v14  ;;  %5098 = vmatmul.msk.f32.gmra.mxu0 %vm3134_vm2, %v3705_v60  ;;  %5114 = vmatmul.msk.f32.gmra.mxu3 %vm3134_vm2, %v3893_v27 }
 0x318   : > { %5104 = vmatmul.msk.f32.gmra.mxu1 %vm3134_vm2, %v3769_v63  ;;  %5110 = vmatmul.msk.f32.gmra.mxu2 %vm3134_vm2, %v3833_v19 }
 0x31b   : > { %v3364_v23 = vpop.f32.mrf.mxu2  ;;  %v3428_v9 = vpop.f32.mrf.mxu3 }
 0x31c   : > { %v3375_v7 = vadd.f32 %v3364_v23, %v3311_v58 }
 0x31e   : > { %v6228_v8 = vadd.f32 %v3428_v9, %v3375_v7 }
 0x31f   : > { %5099 = vmatmul.msk.f32.gmra.mxu0 %vm3134_vm2, %v3707_v43  ;;  %5115 = vmatmul.msk.f32.gmra.mxu3 %vm3134_vm2, %v3895_v2 }
 0x320   : > { %5105 = vmatmul.msk.f32.gmra.mxu1 %vm3134_vm2, %v3771_v48  ;;  %5111 = vmatmul.msk.f32.gmra.mxu2 %vm3134_vm2, %v3835_v11 }
 0x327   : > { %5116 = vmatmul.msk.f32.gmra.mxu3 %vm3134_vm2, %v3897_v16  ;;  %5119 = vmatmul.msk.f32.vlgmr.msrb.gmra.mxu0 %vm3134_vm2, %v3955_v20 }
 0x328   : > { %5125 = vmatmul.msk.f32.vlgmr.msrb.gmra.mxu1 %vm3134_vm2, %v4019_v22  ;;  %5131 = vmatmul.msk.f32.vlgmr.msrb.gmra.mxu2 %vm3134_vm2, %v4082_v32 }
 0x32f   : > { %5117 = vmatmul.msk.f32.gmra.mxu3 %vm3134_vm2, %v3899_v45  ;;  %5120 = vmatmul.msk.f32.gmra.mxu0 %vm3134_vm2, %v3957_v41 }
 0x330   : > { %5126 = vmatmul.msk.f32.gmra.mxu1 %vm3134_vm2, %v4021_v6  ;;  %5132 = vmatmul.msk.f32.gmra.mxu2 %vm3134_vm2, %v4083_v25 }
 0x337   : > { %5121 = vmatmul.msk.f32.gmra.mxu0 %vm3134_vm2, %v3959_v17  ;;  %5137 = vmatmul.msk.f32.vlgmr.msrb.gmra.mxu3 %vm3134_vm2, %v4143_v51 }
 0x338   : > { %5127 = vmatmul.msk.f32.gmra.mxu1 %vm3134_vm2, %v4023_v24  ;;  %5133 = vmatmul.msk.f32.gmra.mxu2 %vm3134_vm2, %v4084_v57 }
 0x33c   : > { %v3239_v21 = vpop.f32.mrf.mxu0  ;;  %v3303_v29 = vpop.f32.mrf.mxu1 }
 0x33d   : > { %v3248_v52 = vadd.f32 %v6175_v28, %v3239_v21 }
 0x33f   : > { %v3312_v31 = vadd.f32 %v3303_v29, %v3248_v52  ;;  %5122 = vmatmul.msk.f32.gmra.mxu0 %vm3134_vm2, %v3961_v33  ;;  %5138 = vmatmul.msk.f32.gmra.mxu3 %vm3134_vm2, %v4144_v30 }
 0x340   : > { %5128 = vmatmul.msk.f32.gmra.mxu1 %vm3134_vm2, %v4025_v18  ;;  %5134 = vmatmul.msk.f32.gmra.mxu2 %vm3134_vm2, %v4086_v55 }
 0x343   : > { %v3367_v38 = vpop.f32.mrf.mxu2  ;;  %v3431_v40 = vpop.f32.mrf.mxu3 }
 0x344   : > { %v3376_v61 = vadd.f32 %v3367_v38, %v3312_v31 }
 0x346   : > { %v3440_v49 = vadd.f32 %v3431_v40, %v3376_v61 }
 0x347   : > { %5123 = vmatmul.msk.f32.gmra.mxu0 %vm3134_vm2, %v3963_v0  ;;  %5139 = vmatmul.msk.f32.gmra.mxu3 %vm3134_vm2, %v4145_v62 }
 0x348   : > { %5135 = vmatmul.msk.f32.gmra.mxu2 %vm3134_vm2, %v4088_v35  ;;  %5129 = vmatmul.msk.f32.gmra.mxu1 %vm3134_vm2, %v4027_v3 }
 0x34c   : > { %v3242_v39 = vpop.f32.mrf.mxu0  ;;  %v3306_v13 = vpop.f32.mrf.mxu1 }
 0x34d   : > { %v3249_v44 = vadd.f32 %v6175_v28, %v3242_v39 }
 0x34f   : > { %v3313_v5 = vadd.f32 %v3306_v13, %v3249_v44  ;;  %5140 = vmatmul.msk.f32.gmra.mxu3 %vm3134_vm2, %v4147_v59 }
 0x353   : > { %v3370_v1 = vpop.f32.mrf.mxu2 }
 0x354   : > { %v3377_v10 = vadd.f32 %v3370_v1, %v3313_v5  ;;  %v3486_v42 = vpop.f32.mrf.mxu0  ;;  %v3550_v47 = vpop.f32.mrf.mxu1 }
 0x355   : > { %v3501_v50 = vadd.f32 %v3486_v42, %v6182_v12 }
 0x357   : > { %v3565_v53 = vadd.f32 %v3550_v47, %v3501_v50  ;;  %5141 = vmatmul.msk.f32.gmra.mxu3 %vm3134_vm2, %v4149_v4 }
 0x35b   : > { %v3614_v54 = vpop.f32.mrf.mxu2 }
 0x35c   : > { %v3629_v15 = vadd.f32 %v3614_v54, %v3565_v53  ;;  %v3489_v34 = vpop.f32.mrf.mxu0 }
 0x35d   : > { %v3502_v36 = vadd.f32 %v3489_v34, %v6217_v26  ;;  %v3553_v28 = vpop.f32.mrf.mxu1 }
 0x35f   : > { %v3566_v56 = vadd.f32 %v3553_v28, %v3502_v36 }
 0x362   : > { %v3434_v14 = vpop.f32.mrf.mxu3 }
 0x363   : > { %v3441_v37 = vadd.f32 %v3434_v14, %v3377_v10  ;;  %v3617_v60 = vpop.f32.mrf.mxu2 }
 0x364   : > { %v3630_v27 = vadd.f32 %v3617_v60, %v3566_v56  ;;  %v3492_v58 = vpop.f32.mrf.mxu0 }
 0x365   : > { %v3503_v63 = vadd.f32 %v3492_v58, %v6228_v8  ;;  %v3556_v19 = vpop.f32.mrf.mxu1 }
 0x367   : > { %v3567_v23 = vadd.f32 %v3556_v19, %v3503_v63 }
 0x36a   : > { %v3678_v12 = vpop.f32.mrf.mxu3 }
 0x36b   : > { %v3620_v7 = vpop.f32.mrf.mxu2  ;;  %v3693_v9 = vadd.f32 %v3678_v12, %v3629_v15 }
 0x36c   : > { %v3631_v43 = vadd.f32 %v3620_v7, %v3567_v23  ;;  %v3495_v2 = vpop.f32.mrf.mxu0 }
 0x36d   : > { %v3504_v48 = vadd.f32 %v3495_v2, %v3440_v49  ;;  %v3559_v11 = vpop.f32.mrf.mxu1 }
 0x36f   : > { %v3568_v16 = vadd.f32 %v3559_v11, %v3504_v48 }
 0x372   : > { %v3681_v26 = vpop.f32.mrf.mxu3 }
 0x373   : > { %v3623_v20 = vpop.f32.mrf.mxu2  ;;  %v3694_v22 = vadd.f32 %v3681_v26, %v3630_v27 }
 0x374   : > { %v3632_v32 = vadd.f32 %v3623_v20, %v3568_v16  ;;  %v3498_v45 = vpop.f32.mrf.mxu0 }
 0x375   : > { %v3505_v41 = vadd.f32 %v3498_v45, %v3441_v37  ;;  %v3562_v6 = vpop.f32.mrf.mxu1 }
 0x377   : > { %v3569_v25 = vadd.f32 %v3562_v6, %v3505_v41 }
 0x37a   : > { %v3684_v17 = vpop.f32.mrf.mxu3 }
 0x37b   : > { %v3626_v8 = vpop.f32.mrf.mxu2  ;;  %v3695_v51 = vadd.f32 %v3684_v17, %v3631_v43 }
 0x37c   : > { %v3633_v24 = vadd.f32 %v3626_v8, %v3569_v25  ;;  %v3742_v57 = vpop.f32.mrf.mxu0 }
 0x37d   : > { %v3806_v21 = vpop.f32.mrf.mxu1  ;;  %v3757_v10 = vadd.f32 %v3742_v57, %v3693_v9 }
 0x37f   : > { %v3821_v47 = vadd.f32 %v3806_v21, %v3757_v10 }
 0x382   : > { %v3687_v52 = vpop.f32.mrf.mxu3 }
 0x383   : > { %v3696_v29 = vadd.f32 %v3687_v52, %v3632_v32  ;;  %v3870_v33 = vpop.f32.mrf.mxu2 }
 0x384   : > { %v3745_v30 = vpop.f32.mrf.mxu0  ;;  %v3885_v53 = vadd.f32 %v3870_v33, %v3821_v47 }
 0x385   : > { %v3809_v31 = vpop.f32.mrf.mxu1  ;;  %v3758_v54 = vadd.f32 %v3745_v30, %v3694_v22 }
 0x387   : > { %v3822_v56 = vadd.f32 %v3809_v31, %v3758_v54 }
 0x38a   : > { %v3690_v18 = vpop.f32.mrf.mxu3 }
 0x38b   : > { %v6261_v55 = vadd.f32 %v3690_v18, %v3633_v24  ;;  %v3873_v38 = vpop.f32.mrf.mxu2 }
 0x38c   : > { %v3748_v61 = vpop.f32.mrf.mxu0  ;;  %v3886_v14 = vadd.f32 %v3873_v38, %v3822_v56 }
 0x38d   : > { %v3812_v0 = vpop.f32.mrf.mxu1  ;;  %v3759_v58 = vadd.f32 %v3748_v61, %v3695_v51 }
 0x38f   : > { %v3823_v9 = vadd.f32 %v3812_v0, %v3759_v58 }
 0x392   : > { %v3934_v40 = vpop.f32.mrf.mxu3 }
 0x393   : > { %v3876_v35 = vpop.f32.mrf.mxu2  ;;  %v3949_v15 = vadd.f32 %v3934_v40, %v3885_v53 }
 0x394   : > { %v3751_v3 = vpop.f32.mrf.mxu0  ;;  %v3887_v2 = vadd.f32 %v3876_v35, %v3823_v9 }
 0x395   : > { %v3815_v49 = vpop.f32.mrf.mxu1  ;;  %v3760_v16 = vadd.f32 %v3751_v3, %v3696_v29 }
 0x397   : > { %v3824_v25 = vadd.f32 %v3815_v49, %v3760_v16 }
 0x39a   : > { %v3937_v62 = vpop.f32.mrf.mxu3 }
 0x39b   : > { %v3879_v39 = vpop.f32.mrf.mxu2  ;;  %v3950_v63 = vadd.f32 %v3937_v62, %v3886_v14  ;;  %v6285_v62 = vld [vmem:[%s6360_s5 + $0x1] ss:$0 sm:$0xff] }
 0x39c   : > { %v3754_v13 = vpop.f32.mrf.mxu0  ;;  %v3888_v51 = vadd.f32 %v3879_v39, %v3824_v25  ;;  %v5172_v25 = vld [vmem:[%s6360_s5 + $0x7] ss:$0 sm:$0xff] }
 0x39d   : > { %v3818_v59 = vpop.f32.mrf.mxu1  ;;  %v3761_v52 = vadd.f32 %v3754_v13, %v6261_v55  ;;  %v6280_v55 = vld [vmem:[%s6360_s5] ss:$0 sm:$0xff] }
 0x39f   : > { %v3825_v0 = vadd.f32 %v3818_v59, %v3761_v52 }
 0x3a2   : > { %v3940_v44 = vpop.f32.mrf.mxu3 }
 0x3a3   : > { %v3882_v5 = vpop.f32.mrf.mxu2  ;;  %v3951_v26 = vadd.f32 %v3940_v44, %v3887_v2  ;;  %v6313_v2 = vld [vmem:[%s6360_s5 + $0x5] ss:$0 sm:$0xff] }
 0x3a4   : > { %v3998_v1 = vpop.f32.mrf.mxu0  ;;  %v3889_v35 = vadd.f32 %v3882_v5, %v3825_v0 }
 0x3a5   : > { %v4062_v4 = vpop.f32.mrf.mxu1  ;;  %v4013_v28 = vadd.f32 %v3998_v1, %v3949_v15  ;;  %v6294_v15 = vld [vmem:[%s6360_s5 + $0x2] ss:$0 sm:$0xff] }
 0x3a7   : > { %v4077_v37 = vadd.f32 %v4062_v4, %v4013_v28 }
 0x3aa   : > { %v3943_v42 = vpop.f32.mrf.mxu3 }
 0x3ab   : > { %v4123_v50 = vpop.f32.mrf.mxu2  ;;  %v3952_v29 = vadd.f32 %v3943_v42, %v3888_v51 }
 0x3ac   : > { %v4001_v34 = vpop.f32.mrf.mxu0  ;;  %v4138_v46 = vadd.f32 %v4123_v50, %v4077_v37  ;;  %v6299_v37 = vld [vmem:[%s6360_s5 + $0x3] ss:$0 sm:$0xff] }
 0x3ad   : > { %v4065_v60 = vpop.f32.mrf.mxu1  ;;  %v4014_v23 = vadd.f32 %v4001_v34, %v3950_v63  ;;  %v6306_v63 = vld [vmem:[%s6360_s5 + $0x4] ss:$0 sm:$0xff] }
 0x3af   : > { %v4078_v48 = vadd.f32 %v4065_v60, %v4014_v23 }
 0x3b2   : > { %v3946_v36 = vpop.f32.mrf.mxu3 }
 0x3b3   : > { %v4126_v27 = vpop.f32.mrf.mxu2  ;;  %v3953_v1 = vadd.f32 %v3946_v36, %v3889_v35 }
 0x3b4   : > { %v4004_v7 = vpop.f32.mrf.mxu0  ;;  %v4139_v20 = vadd.f32 %v4126_v27, %v4078_v48 }
 0x3b5   : > { %v4068_v22 = vpop.f32.mrf.mxu1  ;;  %v4015_v41 = vadd.f32 %v4004_v7, %v3951_v26 }
 0x3b7   : > { %v4079_v24 = vadd.f32 %v4068_v22, %v4015_v41 }
 0x3ba   : > { %v4184_v19 = vpop.f32.mrf.mxu3 }
 0x3bb   : > { %v4199_v12 = vadd.f32 %v4184_v19, %v4138_v46  ;;  %v4129_v32 = vpop.f32.mrf.mxu2 }
 0x3bc   : > { %v4007_v8 = vpop.f32.mrf.mxu0  ;;  %v4140_v33 = vadd.f32 %v4129_v32, %v4079_v24 }
 0x3bd   : > { %v4204_v43 = vmul.f32 0.01, %v4199_v12  ;;  %v4016_v31 = vadd.f32 %v4007_v8, %v3952_v29  ;;  %v4071_v38 = vpop.f32.mrf.mxu1 }
 0x3bf   : > { %v4209_v11 = vmax.f32 %v4199_v12, %v4204_v43  ;;  %v4080_v3 = vadd.f32 %v4071_v38, %v4016_v31 }
 0x3c1   : > { %4215 = vst.msk [vmem:[#allocation5] sm:$0xff] %vm4214_vm3, %v4209_v11 }
 0x3c2   : > { %v4187_v45 = vpop.f32.mrf.mxu3 }
 0x3c3   : > { %v4200_v6 = vadd.f32 %v4187_v45, %v4139_v20  ;;  %v4132_v61 = vpop.f32.mrf.mxu2  ;;  %v6319_v20 = vld [vmem:[%s6360_s5 + $0x6] ss:$0 sm:$0xff] }
 0x3c4   : > { %v4010_v39 = vpop.f32.mrf.mxu0  ;;  %v4141_v10 = vadd.f32 %v4132_v61, %v4080_v3 }
 0x3c5   : > { %v4205_v17 = vmul.f32 0.01, %v4200_v6  ;;  %v4017_v42 = vadd.f32 %v4010_v39, %v3953_v1  ;;  %v4074_v53 = vpop.f32.mrf.mxu1 }
 0x3c7   : > { %v4210_v57 = vmax.f32 %v4200_v6, %v4205_v17  ;;  %v4081_v28 = vadd.f32 %v4074_v53, %v4017_v42 }
 0x3c8   : > { %v4226_v21 = vld [vmem:[#allocation5] sm:$0xf] }
 0x3c9   : > { %4228 = vst.msk [vmem:[#allocation3 + $0x7] sm:$0xf] %vm4227_vm4, %v4226_v21 }
 0x3ca   : > { %4216 = vst.msk [vmem:[#allocation5 + $0x8] sm:$0xff] %vm4214_vm3, %v4210_v57  ;;  %v4190_v30 = vpop.f32.mrf.mxu3  ;;  %v5173_v57 = vld [vmem:[%s6360_s5 + $0x8] ss:$0 sm:$0xff] }
 0x3cb   : > { %v4201_v18 = vadd.f32 %v4190_v30, %v4140_v33  ;;  %v4135_v34 = vpop.f32.mrf.mxu2 }
 0x3cc   : > { %v4142_v27 = vadd.f32 %v4135_v34, %v4081_v28 }
 0x3cd   : > { %v4206_v40 = vmul.f32 0.01, %v4201_v18 }
 0x3cf   : > { %v4211_v49 = vmax.f32 %v4201_v18, %v4206_v40 }
 0x3d0   : > { %v4235_v13 = vld [vmem:[#allocation3] sm:$0xff] }
 0x3d1   : > { %v4248_v44 = vld [vmem:[#allocation3 + $0x1] sm:$0xff]  ;;  %v4229_v59 = vld [vmem:[#allocation5 + $0xa] sm:$0xf]  ;;  %4217 = vst.msk [vmem:[#allocation5 + $0x10] sm:$0xff] %vm4214_vm3, %v4211_v49  ;;  %v4242_v4 = vmul.f32 %v6280_v55, %v4235_v13 }
 0x3d2   : > { %4230 = vst.msk [vmem:[#allocation3 + $0xd] sm:$0xf] %vm4227_vm4, %v4229_v59  ;;  %v4193_v5 = vpop.f32.mrf.mxu3  ;;  %v4256_v50 = vmul.f32 %v6285_v62, %v4248_v44  ;;  %v4262_v36 = vld [vmem:[#allocation3 + $0x2] sm:$0xff] }
 0x3d3   : > { %v4202_v47 = vadd.f32 %v4193_v5, %v4141_v10  ;;  %v4270_v58 = vmul.f32 %v6294_v15, %v4262_v36 }
 0x3d4   : > { %v4259_v14 = vadd.f32 %v4256_v50, %v4242_v4 }
 0x3d5   : > { %v4207_v54 = vmul.f32 0.01, %v4202_v47 }
 0x3d6   : > { %v4273_v9 = vadd.f32 %v4270_v58, %v4259_v14 }
 0x3d7   : > { %v4212_v56 = vmax.f32 %v4202_v47, %v4207_v54 }
 0x3d8   : > { %v4231_v60 = vld [vmem:[#allocation5 + $0x14] sm:$0xf] }
 0x3d9   : > { %4232 = vst.msk [vmem:[#allocation3 + $0x13] sm:$0xf] %vm4227_vm4, %v4231_v60  ;;  %v4276_v19 = vld [vmem:[#allocation3 + $0x6] sm:$0xff] }
 0x3da   : > { %4218 = vst.msk [vmem:[#allocation5 + $0x18] sm:$0xff] %vm4214_vm3, %v4212_v56  ;;  %v4196_v46 = vpop.f32.mrf.mxu3  ;;  %v4290_v23 = vld [vmem:[#allocation3 + $0x7] sm:$0xff]  ;;  %v4284_v43 = vmul.f32 %v6299_v37, %v4276_v19 }
 0x3db   : > { %v4203_v12 = vadd.f32 %v4196_v46, %v4142_v27  ;;  %v4236_v7 = vld [vmem:[#allocation3 + $0x8] sm:$0xff]  ;;  %v4298_v26 = vmul.f32 %v6306_v63, %v4290_v23 }
 0x3dc   : > { %v4249_v48 = vld [vmem:[#allocation3 + $0x9] sm:$0xff]  ;;  %v4287_v16 = vadd.f32 %v4284_v43, %v4273_v9  ;;  %v4243_v22 = vmul.f32 %v6280_v55, %v4236_v7  ;;  %v4310_v6 = vmul.f32 %v6313_v2, %v4236_v7  ;;  %v4332_v9 = vld [vmem:[#allocation3 + $0x1d] sm:$0xff] }
 0x3dd   : > { %v4208_v11 = vmul.f32 0.01, %v4203_v12  ;;  %v4257_v45 = vmul.f32 %v6285_v62, %v4249_v48  ;;  %v4263_v21 = vld [vmem:[#allocation3 + $0xa] sm:$0xff] }
 0x3de   : > { %v4301_v41 = vadd.f32 %v4298_v26, %v4287_v16  ;;  %v4271_v31 = vmul.f32 %v6294_v15, %v4263_v21  ;;  %v4340_v26 = vmul.f32 %v5172_v25, %v4332_v9 }
 0x3df   : > { %v4213_v32 = vmax.f32 %v4203_v12, %v4208_v11  ;;  %v4260_v29 = vadd.f32 %v4257_v45, %v4243_v22  ;;  %v4344_v11 = vld [vmem:[#allocation3 + $0x1e] sm:$0xff] }
 0x3e0   : > { %v4316_v17 = vld [vmem:[#allocation3 + $0xc] sm:$0xff]  ;;  %v4313_v8 = vadd.f32 %v4310_v6, %v4301_v41 }
 0x3e1   : > { %4219 = vst.msk [vmem:[#allocation5 + $0x20] sm:$0xff] %vm4214_vm3, %v4213_v32  ;;  %v4324_v51 = vmul.f32 %v6319_v20, %v4316_v17  ;;  %v4330_v24 = vld [vmem:[#allocation3 + $0xd] sm:$0xff]  ;;  %v4274_v0 = vadd.f32 %v4271_v31, %v4260_v29  ;;  %v4352_v32 = vmul.f32 %v5173_v57, %v4344_v11 }
 0x3e2   : > { %v4277_v52 = vld [vmem:[#allocation3 + $0xe] sm:$0xff]  ;;  %v4338_v30 = vmul.f32 %v5172_v25, %v4330_v24 }
 0x3e3   : > { %v4327_v33 = vadd.f32 %v4324_v51, %v4313_v8  ;;  %v4350_v38 = vmul.f32 %v5173_v57, %v4277_v52  ;;  %v4285_v61 = vmul.f32 %v6299_v37, %v4277_v52  ;;  %v4291_v3 = vld [vmem:[#allocation3 + $0xf] sm:$0xff] }
 0x3e4   : > { %v4299_v13 = vmul.f32 %v6306_v63, %v4291_v3  ;;  %v4237_v44 = vld [vmem:[#allocation3 + $0x10] sm:$0xff] }
 0x3e5   : > { %v4341_v18 = vadd.f32 %v4338_v30, %v4327_v33  ;;  %v4288_v39 = vadd.f32 %v4285_v61, %v4274_v0  ;;  %v4250_v1 = vld [vmem:[#allocation3 + $0x11] sm:$0xff]  ;;  %v4244_v59 = vmul.f32 %v6280_v55, %v4237_v44  ;;  %v4311_v42 = vmul.f32 %v6313_v2, %v4237_v44 }
 0x3e6   : > { %v4258_v5 = vmul.f32 %v6285_v62, %v4250_v1 }
 0x3e7   : > { %v4353_v40 = vadd.f32 %v4350_v38, %v4341_v18  ;;  %v4302_v10 = vadd.f32 %v4299_v13, %v4288_v39 }
 0x3e8   : > { %v4233_v35 = vld [vmem:[#allocation5 + $0x1e] sm:$0xf]  ;;  %v4261_v36 = vadd.f32 %v4258_v5, %v4244_v59 }
 0x3e9   : > { %4234 = vst.msk [vmem:[#allocation3 + $0x19] sm:$0xf] %vm4227_vm4, %v4233_v35  ;;  %v4356_v49 = vsel %vm4214_vm3, %v4353_v40, 0.0  ;;  %v4314_v53 = vadd.f32 %v4311_v42, %v4302_v10 }
 0x3ea   : > { %4357 = vadd.xlane.f32.xlu0 %v4356_v49 }
 0x3f0   : > { %v4317_v47 = vld [vmem:[#allocation3 + $0x14] sm:$0xff]  ;;  %v4318_v7 = vld [vmem:[#allocation3 + $0x1c] sm:$0xff] }
 0x3f1   : > { %v4331_v4 = vld [vmem:[#allocation3 + $0x15] sm:$0xff]  ;;  %v4325_v54 = vmul.f32 %v6319_v20, %v4317_v47 }
 0x3f2   : > { %v4278_v50 = vld [vmem:[#allocation3 + $0x16] sm:$0xff]  ;;  %v4339_v14 = vmul.f32 %v5172_v25, %v4331_v4 }
 0x3f3   : > { %v4264_v34 = vld [vmem:[#allocation3 + $0x12] sm:$0xff]  ;;  %v4328_v56 = vadd.f32 %v4325_v54, %v4314_v53  ;;  %v4286_v55 = vmul.f32 %v6299_v37, %v4278_v50  ;;  %v4351_v62 = vmul.f32 %v5173_v57, %v4278_v50  ;;  %v4326_v37 = vmul.f32 %v6319_v20, %v4318_v7 }
 0x3f4   : > { %v4272_v28 = vmul.f32 %v6294_v15, %v4264_v34  ;;  %v4292_v60 = vld [vmem:[#allocation3 + $0x17] sm:$0xff] }
 0x3f5   : > { %v4342_v58 = vadd.f32 %v4339_v14, %v4328_v56  ;;  %v4304_v46 = vld [vmem:[#allocation3 + $0x18] sm:$0xff]  ;;  %v4300_v23 = vmul.f32 %v6306_v63, %v4292_v60 }
 0x3f6   : > { %v4275_v27 = vadd.f32 %v4272_v28, %v4261_v36  ;;  %v4312_v48 = vmul.f32 %v6313_v2, %v4304_v46 }
 0x3f7   : > { %v4354_v12 = vadd.f32 %v4351_v62, %v4342_v58 }
 0x3f8   : > { %v4289_v19 = vadd.f32 %v4286_v55, %v4275_v27 }
 0x3f9   : > { %v4359_v15 = vsel %vm4214_vm3, %v4354_v12, 0.0 }
 0x3fa   : > { %v4303_v43 = vadd.f32 %v4300_v23, %v4289_v19  ;;  %4360 = vadd.xlane.f32.xlu0 %v4359_v15 }
 0x3fc   : > { %v4315_v16 = vadd.f32 %v4312_v48, %v4303_v43 }
 0x3fe   : > { %v4329_v22 = vadd.f32 %v4326_v37, %v4315_v16 }
 0x400   : > { %v4343_v45 = vadd.f32 %v4340_v26, %v4329_v22 }
 0x402   : > { %v4355_v41 = vadd.f32 %v4352_v32, %v4343_v45 }
 0x404   : > { %v4362_v63 = vsel %vm4214_vm3, %v4355_v41, 0.0 }
 0x405   : > { %4363 = vadd.xlane.f32.xlu1 %v4362_v63 }
 0x45d   : > { %v4358_v6 = vpop.xlane.xlu0 %4357 }
 0x45e   : > { %4366 = vst.msk [vmem:[#allocation6] sm:$0xff] %vm4365_vm5, %v4358_v6 }
 0x465   : > { %v4369_v2 = vld [vmem:[#allocation6] sm:$0xf] }
 0x466   : > { %4371 = vst.msk [vmem:[%s251_s28] sm:$0xf] %vm4370_vm6, %v4369_v2 }
 0x46d   : > { %v4361_v20 = vpop.xlane.xlu0 %4360 }
 0x46e   : > { %4367 = vst.msk [vmem:[#allocation6 + $0x8] sm:$0xff] %vm4365_vm5, %v4361_v20 }
 0x475   : > { %v4372_v25 = vld [vmem:[#allocation6 + $0x6] sm:$0xf]  ;;  %v4374_v17 = vld [vmem:[#allocation6 + $0xc] sm:$0xf] }
 0x476   : > { %4373 = vst.msk [vmem:[%s251_s28 + $0x4] sm:$0xf] %vm4370_vm6, %v4372_v25 }
 0x477   : > { %4375 = vst.msk [vmem:[%s251_s28 + $0x8] sm:$0xf] %vm4370_vm6, %v4374_v17 }
 0x478   : > { %v4364_v8 = vpop.xlane.xlu1 %4363 }
 0x479   : > { %4368 = vst.msk [vmem:[#allocation6 + $0x10] sm:$0xff] %vm4365_vm5, %v4364_v8 }
 0x480   : > { %v4376_v51 = vld [vmem:[#allocation6 + $0x12] sm:$0xf] }
 0x481   : > { %4377 = vst.msk [vmem:[%s251_s28 + $0xc] sm:$0xf] %vm4370_vm6, %v4376_v51 }
 0x482 PF: > { %s16_s21 = sadd.s32 1, %s5180_s21  }
 0x483   : > { %p13_p4 = scmp.ge.s32.totalorder %s16_s21, 4  }
 0x485   :  { %15 = sbr.rel (!%p13_p4) target bundleno = 1 (0x1), region = 370 }

</bundles_post_ra>
